<compile_context>
chip_gen: v7x
topology: tpu7x:2x2x1
jax: 0.10.0
libtpu: 0.0.40
codegen_flags: <defaults>
</compile_context>

<pallas_src>
import jax
import jax.numpy as jnp
from jax.experimental import pallas as pl
from jax.experimental.pallas import tpu as pltpu

INPUT_SIZE = 21
HIDDEN_SIZE = 256
FC_HIDDEN = 128
OUTPUT_SIZE = 2
OUT_PAD = 128          # lane-dense padded head width; sliced back to OUTPUT_SIZE in the wrapper
NUM_LAYERS = 3
BATCH = 2
SEQ = 8


def _sigmoid(x):
    # single EUP tanh instead of exp + full-precision divide (algebraically exact)
    return 0.5 * jnp.tanh(0.5 * x) + 0.5


def qnet_kernel(xw0_ref, wih_ref, whh_ref, b_ref,
                fc1w_ref, fc1b_ref, fc2w_ref, fc2b_ref,
                out_ref, carry_ref, xw_ref):
    """One grid step == one LSTM layer.
    carry_ref (VMEM scratch, (T*B, H) f32): previous layer's time-major output / next layer's input.
    xw_ref    (VMEM scratch, (T*B, 4H) f32): this layer's batched input projection (+bias), staged
              so the unrolled timestep loop only keeps a 2-row slice live per step."""
    l = pl.program_id(0)
    B, T, H = BATCH, SEQ, HIDDEN_SIZE

    # ---- batched input projection for ALL timesteps, off the serial h->h critical path ----
    @pl.when(l == 0)
    def _():
        # layer-0 projection (x @ wih0 + b0) was computed in the wrapper (avoids DMAing the
        # 235 zero-padded rows of wih0)
        xw_ref[...] = xw0_ref[...]

    @pl.when(l > 0)
    def _():
        xw_ref[...] = (jnp.dot(carry_ref[...].astype(jnp.bfloat16), wih_ref[...],
                               preferred_element_type=jnp.float32) + b_ref[...])

    whh = whh_ref[...]                       # (H, 4H) bf16, gate-permuted [i, f, o, g]
    write_carry = l < NUM_LAYERS - 1         # top layer only needs its final h

    # TODO(synk): whh is re-pushed to the MXU every timestep; a weight-stationary recurrence via
    # explicit MXU driving (matmul_push_rhs once/layer) would cut the serial path but has
    # chip-dependent staging-register constraints, so jnp.dot is kept for portability.
    h = jnp.zeros((B, H), jnp.float32)
    c = jnp.zeros((B, H), jnp.float32)
    for t in range(T):                       # small, fully unrolled, static indices
        gates = xw_ref[t * B:(t + 1) * B, :] + jnp.dot(
            h.astype(jnp.bfloat16), whh, preferred_element_type=jnp.float32)
        # permuted gate layout [i, f, o, g]: one sigmoid slab + one tanh slab
        s = _sigmoid(gates[:, :3 * H])       # (B, 3H): i | f | o
        g_g = jnp.tanh(gates[:, 3 * H:])     # (B, H)
        c = s[:, H:2 * H] * c + s[:, :H] * g_g
        h = s[:, 2 * H:3 * H] * jnp.tanh(c)

        @pl.when(write_carry)
        def _(h=h, t=t):
            carry_ref[t * B:(t + 1) * B, :] = h     # feeds the next layer

    # ---- head: only on the last layer; `h` is the top layer's last-timestep output ----
    @pl.when(l == NUM_LAYERS - 1)
    def _():
        z = jnp.dot(h.astype(jnp.bfloat16), fc1w_ref[...],
                    preferred_element_type=jnp.float32) + fc1b_ref[...]
        z = jnp.where(z >= 0.0, z, 0.01 * z)                      # LeakyReLU(0.01)
        z = jnp.dot(z.astype(jnp.bfloat16), fc2w_ref[...],
                    preferred_element_type=jnp.float32) + fc2b_ref[...]
        out_ref[...] = _sigmoid(z)                                # (B, OUT_PAD), lane-dense store


def init_params(key):
    """Deterministic synthetic init, PyTorch-style shapes/bounds (weights stored transposed:
    wih_l (in_l, 4H), whh_l (H, 4H), biases as (1, 4H) rows; gate order [i, f, g, o])."""
    H, I = HIDDEN_SIZE, INPUT_SIZE
    k_lstm = 1.0 / jnp.sqrt(H)
    keys = iter(jax.random.split(key, 32))
    params = {}
    for l in range(NUM_LAYERS):
        in_l = I if l == 0 else H
        params[f"wih{l}"] = jax.random.uniform(next(keys), (in_l, 4 * H), jnp.float32, -k_lstm, k_lstm)
        params[f"whh{l}"] = jax.random.uniform(next(keys), (H, 4 * H), jnp.float32, -k_lstm, k_lstm)
        b_ih = jax.random.uniform(next(keys), (1, 4 * H), jnp.float32, -k_lstm, k_lstm)
        b_hh = jax.random.uniform(next(keys), (1, 4 * H), jnp.float32, -k_lstm, k_lstm)
        params[f"b{l}"] = b_ih + b_hh
    k1 = 1.0 / jnp.sqrt(H)
    params["fc1w"] = jax.random.uniform(next(keys), (H, FC_HIDDEN), jnp.float32, -k1, k1)
    params["fc1b"] = jax.random.uniform(next(keys), (1, FC_HIDDEN), jnp.float32, -k1, k1)
    k2 = 1.0 / jnp.sqrt(FC_HIDDEN)
    params["fc2w"] = jax.random.uniform(next(keys), (FC_HIDDEN, OUTPUT_SIZE), jnp.float32, -k2, k2)
    params["fc2b"] = jax.random.uniform(next(keys), (1, OUTPUT_SIZE), jnp.float32, -k2, k2)
    return params


def qnet_forward(x, params):
    B, T, I = x.shape
    H = HIDDEN_SIZE
    bf = jnp.bfloat16

    # ---- layout plumbing (wrapper-side; free relative to the kernel) ----
    # time-major flatten: row t*B + b
    x_tm = jnp.transpose(x, (1, 0, 2)).reshape(T * B, I)

    def permute_gates(w):  # columns [i, f, g, o] -> [i, f, o, g]
        return jnp.concatenate([w[..., :2 * H], w[..., 3 * H:], w[..., 2 * H:3 * H]], axis=-1)

    # layer-0 input projection done here as one tiny XLA matmul (same bf16-operand / f32-accum
    # precision as the kernel) -> no zero-padded wih0 DMA, no l==0 special case for wih/b.
    wih0 = permute_gates(params["wih0"]).astype(bf)                               # (21, 4H) bf16
    b0 = permute_gates(params["b0"])                                              # (1, 4H) f32
    xw0 = jnp.dot(x_tm.astype(bf), wih0, preferred_element_type=jnp.float32) + b0  # (T*B, 4H) f32

    wih_rest = jnp.stack([permute_gates(params[f"wih{l}"])
                          for l in range(1, NUM_LAYERS)]).astype(bf)              # (2, H, 4H) bf16
    whh_all = jnp.stack([permute_gates(params[f"whh{l}"])
                         for l in range(NUM_LAYERS)]).astype(bf)                  # (3, H, 4H) bf16
    b_rest = jnp.stack([permute_gates(params[f"b{l}"])
                        for l in range(1, NUM_LAYERS)])                           # (2, 1, 4H) f32

    fc1w = params["fc1w"].astype(bf)
    fc1b = params["fc1b"]
    # pad the 2-wide head to 128 lanes (unmasked stores); sliced back below
    fc2w = jnp.pad(params["fc2w"], ((0, 0), (0, OUT_PAD - OUTPUT_SIZE))).astype(bf)
    fc2b = jnp.pad(params["fc2b"], ((0, 0), (0, OUT_PAD - OUTPUT_SIZE)))

    out_padded = pl.pallas_call(
        qnet_kernel,
        out_shape=jax.ShapeDtypeStruct((B, OUT_PAD), jnp.float32),
        grid_spec=pltpu.PrefetchScalarGridSpec(
            num_scalar_prefetch=0,
            grid=(NUM_LAYERS,),
            in_specs=[
                pl.BlockSpec((T * B, 4 * H), lambda l: (0, 0)),                   # xw0 (resident)
                pl.BlockSpec((None, H, 4 * H),
                             lambda l: (jnp.maximum(l - 1, 0), 0, 0)),            # wih, layers 1..2
                pl.BlockSpec((None, H, 4 * H), lambda l: (l, 0, 0)),              # whh, pipelined
                pl.BlockSpec((None, 1, 4 * H),
                             lambda l: (jnp.maximum(l - 1, 0), 0, 0)),            # bias, layers 1..2
                pl.BlockSpec((H, FC_HIDDEN), lambda l: (0, 0)),                   # fc weights: resident
                pl.BlockSpec((1, FC_HIDDEN), lambda l: (0, 0)),
                pl.BlockSpec((FC_HIDDEN, OUT_PAD), lambda l: (0, 0)),
                pl.BlockSpec((1, OUT_PAD), lambda l: (0, 0)),
            ],
            out_specs=pl.BlockSpec((B, OUT_PAD), lambda l: (0, 0)),
            scratch_shapes=[pltpu.VMEM((T * B, H), jnp.float32),       # layer-to-layer carry
                            pltpu.VMEM((T * B, 4 * H), jnp.float32)],  # staged input projection
        ),
        compiler_params=pltpu.CompilerParams(dimension_semantics=("arbitrary",)),
    )(xw0, wih_rest, whh_all, b_rest, fc1w, fc1b, fc2w, fc2b)

    return out_padded[:, :OUTPUT_SIZE]


def qnet_forward_ref(x, params):
    """Pure-JAX reference with identical semantics AND identical precision choices
    (bf16 matmul operands, f32 accumulation / elementwise) for a tight correctness check."""
    B, T, _ = x.shape
    H = HIDDEN_SIZE
    bf = jnp.bfloat16
    layer_in = x
    for l in range(NUM_LAYERS):
        wih = params[f"wih{l}"].astype(bf)
        whh = params[f"whh{l}"].astype(bf)
        b = params[f"b{l}"]
        h = jnp.zeros((B, H), jnp.float32)
        c = jnp.zeros((B, H), jnp.float32)
        outs = []
        for t in range(T):
            gates = (jnp.dot(layer_in[:, t, :].astype(bf), wih, preferred_element_type=jnp.float32)
                     + jnp.dot(h.astype(bf), whh, preferred_element_type=jnp.float32)
                     + b)
            i_g = jax.nn.sigmoid(gates[:, 0 * H:1 * H])
            f_g = jax.nn.sigmoid(gates[:, 1 * H:2 * H])
            g_g = jnp.tanh(gates[:, 2 * H:3 * H])
            o_g = jax.nn.sigmoid(gates[:, 3 * H:4 * H])
            c = f_g * c + i_g * g_g
            h = o_g * jnp.tanh(c)
            outs.append(h)
        layer_in = jnp.stack(outs, axis=1)
    last = layer_in[:, -1, :]
    z = jnp.dot(last.astype(bf), params["fc1w"].astype(bf),
                preferred_element_type=jnp.float32) + params["fc1b"]
    z = jnp.where(z >= 0.0, z, 0.01 * z)
    z = jnp.dot(z.astype(bf), params["fc2w"].astype(bf),
                preferred_element_type=jnp.float32) + params["fc2b"]
    return jax.nn.sigmoid(z)


if __name__ == "__main__":
    key = jax.random.PRNGKey(0)
    k_x, k_p = jax.random.split(key)
    x = jax.random.normal(k_x, (BATCH, SEQ, INPUT_SIZE), jnp.float32)
    params = init_params(k_p)

    out = jax.block_until_ready(jax.jit(qnet_forward)(x, params))
    ref = jax.block_until_ready(qnet_forward_ref(x, params))

    assert out.shape == (BATCH, OUTPUT_SIZE)
    assert jnp.allclose(out, ref, atol=2e-3, rtol=2e-3), (out, ref)

    print("KERNEL_OK")
</pallas_src>

<mosaic_0001>
module attributes {stable_mosaic.version = 11 : i64} {
  func.func @qnet_kernel(%arg0: i32, %arg1: memref<16x1024xf32, #tpu.memory_space<vmem>>, %arg2: memref<1x256x1024xbf16, #tpu.memory_space<vmem>>, %arg3: memref<1x256x1024xbf16, #tpu.memory_space<vmem>>, %arg4: memref<1x1x1024xf32, #tpu.memory_space<vmem>>, %arg5: memref<256x128xbf16, #tpu.memory_space<vmem>>, %arg6: memref<1x128xf32, #tpu.memory_space<vmem>>, %arg7: memref<128x128xbf16, #tpu.memory_space<vmem>>, %arg8: memref<1x128xf32, #tpu.memory_space<vmem>>, %arg9: memref<2x128xf32, #tpu.memory_space<vmem>>, %arg10: memref<16x256xf32, #tpu.memory_space<vmem>>, %arg11: memref<16x1024xf32, #tpu.memory_space<vmem>>) attributes {dimension_semantics = [#tpu.dimension_semantics<arbitrary>], iteration_bounds = array<i64: 3>, scalar_prefetch = 0 : i64, scratch_operands = 2 : i64, tpu.core_type = #tpu.core_type<tc>, window_params = [{pipeline_mode = #tpu.pipeline_mode<synchronous>, transform_indices = @transform_0, window_bounds = array<i64: 16, 1024>}, {transform_indices = @transform_1, window_bounds = array<i64: 1, 256, 1024>}, {transform_indices = @transform_2, window_bounds = array<i64: 1, 256, 1024>}, {transform_indices = @transform_3, window_bounds = array<i64: 1, 1, 1024>}, {pipeline_mode = #tpu.pipeline_mode<synchronous>, transform_indices = @transform_4, window_bounds = array<i64: 256, 128>}, {pipeline_mode = #tpu.pipeline_mode<synchronous>, transform_indices = @transform_5, window_bounds = array<i64: 1, 128>}, {pipeline_mode = #tpu.pipeline_mode<synchronous>, transform_indices = @transform_6, window_bounds = array<i64: 128, 128>}, {pipeline_mode = #tpu.pipeline_mode<synchronous>, transform_indices = @transform_7, window_bounds = array<i64: 1, 128>}, {pipeline_mode = #tpu.pipeline_mode<synchronous>, transform_indices = @transform_8, window_bounds = array<i64: 2, 128>}]} {
    %c0_i32 = arith.constant 0 : i32
    %0 = arith.cmpi eq, %arg0, %c0_i32 : i32
    %1 = arith.extui %0 : i1 to i32
    %c0_i32_0 = arith.constant 0 : i32
    %2 = arith.cmpi ne, %1, %c0_i32_0 : i32
    scf.if %2 {
      %c0_57 = arith.constant 0 : index
      %c0_58 = arith.constant 0 : index
      %206 = vector.load %arg1[%c0_57, %c0_58] : memref<16x1024xf32, #tpu.memory_space<vmem>>, vector<16x1024xf32>
      %c0_59 = arith.constant 0 : index
      %c0_60 = arith.constant 0 : index
      %207 = vector.load %arg11[%c0_59, %c0_60] : memref<16x1024xf32, #tpu.memory_space<vmem>>, vector<16x1024xf32>
      tpu.vector_store %arg11[%c0_59, %c0_60], %206 {strides = array<i32>} : memref<16x1024xf32, #tpu.memory_space<vmem>>, vector<16x1024xf32>,
    } else {
    }
    %c0_i32_1 = arith.constant 0 : i32
    %3 = arith.cmpi sgt, %arg0, %c0_i32_1 : i32
    %4 = arith.extui %3 : i1 to i32
    %c0_i32_2 = arith.constant 0 : i32
    %5 = arith.cmpi ne, %4, %c0_i32_2 : i32
    scf.if %5 {
      %c0_57 = arith.constant 0 : index
      %c0_58 = arith.constant 0 : index
      %206 = vector.load %arg10[%c0_57, %c0_58] : memref<16x256xf32, #tpu.memory_space<vmem>>, vector<16x256xf32>
      %207 = arith.truncf %206 : vector<16x256xf32> to vector<16x256xbf16>
      %c0_59 = arith.constant 0 : index
      %c0_60 = arith.constant 0 : index
      %c0_61 = arith.constant 0 : index
      %208 = vector.load %arg2[%c0_59, %c0_60, %c0_61] : memref<1x256x1024xbf16, #tpu.memory_space<vmem>>, vector<1x256x1024xbf16>
      %209 = vector.shape_cast %208 : vector<1x256x1024xbf16> to vector<256x1024xbf16>
      %cst_62 = arith.constant dense<0.000000e+00> : vector<16x1024xf32>
      %210 = tpu.matmul %207, %209, %cst_62 {dimension_numbers = #tpu.dot_dimension_numbers<[1], [0], [0], [1], [0, 0, 1, 1], [], []>} : vector<16x256xbf16>, vector<256x1024xbf16>, vector<16x1024xf32> -> vector<16x1024xf32>
      %c0_63 = arith.constant 0 : index
      %c0_64 = arith.constant 0 : index
      %c0_65 = arith.constant 0 : index
      %211 = vector.load %arg4[%c0_63, %c0_64, %c0_65] : memref<1x1x1024xf32, #tpu.memory_space<vmem>>, vector<1x1x1024xf32>
      %212 = vector.shape_cast %211 : vector<1x1x1024xf32> to vector<1x1024xf32>
      %213 = vector.broadcast %212 : vector<1x1024xf32> to vector<16x1024xf32>
      %214 = arith.addf %210, %213 : vector<16x1024xf32>
      %c0_66 = arith.constant 0 : index
      %c0_67 = arith.constant 0 : index
      %215 = vector.load %arg11[%c0_66, %c0_67] : memref<16x1024xf32, #tpu.memory_space<vmem>>, vector<16x1024xf32>
      tpu.vector_store %arg11[%c0_66, %c0_67], %214 {strides = array<i32>} : memref<16x1024xf32, #tpu.memory_space<vmem>>, vector<16x1024xf32>,
    } else {
    }
    %c0 = arith.constant 0 : index
    %c0_3 = arith.constant 0 : index
    %c0_4 = arith.constant 0 : index
    %6 = vector.load %arg3[%c0, %c0_3, %c0_4] : memref<1x256x1024xbf16, #tpu.memory_space<vmem>>, vector<1x256x1024xbf16>
    %7 = vector.shape_cast %6 : vector<1x256x1024xbf16> to vector<256x1024xbf16>
    %c2_i32 = arith.constant 2 : i32
    %8 = arith.cmpi slt, %arg0, %c2_i32 : i32
    %cst = arith.constant 0.000000e+00 : f32
    %9 = vector.broadcast %cst : f32 to vector<2x256xf32>
    %cst_5 = arith.constant 0.000000e+00 : f32
    %10 = vector.broadcast %cst_5 : f32 to vector<2x256xf32>
    %c0_6 = arith.constant 0 : index
    %c0_7 = arith.constant 0 : index
    %11 = vector.load %arg11[%c0_6, %c0_7] : memref<16x1024xf32, #tpu.memory_space<vmem>>, vector<2x1024xf32>
    %12 = arith.truncf %9 : vector<2x256xf32> to vector<2x256xbf16>
    %cst_8 = arith.constant dense<0.000000e+00> : vector<2x1024xf32>
    %13 = tpu.matmul %12, %7, %cst_8 {dimension_numbers = #tpu.dot_dimension_numbers<[1], [0], [0], [1], [0, 0, 1, 1], [], []>} : vector<2x256xbf16>, vector<256x1024xbf16>, vector<2x1024xf32> -> vector<2x1024xf32>
    %14 = arith.addf %11, %13 : vector<2x1024xf32>
    %15 = vector.extract_strided_slice %14 {offsets = [0, 0], sizes = [2, 768], strides = [1, 1]} : vector<2x1024xf32> to vector<2x768xf32>
    %cst_9 = arith.constant 5.000000e-01 : f32
    %16 = vector.broadcast %cst_9 : f32 to vector<2x768xf32>
    %17 = arith.mulf %16, %15 : vector<2x768xf32>
    %18 = math.tanh %17 : vector<2x768xf32>
    %cst_10 = arith.constant 5.000000e-01 : f32
    %19 = vector.broadcast %cst_10 : f32 to vector<2x768xf32>
    %20 = arith.mulf %19, %18 : vector<2x768xf32>
    %cst_11 = arith.constant 5.000000e-01 : f32
    %21 = vector.broadcast %cst_11 : f32 to vector<2x768xf32>
    %22 = arith.addf %20, %21 : vector<2x768xf32>
    %23 = vector.extract_strided_slice %14 {offsets = [0, 768], sizes = [2, 256], strides = [1, 1]} : vector<2x1024xf32> to vector<2x256xf32>
    %24 = math.tanh %23 : vector<2x256xf32>
    %25 = vector.extract_strided_slice %22 {offsets = [0, 256], sizes = [2, 256], strides = [1, 1]} : vector<2x768xf32> to vector<2x256xf32>
    %26 = arith.mulf %25, %10 : vector<2x256xf32>
    %27 = vector.extract_strided_slice %22 {offsets = [0, 0], sizes = [2, 256], strides = [1, 1]} : vector<2x768xf32> to vector<2x256xf32>
    %28 = arith.mulf %27, %24 : vector<2x256xf32>
    %29 = arith.addf %26, %28 : vector<2x256xf32>
    %30 = vector.extract_strided_slice %22 {offsets = [0, 512], sizes = [2, 256], strides = [1, 1]} : vector<2x768xf32> to vector<2x256xf32>
    %31 = math.tanh %29 : vector<2x256xf32>
    %32 = arith.mulf %30, %31 : vector<2x256xf32>
    %33 = arith.extui %8 : i1 to i32
    %c0_i32_12 = arith.constant 0 : i32
    %34 = arith.cmpi ne, %33, %c0_i32_12 : i32
    scf.if %34 {
      %c0_57 = arith.constant 0 : index
      %c0_58 = arith.constant 0 : index
      %206 = vector.load %arg10[%c0_57, %c0_58] : memref<16x256xf32, #tpu.memory_space<vmem>>, vector<2x256xf32>
      tpu.vector_store %arg10[%c0_57, %c0_58], %32 {strides = array<i32>} : memref<16x256xf32, #tpu.memory_space<vmem>>, vector<2x256xf32>,
    } else {
    }
    %c2 = arith.constant 2 : index
    %c0_13 = arith.constant 0 : index
    %35 = vector.load %arg11[%c2, %c0_13] : memref<16x1024xf32, #tpu.memory_space<vmem>>, vector<2x1024xf32>
    %36 = arith.truncf %32 : vector<2x256xf32> to vector<2x256xbf16>
    %cst_14 = arith.constant dense<0.000000e+00> : vector<2x1024xf32>
    %37 = tpu.matmul %36, %7, %cst_14 {dimension_numbers = #tpu.dot_dimension_numbers<[1], [0], [0], [1], [0, 0, 1, 1], [], []>} : vector<2x256xbf16>, vector<256x1024xbf16>, vector<2x1024xf32> -> vector<2x1024xf32>
    %38 = arith.addf %35, %37 : vector<2x1024xf32>
    %39 = vector.extract_strided_slice %38 {offsets = [0, 0], sizes = [2, 768], strides = [1, 1]} : vector<2x1024xf32> to vector<2x768xf32>
    %cst_15 = arith.constant 5.000000e-01 : f32
    %40 = vector.broadcast %cst_15 : f32 to vector<2x768xf32>
    %41 = arith.mulf %40, %39 : vector<2x768xf32>
    %42 = math.tanh %41 : vector<2x768xf32>
    %cst_16 = arith.constant 5.000000e-01 : f32
    %43 = vector.broadcast %cst_16 : f32 to vector<2x768xf32>
    %44 = arith.mulf %43, %42 : vector<2x768xf32>
    %cst_17 = arith.constant 5.000000e-01 : f32
    %45 = vector.broadcast %cst_17 : f32 to vector<2x768xf32>
    %46 = arith.addf %44, %45 : vector<2x768xf32>
    %47 = vector.extract_strided_slice %38 {offsets = [0, 768], sizes = [2, 256], strides = [1, 1]} : vector<2x1024xf32> to vector<2x256xf32>
    %48 = math.tanh %47 : vector<2x256xf32>
    %49 = vector.extract_strided_slice %46 {offsets = [0, 256], sizes = [2, 256], strides = [1, 1]} : vector<2x768xf32> to vector<2x256xf32>
    %50 = arith.mulf %49, %29 : vector<2x256xf32>
    %51 = vector.extract_strided_slice %46 {offsets = [0, 0], sizes = [2, 256], strides = [1, 1]} : vector<2x768xf32> to vector<2x256xf32>
    %52 = arith.mulf %51, %48 : vector<2x256xf32>
    %53 = arith.addf %50, %52 : vector<2x256xf32>
    %54 = vector.extract_strided_slice %46 {offsets = [0, 512], sizes = [2, 256], strides = [1, 1]} : vector<2x768xf32> to vector<2x256xf32>
    %55 = math.tanh %53 : vector<2x256xf32>
    %56 = arith.mulf %54, %55 : vector<2x256xf32>
    %57 = arith.extui %8 : i1 to i32
    %c0_i32_18 = arith.constant 0 : i32
    %58 = arith.cmpi ne, %57, %c0_i32_18 : i32
    scf.if %58 {
      %c2_57 = arith.constant 2 : index
      %c0_58 = arith.constant 0 : index
      %206 = vector.load %arg10[%c2_57, %c0_58] : memref<16x256xf32, #tpu.memory_space<vmem>>, vector<2x256xf32>
      tpu.vector_store %arg10[%c2_57, %c0_58], %56 {strides = array<i32>} : memref<16x256xf32, #tpu.memory_space<vmem>>, vector<2x256xf32>,
    } else {
    }
    %c4 = arith.constant 4 : index
    %c0_19 = arith.constant 0 : index
    %59 = vector.load %arg11[%c4, %c0_19] : memref<16x1024xf32, #tpu.memory_space<vmem>>, vector<2x1024xf32>
    %60 = arith.truncf %56 : vector<2x256xf32> to vector<2x256xbf16>
    %cst_20 = arith.constant dense<0.000000e+00> : vector<2x1024xf32>
    %61 = tpu.matmul %60, %7, %cst_20 {dimension_numbers = #tpu.dot_dimension_numbers<[1], [0], [0], [1], [0, 0, 1, 1], [], []>} : vector<2x256xbf16>, vector<256x1024xbf16>, vector<2x1024xf32> -> vector<2x1024xf32>
    %62 = arith.addf %59, %61 : vector<2x1024xf32>
    %63 = vector.extract_strided_slice %62 {offsets = [0, 0], sizes = [2, 768], strides = [1, 1]} : vector<2x1024xf32> to vector<2x768xf32>
    %cst_21 = arith.constant 5.000000e-01 : f32
    %64 = vector.broadcast %cst_21 : f32 to vector<2x768xf32>
    %65 = arith.mulf %64, %63 : vector<2x768xf32>
    %66 = math.tanh %65 : vector<2x768xf32>
    %cst_22 = arith.constant 5.000000e-01 : f32
    %67 = vector.broadcast %cst_22 : f32 to vector<2x768xf32>
    %68 = arith.mulf %67, %66 : vector<2x768xf32>
    %cst_23 = arith.constant 5.000000e-01 : f32
    %69 = vector.broadcast %cst_23 : f32 to vector<2x768xf32>
    %70 = arith.addf %68, %69 : vector<2x768xf32>
    %71 = vector.extract_strided_slice %62 {offsets = [0, 768], sizes = [2, 256], strides = [1, 1]} : vector<2x1024xf32> to vector<2x256xf32>
    %72 = math.tanh %71 : vector<2x256xf32>
    %73 = vector.extract_strided_slice %70 {offsets = [0, 256], sizes = [2, 256], strides = [1, 1]} : vector<2x768xf32> to vector<2x256xf32>
    %74 = arith.mulf %73, %53 : vector<2x256xf32>
    %75 = vector.extract_strided_slice %70 {offsets = [0, 0], sizes = [2, 256], strides = [1, 1]} : vector<2x768xf32> to vector<2x256xf32>
    %76 = arith.mulf %75, %72 : vector<2x256xf32>
    %77 = arith.addf %74, %76 : vector<2x256xf32>
    %78 = vector.extract_strided_slice %70 {offsets = [0, 512], sizes = [2, 256], strides = [1, 1]} : vector<2x768xf32> to vector<2x256xf32>
    %79 = math.tanh %77 : vector<2x256xf32>
    %80 = arith.mulf %78, %79 : vector<2x256xf32>
    %81 = arith.extui %8 : i1 to i32
    %c0_i32_24 = arith.constant 0 : i32
    %82 = arith.cmpi ne, %81, %c0_i32_24 : i32
    scf.if %82 {
      %c4_57 = arith.constant 4 : index
      %c0_58 = arith.constant 0 : index
      %206 = vector.load %arg10[%c4_57, %c0_58] : memref<16x256xf32, #tpu.memory_space<vmem>>, vector<2x256xf32>
      tpu.vector_store %arg10[%c4_57, %c0_58], %80 {strides = array<i32>} : memref<16x256xf32, #tpu.memory_space<vmem>>, vector<2x256xf32>,
    } else {
    }
    %c6 = arith.constant 6 : index
    %c0_25 = arith.constant 0 : index
    %83 = vector.load %arg11[%c6, %c0_25] : memref<16x1024xf32, #tpu.memory_space<vmem>>, vector<2x1024xf32>
    %84 = arith.truncf %80 : vector<2x256xf32> to vector<2x256xbf16>
    %cst_26 = arith.constant dense<0.000000e+00> : vector<2x1024xf32>
    %85 = tpu.matmul %84, %7, %cst_26 {dimension_numbers = #tpu.dot_dimension_numbers<[1], [0], [0], [1], [0, 0, 1, 1], [], []>} : vector<2x256xbf16>, vector<256x1024xbf16>, vector<2x1024xf32> -> vector<2x1024xf32>
    %86 = arith.addf %83, %85 : vector<2x1024xf32>
    %87 = vector.extract_strided_slice %86 {offsets = [0, 0], sizes = [2, 768], strides = [1, 1]} : vector<2x1024xf32> to vector<2x768xf32>
    %cst_27 = arith.constant 5.000000e-01 : f32
    %88 = vector.broadcast %cst_27 : f32 to vector<2x768xf32>
    %89 = arith.mulf %88, %87 : vector<2x768xf32>
    %90 = math.tanh %89 : vector<2x768xf32>
    %cst_28 = arith.constant 5.000000e-01 : f32
    %91 = vector.broadcast %cst_28 : f32 to vector<2x768xf32>
    %92 = arith.mulf %91, %90 : vector<2x768xf32>
    %cst_29 = arith.constant 5.000000e-01 : f32
    %93 = vector.broadcast %cst_29 : f32 to vector<2x768xf32>
    %94 = arith.addf %92, %93 : vector<2x768xf32>
    %95 = vector.extract_strided_slice %86 {offsets = [0, 768], sizes = [2, 256], strides = [1, 1]} : vector<2x1024xf32> to vector<2x256xf32>
    %96 = math.tanh %95 : vector<2x256xf32>
    %97 = vector.extract_strided_slice %94 {offsets = [0, 256], sizes = [2, 256], strides = [1, 1]} : vector<2x768xf32> to vector<2x256xf32>
    %98 = arith.mulf %97, %77 : vector<2x256xf32>
    %99 = vector.extract_strided_slice %94 {offsets = [0, 0], sizes = [2, 256], strides = [1, 1]} : vector<2x768xf32> to vector<2x256xf32>
    %100 = arith.mulf %99, %96 : vector<2x256xf32>
    %101 = arith.addf %98, %100 : vector<2x256xf32>
    %102 = vector.extract_strided_slice %94 {offsets = [0, 512], sizes = [2, 256], strides = [1, 1]} : vector<2x768xf32> to vector<2x256xf32>
    %103 = math.tanh %101 : vector<2x256xf32>
    %104 = arith.mulf %102, %103 : vector<2x256xf32>
    %105 = arith.extui %8 : i1 to i32
    %c0_i32_30 = arith.constant 0 : i32
    %106 = arith.cmpi ne, %105, %c0_i32_30 : i32
    scf.if %106 {
      %c6_57 = arith.constant 6 : index
      %c0_58 = arith.constant 0 : index
      %206 = vector.load %arg10[%c6_57, %c0_58] : memref<16x256xf32, #tpu.memory_space<vmem>>, vector<2x256xf32>
      tpu.vector_store %arg10[%c6_57, %c0_58], %104 {strides = array<i32>} : memref<16x256xf32, #tpu.memory_space<vmem>>, vector<2x256xf32>,
    } else {
    }
    %c8 = arith.constant 8 : index
    %c0_31 = arith.constant 0 : index
    %107 = vector.load %arg11[%c8, %c0_31] : memref<16x1024xf32, #tpu.memory_space<vmem>>, vector<2x1024xf32>
    %108 = arith.truncf %104 : vector<2x256xf32> to vector<2x256xbf16>
    %cst_32 = arith.constant dense<0.000000e+00> : vector<2x1024xf32>
    %109 = tpu.matmul %108, %7, %cst_32 {dimension_numbers = #tpu.dot_dimension_numbers<[1], [0], [0], [1], [0, 0, 1, 1], [], []>} : vector<2x256xbf16>, vector<256x1024xbf16>, vector<2x1024xf32> -> vector<2x1024xf32>
    %110 = arith.addf %107, %109 : vector<2x1024xf32>
    %111 = vector.extract_strided_slice %110 {offsets = [0, 0], sizes = [2, 768], strides = [1, 1]} : vector<2x1024xf32> to vector<2x768xf32>
    %cst_33 = arith.constant 5.000000e-01 : f32
    %112 = vector.broadcast %cst_33 : f32 to vector<2x768xf32>
    %113 = arith.mulf %112, %111 : vector<2x768xf32>
    %114 = math.tanh %113 : vector<2x768xf32>
    %cst_34 = arith.constant 5.000000e-01 : f32
    %115 = vector.broadcast %cst_34 : f32 to vector<2x768xf32>
    %116 = arith.mulf %115, %114 : vector<2x768xf32>
    %cst_35 = arith.constant 5.000000e-01 : f32
    %117 = vector.broadcast %cst_35 : f32 to vector<2x768xf32>
    %118 = arith.addf %116, %117 : vector<2x768xf32>
    %119 = vector.extract_strided_slice %110 {offsets = [0, 768], sizes = [2, 256], strides = [1, 1]} : vector<2x1024xf32> to vector<2x256xf32>
    %120 = math.tanh %119 : vector<2x256xf32>
    %121 = vector.extract_strided_slice %118 {offsets = [0, 256], sizes = [2, 256], strides = [1, 1]} : vector<2x768xf32> to vector<2x256xf32>
    %122 = arith.mulf %121, %101 : vector<2x256xf32>
    %123 = vector.extract_strided_slice %118 {offsets = [0, 0], sizes = [2, 256], strides = [1, 1]} : vector<2x768xf32> to vector<2x256xf32>
    %124 = arith.mulf %123, %120 : vector<2x256xf32>
    %125 = arith.addf %122, %124 : vector<2x256xf32>
    %126 = vector.extract_strided_slice %118 {offsets = [0, 512], sizes = [2, 256], strides = [1, 1]} : vector<2x768xf32> to vector<2x256xf32>
    %127 = math.tanh %125 : vector<2x256xf32>
    %128 = arith.mulf %126, %127 : vector<2x256xf32>
    %129 = arith.extui %8 : i1 to i32
    %c0_i32_36 = arith.constant 0 : i32
    %130 = arith.cmpi ne, %129, %c0_i32_36 : i32
    scf.if %130 {
      %c8_57 = arith.constant 8 : index
      %c0_58 = arith.constant 0 : index
      %206 = vector.load %arg10[%c8_57, %c0_58] : memref<16x256xf32, #tpu.memory_space<vmem>>, vector<2x256xf32>
      tpu.vector_store %arg10[%c8_57, %c0_58], %128 {strides = array<i32>} : memref<16x256xf32, #tpu.memory_space<vmem>>, vector<2x256xf32>,
    } else {
    }
    %c10 = arith.constant 10 : index
    %c0_37 = arith.constant 0 : index
    %131 = vector.load %arg11[%c10, %c0_37] : memref<16x1024xf32, #tpu.memory_space<vmem>>, vector<2x1024xf32>
    %132 = arith.truncf %128 : vector<2x256xf32> to vector<2x256xbf16>
    %cst_38 = arith.constant dense<0.000000e+00> : vector<2x1024xf32>
    %133 = tpu.matmul %132, %7, %cst_38 {dimension_numbers = #tpu.dot_dimension_numbers<[1], [0], [0], [1], [0, 0, 1, 1], [], []>} : vector<2x256xbf16>, vector<256x1024xbf16>, vector<2x1024xf32> -> vector<2x1024xf32>
    %134 = arith.addf %131, %133 : vector<2x1024xf32>
    %135 = vector.extract_strided_slice %134 {offsets = [0, 0], sizes = [2, 768], strides = [1, 1]} : vector<2x1024xf32> to vector<2x768xf32>
    %cst_39 = arith.constant 5.000000e-01 : f32
    %136 = vector.broadcast %cst_39 : f32 to vector<2x768xf32>
    %137 = arith.mulf %136, %135 : vector<2x768xf32>
    %138 = math.tanh %137 : vector<2x768xf32>
    %cst_40 = arith.constant 5.000000e-01 : f32
    %139 = vector.broadcast %cst_40 : f32 to vector<2x768xf32>
    %140 = arith.mulf %139, %138 : vector<2x768xf32>
    %cst_41 = arith.constant 5.000000e-01 : f32
    %141 = vector.broadcast %cst_41 : f32 to vector<2x768xf32>
    %142 = arith.addf %140, %141 : vector<2x768xf32>
    %143 = vector.extract_strided_slice %134 {offsets = [0, 768], sizes = [2, 256], strides = [1, 1]} : vector<2x1024xf32> to vector<2x256xf32>
    %144 = math.tanh %143 : vector<2x256xf32>
    %145 = vector.extract_strided_slice %142 {offsets = [0, 256], sizes = [2, 256], strides = [1, 1]} : vector<2x768xf32> to vector<2x256xf32>
    %146 = arith.mulf %145, %125 : vector<2x256xf32>
    %147 = vector.extract_strided_slice %142 {offsets = [0, 0], sizes = [2, 256], strides = [1, 1]} : vector<2x768xf32> to vector<2x256xf32>
    %148 = arith.mulf %147, %144 : vector<2x256xf32>
    %149 = arith.addf %146, %148 : vector<2x256xf32>
    %150 = vector.extract_strided_slice %142 {offsets = [0, 512], sizes = [2, 256], strides = [1, 1]} : vector<2x768xf32> to vector<2x256xf32>
    %151 = math.tanh %149 : vector<2x256xf32>
    %152 = arith.mulf %150, %151 : vector<2x256xf32>
    %153 = arith.extui %8 : i1 to i32
    %c0_i32_42 = arith.constant 0 : i32
    %154 = arith.cmpi ne, %153, %c0_i32_42 : i32
    scf.if %154 {
      %c10_57 = arith.constant 10 : index
      %c0_58 = arith.constant 0 : index
      %206 = vector.load %arg10[%c10_57, %c0_58] : memref<16x256xf32, #tpu.memory_space<vmem>>, vector<2x256xf32>
      tpu.vector_store %arg10[%c10_57, %c0_58], %152 {strides = array<i32>} : memref<16x256xf32, #tpu.memory_space<vmem>>, vector<2x256xf32>,
    } else {
    }
    %c12 = arith.constant 12 : index
    %c0_43 = arith.constant 0 : index
    %155 = vector.load %arg11[%c12, %c0_43] : memref<16x1024xf32, #tpu.memory_space<vmem>>, vector<2x1024xf32>
    %156 = arith.truncf %152 : vector<2x256xf32> to vector<2x256xbf16>
    %cst_44 = arith.constant dense<0.000000e+00> : vector<2x1024xf32>
    %157 = tpu.matmul %156, %7, %cst_44 {dimension_numbers = #tpu.dot_dimension_numbers<[1], [0], [0], [1], [0, 0, 1, 1], [], []>} : vector<2x256xbf16>, vector<256x1024xbf16>, vector<2x1024xf32> -> vector<2x1024xf32>
    %158 = arith.addf %155, %157 : vector<2x1024xf32>
    %159 = vector.extract_strided_slice %158 {offsets = [0, 0], sizes = [2, 768], strides = [1, 1]} : vector<2x1024xf32> to vector<2x768xf32>
    %cst_45 = arith.constant 5.000000e-01 : f32
    %160 = vector.broadcast %cst_45 : f32 to vector<2x768xf32>
    %161 = arith.mulf %160, %159 : vector<2x768xf32>
    %162 = math.tanh %161 : vector<2x768xf32>
    %cst_46 = arith.constant 5.000000e-01 : f32
    %163 = vector.broadcast %cst_46 : f32 to vector<2x768xf32>
    %164 = arith.mulf %163, %162 : vector<2x768xf32>
    %cst_47 = arith.constant 5.000000e-01 : f32
    %165 = vector.broadcast %cst_47 : f32 to vector<2x768xf32>
    %166 = arith.addf %164, %165 : vector<2x768xf32>
    %167 = vector.extract_strided_slice %158 {offsets = [0, 768], sizes = [2, 256], strides = [1, 1]} : vector<2x1024xf32> to vector<2x256xf32>
    %168 = math.tanh %167 : vector<2x256xf32>
    %169 = vector.extract_strided_slice %166 {offsets = [0, 256], sizes = [2, 256], strides = [1, 1]} : vector<2x768xf32> to vector<2x256xf32>
    %170 = arith.mulf %169, %149 : vector<2x256xf32>
    %171 = vector.extract_strided_slice %166 {offsets = [0, 0], sizes = [2, 256], strides = [1, 1]} : vector<2x768xf32> to vector<2x256xf32>
    %172 = arith.mulf %171, %168 : vector<2x256xf32>
    %173 = arith.addf %170, %172 : vector<2x256xf32>
    %174 = vector.extract_strided_slice %166 {offsets = [0, 512], sizes = [2, 256], strides = [1, 1]} : vector<2x768xf32> to vector<2x256xf32>
    %175 = math.tanh %173 : vector<2x256xf32>
    %176 = arith.mulf %174, %175 : vector<2x256xf32>
    %177 = arith.extui %8 : i1 to i32
    %c0_i32_48 = arith.constant 0 : i32
    %178 = arith.cmpi ne, %177, %c0_i32_48 : i32
    scf.if %178 {
      %c12_57 = arith.constant 12 : index
      %c0_58 = arith.constant 0 : index
      %206 = vector.load %arg10[%c12_57, %c0_58] : memref<16x256xf32, #tpu.memory_space<vmem>>, vector<2x256xf32>
      tpu.vector_store %arg10[%c12_57, %c0_58], %176 {strides = array<i32>} : memref<16x256xf32, #tpu.memory_space<vmem>>, vector<2x256xf32>,
    } else {
    }
    %c14 = arith.constant 14 : index
    %c0_49 = arith.constant 0 : index
    %179 = vector.load %arg11[%c14, %c0_49] : memref<16x1024xf32, #tpu.memory_space<vmem>>, vector<2x1024xf32>
    %180 = arith.truncf %176 : vector<2x256xf32> to vector<2x256xbf16>
    %cst_50 = arith.constant dense<0.000000e+00> : vector<2x1024xf32>
    %181 = tpu.matmul %180, %7, %cst_50 {dimension_numbers = #tpu.dot_dimension_numbers<[1], [0], [0], [1], [0, 0, 1, 1], [], []>} : vector<2x256xbf16>, vector<256x1024xbf16>, vector<2x1024xf32> -> vector<2x1024xf32>
    %182 = arith.addf %179, %181 : vector<2x1024xf32>
    %183 = vector.extract_strided_slice %182 {offsets = [0, 0], sizes = [2, 768], strides = [1, 1]} : vector<2x1024xf32> to vector<2x768xf32>
    %cst_51 = arith.constant 5.000000e-01 : f32
    %184 = vector.broadcast %cst_51 : f32 to vector<2x768xf32>
    %185 = arith.mulf %184, %183 : vector<2x768xf32>
    %186 = math.tanh %185 : vector<2x768xf32>
    %cst_52 = arith.constant 5.000000e-01 : f32
    %187 = vector.broadcast %cst_52 : f32 to vector<2x768xf32>
    %188 = arith.mulf %187, %186 : vector<2x768xf32>
    %cst_53 = arith.constant 5.000000e-01 : f32
    %189 = vector.broadcast %cst_53 : f32 to vector<2x768xf32>
    %190 = arith.addf %188, %189 : vector<2x768xf32>
    %191 = vector.extract_strided_slice %182 {offsets = [0, 768], sizes = [2, 256], strides = [1, 1]} : vector<2x1024xf32> to vector<2x256xf32>
    %192 = math.tanh %191 : vector<2x256xf32>
    %193 = vector.extract_strided_slice %190 {offsets = [0, 256], sizes = [2, 256], strides = [1, 1]} : vector<2x768xf32> to vector<2x256xf32>
    %194 = arith.mulf %193, %173 : vector<2x256xf32>
    %195 = vector.extract_strided_slice %190 {offsets = [0, 0], sizes = [2, 256], strides = [1, 1]} : vector<2x768xf32> to vector<2x256xf32>
    %196 = arith.mulf %195, %192 : vector<2x256xf32>
    %197 = arith.addf %194, %196 : vector<2x256xf32>
    %198 = vector.extract_strided_slice %190 {offsets = [0, 512], sizes = [2, 256], strides = [1, 1]} : vector<2x768xf32> to vector<2x256xf32>
    %199 = math.tanh %197 : vector<2x256xf32>
    %200 = arith.mulf %198, %199 : vector<2x256xf32>
    %201 = arith.extui %8 : i1 to i32
    %c0_i32_54 = arith.constant 0 : i32
    %202 = arith.cmpi ne, %201, %c0_i32_54 : i32
    scf.if %202 {
      %c14_57 = arith.constant 14 : index
      %c0_58 = arith.constant 0 : index
      %206 = vector.load %arg10[%c14_57, %c0_58] : memref<16x256xf32, #tpu.memory_space<vmem>>, vector<2x256xf32>
      tpu.vector_store %arg10[%c14_57, %c0_58], %200 {strides = array<i32>} : memref<16x256xf32, #tpu.memory_space<vmem>>, vector<2x256xf32>,
    } else {
    }
    %c2_i32_55 = arith.constant 2 : i32
    %203 = arith.cmpi eq, %arg0, %c2_i32_55 : i32
    %204 = arith.extui %203 : i1 to i32
    %c0_i32_56 = arith.constant 0 : i32
    %205 = arith.cmpi ne, %204, %c0_i32_56 : i32
    scf.if %205 {
      %206 = arith.truncf %200 : vector<2x256xf32> to vector<2x256xbf16>
      %c0_57 = arith.constant 0 : index
      %c0_58 = arith.constant 0 : index
      %207 = vector.load %arg5[%c0_57, %c0_58] : memref<256x128xbf16, #tpu.memory_space<vmem>>, vector<256x128xbf16>
      %cst_59 = arith.constant dense<0.000000e+00> : vector<2x128xf32>
      %208 = tpu.matmul %206, %207, %cst_59 {dimension_numbers = #tpu.dot_dimension_numbers<[1], [0], [0], [1], [0, 0, 1, 1], [], []>} : vector<2x256xbf16>, vector<256x128xbf16>, vector<2x128xf32> -> vector<2x128xf32>
      %c0_60 = arith.constant 0 : index
      %c0_61 = arith.constant 0 : index
      %209 = vector.load %arg6[%c0_60, %c0_61] : memref<1x128xf32, #tpu.memory_space<vmem>>, vector<1x128xf32>
      %210 = vector.broadcast %209 : vector<1x128xf32> to vector<2x128xf32>
      %211 = arith.addf %208, %210 : vector<2x128xf32>
      %cst_62 = arith.constant 0.000000e+00 : f32
      %212 = vector.broadcast %cst_62 : f32 to vector<2x128xf32>
      %213 = arith.cmpf oge, %211, %212 : vector<2x128xf32>
      %cst_63 = arith.constant 0.00999999977 : f32
      %214 = vector.broadcast %cst_63 : f32 to vector<2x128xf32>
      %215 = arith.mulf %214, %211 : vector<2x128xf32>
      %216 = arith.select %213, %211, %215 : vector<2x128xi1>, vector<2x128xf32>
      %217 = arith.truncf %216 : vector<2x128xf32> to vector<2x128xbf16>
      %c0_64 = arith.constant 0 : index
      %c0_65 = arith.constant 0 : index
      %218 = vector.load %arg7[%c0_64, %c0_65] : memref<128x128xbf16, #tpu.memory_space<vmem>>, vector<128x128xbf16>
      %cst_66 = arith.constant dense<0.000000e+00> : vector<2x128xf32>
      %219 = tpu.matmul %217, %218, %cst_66 {dimension_numbers = #tpu.dot_dimension_numbers<[1], [0], [0], [1], [0, 0, 1, 1], [], []>} : vector<2x128xbf16>, vector<128x128xbf16>, vector<2x128xf32> -> vector<2x128xf32>
      %c0_67 = arith.constant 0 : index
      %c0_68 = arith.constant 0 : index
      %220 = vector.load %arg8[%c0_67, %c0_68] : memref<1x128xf32, #tpu.memory_space<vmem>>, vector<1x128xf32>
      %221 = vector.broadcast %220 : vector<1x128xf32> to vector<2x128xf32>
      %222 = arith.addf %219, %221 : vector<2x128xf32>
      %cst_69 = arith.constant 5.000000e-01 : f32
      %223 = vector.broadcast %cst_69 : f32 to vector<2x128xf32>
      %224 = arith.mulf %223, %222 : vector<2x128xf32>
      %225 = math.tanh %224 : vector<2x128xf32>
      %cst_70 = arith.constant 5.000000e-01 : f32
      %226 = vector.broadcast %cst_70 : f32 to vector<2x128xf32>
      %227 = arith.mulf %226, %225 : vector<2x128xf32>
      %cst_71 = arith.constant 5.000000e-01 : f32
      %228 = vector.broadcast %cst_71 : f32 to vector<2x128xf32>
      %229 = arith.addf %227, %228 : vector<2x128xf32>
      %c0_72 = arith.constant 0 : index
      %c0_73 = arith.constant 0 : index
      %230 = vector.load %arg9[%c0_72, %c0_73] : memref<2x128xf32, #tpu.memory_space<vmem>>, vector<2x128xf32>
      tpu.vector_store %arg9[%c0_72, %c0_73], %229 {strides = array<i32>} : memref<2x128xf32, #tpu.memory_space<vmem>>, vector<2x128xf32>,
    } else {
    }
    return
  }
  func.func @transform_0(%arg0: i32) -> (i32, i32) {
    %c0_i32 = arith.constant 0 : i32
    %c0_i32_0 = arith.constant 0 : i32
    %c0_i32_1 = arith.constant 0 : i32
    return %c0_i32, %c0_i32_0 : i32, i32
  }
  func.func @transform_1(%arg0: i32) -> (i32, i32, i32) {
    %c1_i32 = arith.constant 1 : i32
    %0 = arith.subi %arg0, %c1_i32 : i32
    %c0_i32 = arith.constant 0 : i32
    %1 = arith.maxsi %0, %c0_i32 : i32
    %c0_i32_0 = arith.constant 0 : i32
    %c0_i32_1 = arith.constant 0 : i32
    %c0_i32_2 = arith.constant 0 : i32
    return %1, %c0_i32_0, %c0_i32_1 : i32, i32, i32
  }
  func.func @transform_2(%arg0: i32) -> (i32, i32, i32) {
    %c0_i32 = arith.constant 0 : i32
    %c0_i32_0 = arith.constant 0 : i32
    %c0_i32_1 = arith.constant 0 : i32
    return %arg0, %c0_i32, %c0_i32_0 : i32, i32, i32
  }
  func.func @transform_3(%arg0: i32) -> (i32, i32, i32) {
    %c1_i32 = arith.constant 1 : i32
    %0 = arith.subi %arg0, %c1_i32 : i32
    %c0_i32 = arith.constant 0 : i32
    %1 = arith.maxsi %0, %c0_i32 : i32
    %c0_i32_0 = arith.constant 0 : i32
    %c0_i32_1 = arith.constant 0 : i32
    %c0_i32_2 = arith.constant 0 : i32
    return %1, %c0_i32_0, %c0_i32_1 : i32, i32, i32
  }
  func.func @transform_4(%arg0: i32) -> (i32, i32) {
    %c0_i32 = arith.constant 0 : i32
    %c0_i32_0 = arith.constant 0 : i32
    %c0_i32_1 = arith.constant 0 : i32
    return %c0_i32, %c0_i32_0 : i32, i32
  }
  func.func @transform_5(%arg0: i32) -> (i32, i32) {
    %c0_i32 = arith.constant 0 : i32
    %c0_i32_0 = arith.constant 0 : i32
    %c0_i32_1 = arith.constant 0 : i32
    return %c0_i32, %c0_i32_0 : i32, i32
  }
  func.func @transform_6(%arg0: i32) -> (i32, i32) {
    %c0_i32 = arith.constant 0 : i32
    %c0_i32_0 = arith.constant 0 : i32
    %c0_i32_1 = arith.constant 0 : i32
    return %c0_i32, %c0_i32_0 : i32, i32
  }
  func.func @transform_7(%arg0: i32) -> (i32, i32) {
    %c0_i32 = arith.constant 0 : i32
    %c0_i32_0 = arith.constant 0 : i32
    %c0_i32_1 = arith.constant 0 : i32
    return %c0_i32, %c0_i32_0 : i32, i32
  }
  func.func @transform_8(%arg0: i32) -> (i32, i32) {
    %c0_i32 = arith.constant 0 : i32
    %c0_i32_0 = arith.constant 0 : i32
    %c0_i32_1 = arith.constant 0 : i32
    return %c0_i32, %c0_i32_0 : i32, i32
  }
}

</mosaic_0001>

<bundles_post_ra>
// kernel: qnet_forward.1
= control target key start
LH: loop header
LB: loop body
LE: loop exit
PB: predicated region body
PF: predicated region fallthrough
CT: control target
= control target key end

     0   :  { %13 = vsyncpa [#allocation5], 0  ;;  %s5230_s27 = smov 0   ;;  %s7162_s0 = inlined_call_operand.vmem [shape: f32[16,1024], index: 0, kind: input, shape index: {}]   ;;  %s7163_s1 = inlined_call_operand.vmem [shape: bf16[2,256,1024], index: 1, kind: input, shape index: {}]   ;;  %s7164_s2 = inlined_call_operand.vmem [shape: bf16[3,256,1024], index: 2, kind: input, shape index: {}]   ;;  %s7165_s3 = inlined_call_operand.vmem [shape: f32[2,1,1024], index: 3, kind: input, shape index: {}]   ;;  %s7166_s4 = inlined_call_operand.vmem [shape: bf16[256,128], index: 4, kind: input, shape index: {}]   ;;  %s7167_s5 = inlined_call_operand.vmem [shape: f32[1,128], index: 5, kind: input, shape index: {}]   ;;  %s7168_s6 = inlined_call_operand.vmem [shape: bf16[128,128], index: 6, kind: input, shape index: {}]   ;;  %s7169_s7 = inlined_call_operand.vmem [shape: f32[1,128], index: 7, kind: input, shape index: {}]   ;;  %s7170_s8 = inlined_call_operand.hbm [shape: f32[2,128], index: 8, kind: output, shape index: {}]  }
   0x1 LB: > { %s5236_s28 = sadd.s32 4294967295, %s5179_s27   ;;  %p4567_p0 = scmp.ge.s32.totalorder %s5179_s27, 1  ;;  %s5179_s27 = sphi %s5230_s27, %s19_s27  }
   0x2   : > { %p301_p1 = scmp.lt.s32.totalorder %s5179_s27, 4 }
   0x4   : > { %p302_p2 = pnand %p4567_p0, %p301_p1 }
   0x6   : > { %305 = sbr.rel (%p302_p2) target bundleno = 3883 (0xf2b), region = 52 }
   0xd   : > { %s4568_s29 = sadd.s32 4294967295, %s5236_s28  ;;  %p356_p3 = scmp.lt.s32.totalorder %s5236_s28, 2 }
   0xe   : > { %p346_p4 = scmp.gt.s32.totalorder %s4568_s29, 0  ;;  %p4569_p5 = scmp.lt.s32.totalorder %s4568_s29, 1 }
   0xf   : > { %s357_s30 = scalar_select %p356_p3, %s5236_s28, 2 }
  0x10   : > { %s7998_s29 = smov (!%p346_p4, %s4568_s29), 0  ;;  %p4585_p6 = scmp.ne.s32.totalorder %s5236_s28, 0 }
  0x11   : > { %s4885_s9 = sshll.u32 %s357_s30, 10  ;;  %s8000_s29 = smov (!%p4569_p5, %s7998_s29), 1  ;;  %v376_v0 = vld [vmem:[%s7162_s0] sm:$0xff] (!%p4585_p6)  ;;  %v377_v1 = vld [vmem:[%s7162_s0 + $0x8] sm:$0xff] (!%p4585_p6)  ;;  %v378_v2 = vld [vmem:[%s7162_s0 + $0x10] sm:$0xff] (!%p4585_p6) }
  0x12   : > { %s5246_s12 = scalar_lea.vmem %s7164_s2, %s4885_s9  ;;  %s4884_s13 = sshll.u32 %s8000_s29, 10  ;;  %392 = vst [vmem:[#allocation3] sm:$0xff] (!%p4585_p6), %v376_v0  ;;  %393 = vst [vmem:[#allocation3 + $0x8] sm:$0xff] (!%p4585_p6), %v377_v1  ;;  %v379_v3 = vld [vmem:[%s7162_s0 + $0x18] sm:$0xff] (!%p4585_p6)  ;;  %v380_v4 = vld [vmem:[%s7162_s0 + $0x20] sm:$0xff] (!%p4585_p6) }
  0x13   : > { %s4584_s14 = sshll.u32 %s8000_s29, 3  ;;  %s5251_s17 = scalar_lea.vmem %s7163_s1, %s4884_s13  ;;  %394 = vst [vmem:[#allocation3 + $0x10] sm:$0xff] (!%p4585_p6), %v378_v2  ;;  %v381_v5 = vld [vmem:[%s7162_s0 + $0x28] sm:$0xff] (!%p4585_p6)  ;;  %395 = vst [vmem:[#allocation3 + $0x18] sm:$0xff] (!%p4585_p6), %v379_v3  ;;  %v382_v6 = vld [vmem:[%s7162_s0 + $0x30] sm:$0xff] (!%p4585_p6) }
  0x14   : > { %s5256_s20 = scalar_lea.vmem %s7165_s3, %s4584_s14  ;;  %375 = sbr.rel (%p4585_p6) target bundleno = 27 (0x1b), region = 56  ;;  %396 = vst [vmem:[#allocation3 + $0x20] sm:$0xff] (!%p4585_p6), %v380_v4  ;;  %397 = vst [vmem:[#allocation3 + $0x28] sm:$0xff] (!%p4585_p6), %v381_v5  ;;  %v383_v7 = vld [vmem:[%s7162_s0 + $0x38] sm:$0xff] (!%p4585_p6)  ;;  %v384_v8 = vld [vmem:[%s7162_s0 + $0x40] sm:$0xff] (!%p4585_p6) }
  0x15   : > { %398 = vst [vmem:[#allocation3 + $0x30] sm:$0xff] (!%p4585_p6), %v382_v6  ;;  %399 = vst [vmem:[#allocation3 + $0x38] sm:$0xff] (!%p4585_p6), %v383_v7  ;;  %v385_v9 = vld [vmem:[%s7162_s0 + $0x48] sm:$0xff] (!%p4585_p6)  ;;  %v386_v10 = vld [vmem:[%s7162_s0 + $0x50] sm:$0xff] (!%p4585_p6) }
  0x16   : > { %400 = vst [vmem:[#allocation3 + $0x40] sm:$0xff] (!%p4585_p6), %v384_v8  ;;  %v387_v11 = vld [vmem:[%s7162_s0 + $0x58] sm:$0xff] (!%p4585_p6)  ;;  %401 = vst [vmem:[#allocation3 + $0x48] sm:$0xff] (!%p4585_p6), %v385_v9  ;;  %v388_v12 = vld [vmem:[%s7162_s0 + $0x60] sm:$0xff] (!%p4585_p6) }
  0x17   : > { %402 = vst [vmem:[#allocation3 + $0x50] sm:$0xff] (!%p4585_p6), %v386_v10  ;;  %403 = vst [vmem:[#allocation3 + $0x58] sm:$0xff] (!%p4585_p6), %v387_v11  ;;  %v389_v13 = vld [vmem:[%s7162_s0 + $0x68] sm:$0xff] (!%p4585_p6)  ;;  %v390_v14 = vld [vmem:[%s7162_s0 + $0x70] sm:$0xff] (!%p4585_p6) }
  0x18   : > { %404 = vst [vmem:[#allocation3 + $0x60] sm:$0xff] (!%p4585_p6), %v388_v12  ;;  %405 = vst [vmem:[#allocation3 + $0x68] sm:$0xff] (!%p4585_p6), %v389_v13  ;;  %v391_v15 = vld [vmem:[%s7162_s0 + $0x78] sm:$0xff] (!%p4585_p6) }
  0x19   : > { %406 = vst [vmem:[#allocation3 + $0x70] sm:$0xff] (!%p4585_p6), %v390_v14  ;;  %407 = vst [vmem:[#allocation3 + $0x78] sm:$0xff] (!%p4585_p6), %v391_v15 }
  0x1b PF: > { %p4586_p7 = scmp.le.s32.totalorder %s5236_s28, 0 }
  0x1c   : > { %v418_v16 = vld [vmem:[%s5251_s17] sm:$0xff] (!%p4586_p7)  ;;  %v419_v18 = vld [vmem:[%s5251_s17 + $0x8] sm:$0xff] (!%p4586_p7)  ;;  %v415_v6 = vld [vmem:[#allocation2 + $0x18] sm:$0xff] (!%p4586_p7) }
  0x1d   : > { %411 = sbr.rel (%p4586_p7) target bundleno = 378 (0x17a), region = 60  ;;  %v422_v17 = vld [vmem:[%s5251_s17 + $0x20] sm:$0xff] (!%p4586_p7)  ;;  %v423_v20 = vld [vmem:[%s5251_s17 + $0x28] sm:$0xff] (!%p4586_p7) }
  0x1e   : > { %v4588_v19 = vcombine.high (!%p4586_p7), %v418_v16, %v422_v17  ;;  %v4587_v21 = vcombine.low (!%p4586_p7), %v418_v16, %v422_v17  ;;  %v426_v22 = vld [vmem:[%s5251_s17 + $0x40] sm:$0xff] (!%p4586_p7)  ;;  %v4590_v24 = vcombine.high (!%p4586_p7), %v419_v18, %v423_v20  ;;  %v4589_v25 = vcombine.low (!%p4586_p7), %v419_v18, %v423_v20  ;;  %v427_v27 = vld [vmem:[%s5251_s17 + $0x48] sm:$0xff] (!%p4586_p7) }
  0x1f   : > { %v430_v23 = vld [vmem:[%s5251_s17 + $0x60] sm:$0xff] (!%p4586_p7)  ;;  %v431_v28 = vld [vmem:[%s5251_s17 + $0x68] sm:$0xff] (!%p4586_p7) }
  0x20   : > { %v4596_v26 = vcombine.high (!%p4586_p7), %v426_v22, %v430_v23  ;;  %v434_v29 = vld [vmem:[%s5251_s17 + $0x80] sm:$0xff] (!%p4586_p7)  ;;  %1228 = vmatprep.subr.bf16.mxu0 (!%p4586_p7), %v4588_v19  ;;  %v4598_v30 = vcombine.high (!%p4586_p7), %v427_v27, %v431_v28  ;;  %v435_v32 = vld [vmem:[%s5251_s17 + $0x88] sm:$0xff] (!%p4586_p7)  ;;  %1271 = vmatprep.subr.bf16.mxu1 (!%p4586_p7), %v4590_v24  ;;  %v4595_v34 = vcombine.low (!%p4586_p7), %v426_v22, %v430_v23 }
  0x21   : > { %v438_v31 = vld [vmem:[%s5251_s17 + $0xa0] sm:$0xff] (!%p4586_p7)  ;;  %v439_v33 = vld [vmem:[%s5251_s17 + $0xa8] sm:$0xff] (!%p4586_p7)  ;;  %1229 = vmatpush1.bf16.msra.mxu0 (!%p4586_p7), %v4587_v21  ;;  %1272 = vmatpush1.bf16.msra.mxu1 (!%p4586_p7), %v4589_v25  ;;  %v4597_v35 = vcombine.low (!%p4586_p7), %v427_v27, %v431_v28 }
  0x22   : > { %1230 = vmatprep.subr.bf16.mxu0 (!%p4586_p7), %v4596_v26  ;;  %v4604_v36 = vcombine.high (!%p4586_p7), %v434_v29, %v438_v31  ;;  %1273 = vmatprep.subr.bf16.mxu1 (!%p4586_p7), %v4598_v30  ;;  %v4606_v37 = vcombine.high (!%p4586_p7), %v435_v32, %v439_v33  ;;  %v442_v38 = vld [vmem:[%s5251_s17 + $0xc0] sm:$0xff] (!%p4586_p7)  ;;  %v443_v40 = vld [vmem:[%s5251_s17 + $0xc8] sm:$0xff] (!%p4586_p7)  ;;  %v4603_v42 = vcombine.low (!%p4586_p7), %v434_v29, %v438_v31 }
  0x23   : > { %v446_v39 = vld [vmem:[%s5251_s17 + $0xe0] sm:$0xff] (!%p4586_p7)  ;;  %v447_v41 = vld [vmem:[%s5251_s17 + $0xe8] sm:$0xff] (!%p4586_p7)  ;;  %v4605_v43 = vcombine.low (!%p4586_p7), %v435_v32, %v439_v33 }
  0x24   : > { %v4612_v44 = vcombine.high %v442_v38, %v446_v39  ;;  %v4614_v45 = vcombine.high %v443_v40, %v447_v41  ;;  %v450_v46 = vld [vmem:[%s5251_s17 + $0x100] sm:$0xff]  ;;  %v451_v48 = vld [vmem:[%s5251_s17 + $0x108] sm:$0xff]  ;;  %v4611_v50 = vcombine.low %v442_v38, %v446_v39  ;;  %v4613_v51 = vcombine.low %v443_v40, %v447_v41 }
  0x25   : > { %1231 = vmatpush1.bf16.msra.mxu0 %v4595_v34  ;;  %1274 = vmatpush1.bf16.msra.mxu1 %v4597_v35  ;;  %v454_v47 = vld [vmem:[%s5251_s17 + $0x120] sm:$0xff]  ;;  %v455_v49 = vld [vmem:[%s5251_s17 + $0x128] sm:$0xff] }
  0x26   : > { %1232 = vmatprep.subr.bf16.mxu0 %v4604_v36  ;;  %1275 = vmatprep.subr.bf16.mxu1 %v4606_v37  ;;  %v4620_v52 = vcombine.high %v450_v46, %v454_v47  ;;  %v4622_v53 = vcombine.high %v451_v48, %v455_v49  ;;  %v458_v54 = vld [vmem:[%s5251_s17 + $0x140] sm:$0xff]  ;;  %v459_v56 = vld [vmem:[%s5251_s17 + $0x148] sm:$0xff]  ;;  %v4619_v58 = vcombine.low %v450_v46, %v454_v47 }
  0x27   : > { %v462_v55 = vld [vmem:[%s5251_s17 + $0x160] sm:$0xff]  ;;  %v463_v57 = vld [vmem:[%s5251_s17 + $0x168] sm:$0xff]  ;;  %v4621_v59 = vcombine.low %v451_v48, %v455_v49 }
  0x28   : > { %v4628_v60 = vcombine.high %v458_v54, %v462_v55  ;;  %v4630_v61 = vcombine.high %v459_v56, %v463_v57  ;;  %v466_v62 = vld [vmem:[%s5251_s17 + $0x180] sm:$0xff]  ;;  %v467_v0 = vld [vmem:[%s5251_s17 + $0x188] sm:$0xff]  ;;  %v4627_v2 = vcombine.low %v458_v54, %v462_v55  ;;  %v4629_v3 = vcombine.low %v459_v56, %v463_v57 }
  0x29   : > { %1233 = vmatpush1.bf16.msra.mxu0 %v4603_v42  ;;  %1276 = vmatpush1.bf16.msra.mxu1 %v4605_v43  ;;  %v470_v63 = vld [vmem:[%s5251_s17 + $0x1a0] sm:$0xff]  ;;  %v471_v1 = vld [vmem:[%s5251_s17 + $0x1a8] sm:$0xff] }
  0x2a   : > { %1234 = vmatprep.subr.bf16.mxu0 %v4612_v44  ;;  %1277 = vmatprep.subr.bf16.mxu1 %v4614_v45  ;;  %v4636_v4 = vcombine.high %v466_v62, %v470_v63  ;;  %v413_v5 = vld [vmem:[#allocation2 + $0x8] sm:$0xff]  ;;  %v4638_v7 = vcombine.high %v467_v0, %v471_v1  ;;  %v474_v8 = vld [vmem:[%s5251_s17 + $0x1c0] sm:$0xff]  ;;  %v4635_v13 = vcombine.low %v466_v62, %v470_v63 }
  0x2b   : > { %v478_v9 = vld [vmem:[%s5251_s17 + $0x1e0] sm:$0xff]  ;;  %v5338_v10 = vpack.c.bf16 %v415_v6, %v413_v5  ;;  %v475_v11 = vld [vmem:[%s5251_s17 + $0x1c8] sm:$0xff]  ;;  %v4637_v14 = vcombine.low %v467_v0, %v471_v1 }
  0x2c   : > { %v479_v12 = vld [vmem:[%s5251_s17 + $0x1e8] sm:$0xff]  ;;  %v4644_v15 = vcombine.high %v474_v8, %v478_v9  ;;  %v482_v17 = vld [vmem:[%s5251_s17 + $0x200] sm:$0xff]  ;;  %v4643_v21 = vcombine.low %v474_v8, %v478_v9 }
  0x2d   : > { %1235 = vmatpush1.bf16.msra.mxu0 %v4611_v50  ;;  %1278 = vmatpush1.bf16.msra.mxu1 %v4613_v51  ;;  %v4646_v16 = vcombine.high %v475_v11, %v479_v12  ;;  %v486_v18 = vld [vmem:[%s5251_s17 + $0x220] sm:$0xff]  ;;  %v483_v19 = vld [vmem:[%s5251_s17 + $0x208] sm:$0xff]  ;;  %v4645_v22 = vcombine.low %v475_v11, %v479_v12 }
  0x2e   : > { %1236 = vmatprep.subr.bf16.mxu0 %v4620_v52  ;;  %1279 = vmatprep.subr.bf16.mxu1 %v4622_v53  ;;  %v487_v20 = vld [vmem:[%s5251_s17 + $0x228] sm:$0xff]  ;;  %v4652_v23 = vcombine.high %v482_v17, %v486_v18  ;;  %v490_v25 = vld [vmem:[%s5251_s17 + $0x240] sm:$0xff]  ;;  %v4651_v29 = vcombine.low %v482_v17, %v486_v18  ;;  %v420_v18 = vld [vmem:[%s5251_s17 + $0x10] sm:$0xff] }
  0x2f   : > { %1260 = vmatprep.mubr.bf16.mxu0 %v5338_v10  ;;  %1303 = vmatprep.mubr.bf16.mxu1 %v5338_v10  ;;  %v4654_v24 = vcombine.high %v483_v19, %v487_v20  ;;  %v494_v26 = vld [vmem:[%s5251_s17 + $0x260] sm:$0xff]  ;;  %v491_v27 = vld [vmem:[%s5251_s17 + $0x248] sm:$0xff]  ;;  %v4653_v30 = vcombine.low %v483_v19, %v487_v20  ;;  %v424_v19 = vld [vmem:[%s5251_s17 + $0x30] sm:$0xff] }
  0x30   : > { %v495_v28 = vld [vmem:[%s5251_s17 + $0x268] sm:$0xff]  ;;  %v4660_v31 = vcombine.high %v490_v25, %v494_v26  ;;  %v498_v33 = vld [vmem:[%s5251_s17 + $0x280] sm:$0xff]  ;;  %v4659_v37 = vcombine.low %v490_v25, %v494_v26  ;;  %v421_v20 = vld [vmem:[%s5251_s17 + $0x18] sm:$0xff]  ;;  %v4592_v26 = vcombine.high %v420_v18, %v424_v19 }
  0x31   : > { %1237 = vmatpush1.bf16.msra.mxu0 %v4619_v58  ;;  %1280 = vmatpush1.bf16.msra.mxu1 %v4621_v59  ;;  %v4662_v32 = vcombine.high %v491_v27, %v495_v28  ;;  %v502_v34 = vld [vmem:[%s5251_s17 + $0x2a0] sm:$0xff]  ;;  %v499_v35 = vld [vmem:[%s5251_s17 + $0x288] sm:$0xff]  ;;  %v4661_v38 = vcombine.low %v491_v27, %v495_v28  ;;  %v428_v28 = vld [vmem:[%s5251_s17 + $0x50] sm:$0xff] }
  0x32   : > { %1238 = vmatprep.subr.bf16.mxu0 %v4628_v60  ;;  %1281 = vmatprep.subr.bf16.mxu1 %v4630_v61  ;;  %v503_v36 = vld [vmem:[%s5251_s17 + $0x2a8] sm:$0xff]  ;;  %v4668_v39 = vcombine.high %v498_v33, %v502_v34  ;;  %v506_v41 = vld [vmem:[%s5251_s17 + $0x2c0] sm:$0xff]  ;;  %v4667_v45 = vcombine.low %v498_v33, %v502_v34  ;;  %v4591_v33 = vcombine.low %v420_v18, %v424_v19 }
  0x33   : > { %v4670_v40 = vcombine.high %v499_v35, %v503_v36  ;;  %v510_v42 = vld [vmem:[%s5251_s17 + $0x2e0] sm:$0xff]  ;;  %v507_v43 = vld [vmem:[%s5251_s17 + $0x2c8] sm:$0xff]  ;;  %v4669_v46 = vcombine.low %v499_v35, %v503_v36 }
  0x34   : > { %v511_v44 = vld [vmem:[%s5251_s17 + $0x2e8] sm:$0xff]  ;;  %v4676_v47 = vcombine.high %v506_v41, %v510_v42  ;;  %v514_v49 = vld [vmem:[%s5251_s17 + $0x300] sm:$0xff]  ;;  %v4675_v53 = vcombine.low %v506_v41, %v510_v42 }
  0x35   : > { %1239 = vmatpush1.bf16.msra.mxu0 %v4627_v2  ;;  %1282 = vmatpush1.bf16.msra.mxu1 %v4629_v3  ;;  %v4678_v48 = vcombine.high %v507_v43, %v511_v44  ;;  %v518_v50 = vld [vmem:[%s5251_s17 + $0x320] sm:$0xff]  ;;  %v515_v51 = vld [vmem:[%s5251_s17 + $0x308] sm:$0xff]  ;;  %v4677_v54 = vcombine.low %v507_v43, %v511_v44 }
  0x36   : > { %1240 = vmatprep.subr.bf16.mxu0 %v4636_v4  ;;  %1283 = vmatprep.subr.bf16.mxu1 %v4638_v7  ;;  %v519_v52 = vld [vmem:[%s5251_s17 + $0x328] sm:$0xff]  ;;  %v4684_v55 = vcombine.high %v514_v49, %v518_v50  ;;  %v522_v57 = vld [vmem:[%s5251_s17 + $0x340] sm:$0xff]  ;;  %v4683_v61 = vcombine.low %v514_v49, %v518_v50 }
  0x37   : > { %v4686_v56 = vcombine.high %v515_v51, %v519_v52  ;;  %v526_v58 = vld [vmem:[%s5251_s17 + $0x360] sm:$0xff]  ;;  %v523_v59 = vld [vmem:[%s5251_s17 + $0x348] sm:$0xff]  ;;  %v4685_v62 = vcombine.low %v515_v51, %v519_v52 }
  0x38   : > { %v527_v60 = vld [vmem:[%s5251_s17 + $0x368] sm:$0xff]  ;;  %v4692_v63 = vcombine.high %v522_v57, %v526_v58  ;;  %v530_v1 = vld [vmem:[%s5251_s17 + $0x380] sm:$0xff]  ;;  %v4691_v5 = vcombine.low %v522_v57, %v526_v58 }
  0x39   : > { %1241 = vmatpush1.bf16.msra.mxu0 %v4635_v13  ;;  %1284 = vmatpush1.bf16.msra.mxu1 %v4637_v14  ;;  %v4694_v0 = vcombine.high %v523_v59, %v527_v60  ;;  %v534_v2 = vld [vmem:[%s5251_s17 + $0x3a0] sm:$0xff]  ;;  %v531_v3 = vld [vmem:[%s5251_s17 + $0x388] sm:$0xff]  ;;  %v4693_v6 = vcombine.low %v523_v59, %v527_v60  ;;  %v460_v60 = vld [vmem:[%s5251_s17 + $0x150] sm:$0xff] }
  0x3a   : > { %1242 = vmatprep.subr.bf16.mxu0 %v4644_v15  ;;  %1285 = vmatprep.subr.bf16.mxu1 %v4646_v16  ;;  %v535_v4 = vld [vmem:[%s5251_s17 + $0x3a8] sm:$0xff]  ;;  %v4700_v7 = vcombine.high %v530_v1, %v534_v2  ;;  %v538_v9 = vld [vmem:[%s5251_s17 + $0x3c0] sm:$0xff]  ;;  %v4699_v14 = vcombine.low %v530_v1, %v534_v2 }
  0x3b   : > { %v4702_v8 = vcombine.high %v531_v3, %v535_v4  ;;  %v542_v11 = vld [vmem:[%s5251_s17 + $0x3e0] sm:$0xff]  ;;  %v539_v12 = vld [vmem:[%s5251_s17 + $0x3c8] sm:$0xff]  ;;  %v4701_v15 = vcombine.low %v531_v3, %v535_v4  ;;  %v468_v4 = vld [vmem:[%s5251_s17 + $0x190] sm:$0xff] }
  0x3c   : > { %v543_v13 = vld [vmem:[%s5251_s17 + $0x3e8] sm:$0xff]  ;;  %v4708_v16 = vcombine.high %v538_v9, %v542_v11 }
  0x3d   : > { %1243 = vmatpush1.bf16.msra.mxu0 %v4643_v21  ;;  %1286 = vmatpush1.bf16.msra.mxu1 %v4645_v22  ;;  %v4710_v17 = vcombine.high %v539_v12, %v543_v13  ;;  %v425_v21 = vld [vmem:[%s5251_s17 + $0x38] sm:$0xff]  ;;  %v4707_v22 = vcombine.low %v538_v9, %v542_v11  ;;  %v4709_v25 = vcombine.low %v539_v12, %v543_v13  ;;  %v476_v13 = vld [vmem:[%s5251_s17 + $0x1d0] sm:$0xff] }
  0x3e   : > { %1244 = vmatprep.subr.bf16.mxu0 %v4652_v23  ;;  %1287 = vmatprep.subr.bf16.mxu1 %v4654_v24  ;;  %v412_v23 = vld [vmem:[#allocation2] sm:$0xff]  ;;  %v414_v24 = vld [vmem:[#allocation2 + $0x10] sm:$0xff]  ;;  %v4594_v27 = vcombine.high %v421_v20, %v425_v21  ;;  %v4593_v34 = vcombine.low %v421_v20, %v425_v21 }
  0x3f   : > { %v484_v21 = vld [vmem:[%s5251_s17 + $0x210] sm:$0xff] }
  0x41   : > { %1245 = vmatpush1.bf16.msra.mxu0 %v4651_v29  ;;  %1288 = vmatpush1.bf16.msra.mxu1 %v4653_v30  ;;  %v432_v29 = vld [vmem:[%s5251_s17 + $0x70] sm:$0xff]  ;;  %v5382_v30 = vpack.c.bf16 %v414_v24, %v412_v23  ;;  %v485_v23 = vld [vmem:[%s5251_s17 + $0x218] sm:$0xff] }
  0x42   : > { %1246 = vmatprep.subr.bf16.mxu0 %v4660_v31  ;;  %1289 = vmatprep.subr.bf16.mxu1 %v4662_v32  ;;  %v429_v31 = vld [vmem:[%s5251_s17 + $0x58] sm:$0xff]  ;;  %v4600_v35 = vcombine.high %v428_v28, %v432_v29  ;;  %v4599_v41 = vcombine.low %v428_v28, %v432_v29  ;;  %v492_v29 = vld [vmem:[%s5251_s17 + $0x250] sm:$0xff] }
  0x43   : > { %v433_v32 = vld [vmem:[%s5251_s17 + $0x78] sm:$0xff] }
  0x44   : > { %v4602_v36 = vcombine.high %v429_v31, %v433_v32  ;;  %v4601_v42 = vcombine.low %v429_v31, %v433_v32  ;;  %v489_v24 = vld [vmem:[%s5251_s17 + $0x238] sm:$0xff]  ;;  %v496_v31 = vld [vmem:[%s5251_s17 + $0x270] sm:$0xff] }
  0x45   : > { %1247 = vmatpush1.bf16.msra.mxu0 %v4659_v37  ;;  %1290 = vmatpush1.bf16.msra.mxu1 %v4661_v38  ;;  %v436_v37 = vld [vmem:[%s5251_s17 + $0x90] sm:$0xff]  ;;  %v4658_v28 = vcombine.high %v485_v23, %v489_v24  ;;  %v493_v32 = vld [vmem:[%s5251_s17 + $0x258] sm:$0xff] }
  0x46   : > { %1248 = vmatprep.subr.bf16.mxu0 %v4668_v39  ;;  %1291 = vmatprep.subr.bf16.mxu1 %v4670_v40  ;;  %v440_v38 = vld [vmem:[%s5251_s17 + $0xb0] sm:$0xff]  ;;  %v437_v39 = vld [vmem:[%s5251_s17 + $0x98] sm:$0xff] }
  0x47   : > { %v441_v40 = vld [vmem:[%s5251_s17 + $0xb8] sm:$0xff]  ;;  %v4608_v43 = vcombine.high %v436_v37, %v440_v38  ;;  %v4607_v49 = vcombine.low %v436_v37, %v440_v38  ;;  %v500_v38 = vld [vmem:[%s5251_s17 + $0x290] sm:$0xff] }
  0x48   : > { %v4610_v44 = vcombine.high %v437_v39, %v441_v40  ;;  %v4609_v50 = vcombine.low %v437_v39, %v441_v40  ;;  %v504_v39 = vld [vmem:[%s5251_s17 + $0x2b0] sm:$0xff]  ;;  %v501_v40 = vld [vmem:[%s5251_s17 + $0x298] sm:$0xff] }
  0x49   : > { %1249 = vmatpush1.bf16.msra.mxu0 %v4667_v45  ;;  %1292 = vmatpush1.bf16.msra.mxu1 %v4669_v46  ;;  %v444_v45 = vld [vmem:[%s5251_s17 + $0xd0] sm:$0xff] }
  0x4a   : > { %1250 = vmatprep.subr.bf16.mxu0 %v4676_v47  ;;  %1293 = vmatprep.subr.bf16.mxu1 %v4678_v48  ;;  %v448_v46 = vld [vmem:[%s5251_s17 + $0xf0] sm:$0xff]  ;;  %v445_v47 = vld [vmem:[%s5251_s17 + $0xd8] sm:$0xff] }
  0x4b   : > { %v449_v48 = vld [vmem:[%s5251_s17 + $0xf8] sm:$0xff]  ;;  %v4616_v51 = vcombine.high %v444_v45, %v448_v46  ;;  %v4615_v57 = vcombine.low %v444_v45, %v448_v46  ;;  %v508_v46 = vld [vmem:[%s5251_s17 + $0x2d0] sm:$0xff] }
  0x4c   : > { %v4618_v52 = vcombine.high %v445_v47, %v449_v48 }
  0x4d   : > { %1251 = vmatpush1.bf16.msra.mxu0 %v4675_v53  ;;  %1294 = vmatpush1.bf16.msra.mxu1 %v4677_v54  ;;  %v452_v53 = vld [vmem:[%s5251_s17 + $0x110] sm:$0xff] }
  0x4e   : > { %1252 = vmatprep.subr.bf16.mxu0 %v4684_v55  ;;  %1295 = vmatprep.subr.bf16.mxu1 %v4686_v56  ;;  %v456_v54 = vld [vmem:[%s5251_s17 + $0x130] sm:$0xff]  ;;  %v453_v55 = vld [vmem:[%s5251_s17 + $0x118] sm:$0xff] }
  0x4f   : > { %v457_v56 = vld [vmem:[%s5251_s17 + $0x138] sm:$0xff]  ;;  %v4624_v58 = vcombine.high %v452_v53, %v456_v54 }
  0x50   : > { %v4626_v59 = vcombine.high %v453_v55, %v457_v56  ;;  %v4625_v1 = vcombine.low %v453_v55, %v457_v56  ;;  %v520_v55 = vld [vmem:[%s5251_s17 + $0x330] sm:$0xff]  ;;  %v517_v56 = vld [vmem:[%s5251_s17 + $0x318] sm:$0xff] }
  0x51   : > { %1253 = vmatpush1.bf16.msra.mxu0 %v4683_v61  ;;  %1296 = vmatpush1.bf16.msra.mxu1 %v4685_v62  ;;  %v464_v61 = vld [vmem:[%s5251_s17 + $0x170] sm:$0xff]  ;;  %v461_v62 = vld [vmem:[%s5251_s17 + $0x158] sm:$0xff] }
  0x52   : > { %1254 = vmatprep.subr.bf16.mxu0 %v4692_v63  ;;  %1297 = vmatprep.subr.bf16.mxu1 %v4694_v0  ;;  %v465_v63 = vld [vmem:[%s5251_s17 + $0x178] sm:$0xff]  ;;  %v4623_v0 = vcombine.low %v452_v53, %v456_v54  ;;  %v4632_v2 = vcombine.high %v460_v60, %v464_v61  ;;  %v516_v54 = vld [vmem:[%s5251_s17 + $0x310] sm:$0xff] }
  0x53   : > { %v4634_v3 = vcombine.high %v461_v62, %v465_v63  ;;  %v4633_v9 = vcombine.low %v461_v62, %v465_v63  ;;  %v528_v62 = vld [vmem:[%s5251_s17 + $0x370] sm:$0xff]  ;;  %v525_v63 = vld [vmem:[%s5251_s17 + $0x358] sm:$0xff] }
  0x55   : > { %1255 = vmatpush1.bf16.msra.mxu0 %v4691_v5  ;;  %1298 = vmatpush1.bf16.msra.mxu1 %v4693_v6  ;;  %v472_v5 = vld [vmem:[%s5251_s17 + $0x1b0] sm:$0xff]  ;;  %v469_v6 = vld [vmem:[%s5251_s17 + $0x198] sm:$0xff] }
  0x56   : > { %1256 = vmatprep.subr.bf16.mxu0 %v4700_v7  ;;  %1299 = vmatprep.subr.bf16.mxu1 %v4702_v8  ;;  %v473_v7 = vld [vmem:[%s5251_s17 + $0x1b8] sm:$0xff]  ;;  %v4631_v8 = vcombine.low %v460_v60, %v464_v61  ;;  %v4640_v11 = vcombine.high %v468_v4, %v472_v5  ;;  %v524_v61 = vld [vmem:[%s5251_s17 + $0x350] sm:$0xff] }
  0x57   : > { %v4642_v12 = vcombine.high %v469_v6, %v473_v7  ;;  %v4641_v18 = vcombine.low %v469_v6, %v473_v7  ;;  %v536_v6 = vld [vmem:[%s5251_s17 + $0x3b0] sm:$0xff]  ;;  %v533_v7 = vld [vmem:[%s5251_s17 + $0x398] sm:$0xff] }
  0x59   : > { %1257 = vmatpush1.bf16.msra.mxu0 %v4699_v14  ;;  %1300 = vmatpush1.bf16.msra.mxu1 %v4701_v15  ;;  %v480_v14 = vld [vmem:[%s5251_s17 + $0x1f0] sm:$0xff]  ;;  %v477_v15 = vld [vmem:[%s5251_s17 + $0x1d8] sm:$0xff] }
  0x5a   : > { %1258 = vmatprep.subr.bf16.mxu0 %v4708_v16  ;;  %1301 = vmatprep.subr.bf16.mxu1 %v4710_v17  ;;  %v481_v16 = vld [vmem:[%s5251_s17 + $0x1f8] sm:$0xff]  ;;  %v4639_v17 = vcombine.low %v468_v4, %v472_v5  ;;  %v4648_v19 = vcombine.high %v476_v13, %v480_v14  ;;  %v532_v5 = vld [vmem:[%s5251_s17 + $0x390] sm:$0xff] }
  0x5b   : > { %v4650_v20 = vcombine.high %v477_v15, %v481_v16 }
  0x5d   : > { %1259 = vmatpush1.bf16.msra.mxu0 %v4707_v22  ;;  %1302 = vmatpush1.bf16.msra.mxu1 %v4709_v25  ;;  %v488_v22 = vld [vmem:[%s5251_s17 + $0x230] sm:$0xff]  ;;  %v4647_v25 = vcombine.low %v476_v13, %v480_v14 }
  0x5e   : > { %1314 = vmatprep.subr.bf16.mxu0 %v4592_v26  ;;  %1357 = vmatprep.subr.bf16.mxu1 %v4594_v27  ;;  %v4649_v26 = vcombine.low %v477_v15, %v481_v16  ;;  %v4656_v27 = vcombine.high %v484_v21, %v488_v22  ;;  %v540_v14 = vld [vmem:[%s5251_s17 + $0x3d0] sm:$0xff]  ;;  %v541_v16 = vld [vmem:[%s5251_s17 + $0x3d8] sm:$0xff] }
  0x5f   : > { %v544_v15 = vld [vmem:[%s5251_s17 + $0x3f0] sm:$0xff] }
  0x60   : > { %1261 = vmatmul.mubr.bf16.vlgmr.msra.gmra.mrb[0].mxu0 %v5382_v30  ;;  %1304 = vmatmul.mubr.bf16.vlgmr.msra.gmra.mrb[0].mxu1 %v5382_v30 }
  0x61   : > { %1315 = vmatpush1.bf16.msra.mxu0 %v4591_v33  ;;  %1358 = vmatpush1.bf16.msra.mxu1 %v4593_v34  ;;  %v497_v33 = vld [vmem:[%s5251_s17 + $0x278] sm:$0xff]  ;;  %v4655_v34 = vcombine.low %v484_v21, %v488_v22  ;;  %v4711_v22 = vcombine.low %v540_v14, %v544_v15 }
  0x62   : > { %1316 = vmatprep.subr.bf16.mxu0 %v4600_v35  ;;  %1359 = vmatprep.subr.bf16.mxu1 %v4602_v36  ;;  %v4657_v35 = vcombine.low %v485_v23, %v489_v24  ;;  %v4664_v36 = vcombine.high %v492_v29, %v496_v31  ;;  %v4666_v37 = vcombine.high %v493_v32, %v497_v33  ;;  %v548_v24 = vlaneseq }
  0x63   : > { %1346 = vmatprep.mubr.bf16.mxu0 %v5338_v10  ;;  %1389 = vmatprep.mubr.bf16.mxu1 %v5338_v10  ;;  %v4617_v10 = vcombine.low %v445_v47, %v449_v48  ;;  %v512_v47 = vld [vmem:[%s5251_s17 + $0x2f0] sm:$0xff]  ;;  %v509_v48 = vld [vmem:[%s5251_s17 + $0x2d8] sm:$0xff] }
  0x65   : > { %1317 = vmatpush1.bf16.msra.mxu0 %v4599_v41  ;;  %1360 = vmatpush1.bf16.msra.mxu1 %v4601_v42  ;;  %v505_v41 = vld [vmem:[%s5251_s17 + $0x2b8] sm:$0xff]  ;;  %v4663_v42 = vcombine.low %v492_v29, %v496_v31 }
  0x66   : > { %1318 = vmatprep.subr.bf16.mxu0 %v4608_v43  ;;  %1361 = vmatprep.subr.bf16.mxu1 %v4610_v44  ;;  %v4665_v43 = vcombine.low %v493_v32, %v497_v33  ;;  %v4672_v44 = vcombine.high %v500_v38, %v504_v39  ;;  %v4674_v45 = vcombine.high %v501_v40, %v505_v41 }
  0x69   : > { %1319 = vmatpush1.bf16.msra.mxu0 %v4607_v49  ;;  %1362 = vmatpush1.bf16.msra.mxu1 %v4609_v50  ;;  %v513_v49 = vld [vmem:[%s5251_s17 + $0x2f8] sm:$0xff]  ;;  %v4671_v50 = vcombine.low %v500_v38, %v504_v39 }
  0x6a   : > { %1320 = vmatprep.subr.bf16.mxu0 %v4616_v51  ;;  %1363 = vmatprep.subr.bf16.mxu1 %v4618_v52  ;;  %v4673_v51 = vcombine.low %v501_v40, %v505_v41  ;;  %v4680_v52 = vcombine.high %v508_v46, %v512_v47  ;;  %v4682_v53 = vcombine.high %v509_v48, %v513_v49 }
  0x6d   : > { %1321 = vmatpush1.bf16.msra.mxu0 %v4615_v57  ;;  %1364 = vmatpush1.bf16.msra.mxu1 %v4617_v10  ;;  %v521_v57 = vld [vmem:[%s5251_s17 + $0x338] sm:$0xff]  ;;  %v4679_v10 = vcombine.low %v508_v46, %v512_v47 }
  0x6e   : > { %1322 = vmatprep.subr.bf16.mxu0 %v4624_v58  ;;  %1365 = vmatprep.subr.bf16.mxu1 %v4626_v59  ;;  %v4681_v58 = vcombine.low %v509_v48, %v513_v49  ;;  %v4688_v59 = vcombine.high %v516_v54, %v520_v55  ;;  %v4690_v60 = vcombine.high %v517_v56, %v521_v57 }
  0x71   : > { %1323 = vmatpush1.bf16.msra.mxu0 %v4623_v0  ;;  %1366 = vmatpush1.bf16.msra.mxu1 %v4625_v1  ;;  %v529_v0 = vld [vmem:[%s5251_s17 + $0x378] sm:$0xff]  ;;  %v4687_v1 = vcombine.low %v516_v54, %v520_v55 }
  0x72   : > { %1324 = vmatprep.subr.bf16.mxu0 %v4632_v2  ;;  %1367 = vmatprep.subr.bf16.mxu1 %v4634_v3  ;;  %v4689_v2 = vcombine.low %v517_v56, %v521_v57  ;;  %v4696_v3 = vcombine.high %v524_v61, %v528_v62  ;;  %v4698_v4 = vcombine.high %v525_v63, %v529_v0 }
  0x75   : > { %1325 = vmatpush1.bf16.msra.mxu0 %v4631_v8  ;;  %1368 = vmatpush1.bf16.msra.mxu1 %v4633_v9  ;;  %v537_v8 = vld [vmem:[%s5251_s17 + $0x3b8] sm:$0xff]  ;;  %v4695_v9 = vcombine.low %v524_v61, %v528_v62 }
  0x76   : > { %1326 = vmatprep.subr.bf16.mxu0 %v4640_v11  ;;  %1369 = vmatprep.subr.bf16.mxu1 %v4642_v12  ;;  %v4697_v11 = vcombine.low %v525_v63, %v529_v0  ;;  %v4704_v12 = vcombine.high %v532_v5, %v536_v6  ;;  %v4706_v13 = vcombine.high %v533_v7, %v537_v8 }
  0x79   : > { %1327 = vmatpush1.bf16.msra.mxu0 %v4639_v17  ;;  %1370 = vmatpush1.bf16.msra.mxu1 %v4641_v18  ;;  %v545_v17 = vld [vmem:[%s5251_s17 + $0x3f8] sm:$0xff]  ;;  %v4703_v18 = vcombine.low %v532_v5, %v536_v6 }
  0x7a   : > { %1328 = vmatprep.subr.bf16.mxu0 %v4648_v19  ;;  %1371 = vmatprep.subr.bf16.mxu1 %v4650_v20  ;;  %v4705_v19 = vcombine.low %v533_v7, %v537_v8  ;;  %v4712_v20 = vcombine.high %v540_v14, %v544_v15  ;;  %v4714_v21 = vcombine.high %v541_v16, %v545_v17 }
  0x7b   : > { %v4713_v23 = vcombine.low %v541_v16, %v545_v17 }
  0x7d   : > { %1329 = vmatpush1.bf16.msra.mxu0 %v4647_v25  ;;  %1372 = vmatpush1.bf16.msra.mxu1 %v4649_v26  ;;  %v549_v25 = vshrl.u32 %v548_v24, 7 }
  0x7e   : > { %1330 = vmatprep.subr.bf16.mxu0 %v4656_v27  ;;  %1373 = vmatprep.subr.bf16.mxu1 %v4658_v28  ;;  %v546_v27 = vld [vmem:[%s5256_s20] sm:$0xff] }
  0x7f   : > { %v550_v26 = vsub.s32 0, %v549_v25  ;;  %v558_v28 = vsub.s32 2, %v549_v25  ;;  %v554_v29 = vsub.s32 1, %v549_v25  ;;  %v562_v31 = vsub.s32 3, %v549_v25 }
  0x80   : > { %v578_v54 = vsub.s32 7, %v549_v25 }
  0x81   : > { %1331 = vmatpush1.bf16.msra.mxu0 %v4655_v34  ;;  %1374 = vmatpush1.bf16.msra.mxu1 %v4657_v35  ;;  %v551_v32 = vrot.slane %v546_v27, %v550_v26  ;;  %v559_v33 = vrot.slane %v546_v27, %v558_v28  ;;  %v555_v34 = vrot.slane %v546_v27, %v554_v29 }
  0x82   : > { %1332 = vmatprep.subr.bf16.mxu0 %v4664_v36  ;;  %1375 = vmatprep.subr.bf16.mxu1 %v4666_v37  ;;  %v563_v35 = vrot.slane %v546_v27, %v562_v31 }
  0x85   : > { %1333 = vmatpush1.bf16.msra.mxu0 %v4663_v42  ;;  %1376 = vmatpush1.bf16.msra.mxu1 %v4665_v43 }
  0x86   : > { %1334 = vmatprep.subr.bf16.mxu0 %v4672_v44  ;;  %1377 = vmatprep.subr.bf16.mxu1 %v4674_v45 }
  0x89   : > { %1335 = vmatpush1.bf16.msra.mxu0 %v4671_v50  ;;  %1378 = vmatpush1.bf16.msra.mxu1 %v4673_v51  ;;  %v566_v51 = vsub.s32 4, %v549_v25 }
  0x8a   : > { %1336 = vmatprep.subr.bf16.mxu0 %v4680_v52  ;;  %1379 = vmatprep.subr.bf16.mxu1 %v4682_v53  ;;  %v574_v52 = vsub.s32 6, %v549_v25  ;;  %v570_v53 = vsub.s32 5, %v549_v25 }
  0x8b   : > { %v567_v55 = vrot.slane %v546_v27, %v566_v51 }
  0x8c   : > { %v575_v56 = vrot.slane %v546_v27, %v574_v52  ;;  %v571_v57 = vrot.slane %v546_v27, %v570_v53 }
  0x8d   : > { %1337 = vmatpush1.bf16.msra.mxu0 %v4679_v10  ;;  %1380 = vmatpush1.bf16.msra.mxu1 %v4681_v58  ;;  %v579_v10 = vrot.slane %v546_v27, %v578_v54 }
  0x8e   : > { %1338 = vmatprep.subr.bf16.mxu0 %v4688_v59  ;;  %1381 = vmatprep.subr.bf16.mxu1 %v4690_v60 }
  0x91   : > { %1339 = vmatpush1.bf16.msra.mxu0 %v4687_v1  ;;  %1382 = vmatpush1.bf16.msra.mxu1 %v4689_v2 }
  0x92   : > { %1340 = vmatprep.subr.bf16.mxu0 %v4696_v3  ;;  %1383 = vmatprep.subr.bf16.mxu1 %v4698_v4 }
  0x95   : > { %1341 = vmatpush1.bf16.msra.mxu0 %v4695_v9  ;;  %1384 = vmatpush1.bf16.msra.mxu1 %v4697_v11 }
  0x96   : > { %1342 = vmatprep.subr.bf16.mxu0 %v4704_v12  ;;  %1385 = vmatprep.subr.bf16.mxu1 %v4706_v13 }
  0x99   : > { %1343 = vmatpush1.bf16.msra.mxu0 %v4703_v18  ;;  %1386 = vmatpush1.bf16.msra.mxu1 %v4705_v19 }
  0x9a   : > { %1344 = vmatprep.subr.bf16.mxu0 %v4712_v20  ;;  %1387 = vmatprep.subr.bf16.mxu1 %v4714_v21 }
  0x9d   : > { %1345 = vmatpush1.bf16.msra.mxu0 %v4711_v22  ;;  %1388 = vmatpush1.bf16.msra.mxu1 %v4713_v23 }
  0xa0   : > { %1347 = vmatmul.mubr.bf16.vlgmr.msra.gmra.mrb[4].mxu0 %v5382_v30  ;;  %1390 = vmatmul.mubr.bf16.vlgmr.msra.gmra.mrb[4].mxu1 %v5382_v30 }
 0x133   : > { %v1262_v36 = vpop.f32.mrb[0].mxu0  ;;  %v1305_v38 = vpop.f32.mrb[0].mxu1 }
 0x134   : > { %v1263_v37 = vadd.f32 %v1262_v36, %v551_v32  ;;  %v1264_v39 = vpop.f32.mrb[1].mxu0  ;;  %v1306_v40 = vadd.f32 %v1305_v38, %v559_v33  ;;  %v1307_v42 = vpop.f32.mrb[1].mxu1 }
 0x135   : > { %v1265_v41 = vadd.f32 %v1264_v39, %v555_v34  ;;  %v1266_v43 = vpop.f32.mrb[2].mxu0  ;;  %v1308_v30 = vadd.f32 %v1307_v42, %v563_v35  ;;  %v1309_v45 = vpop.f32.mrb[2].mxu1 }
 0x136   : > { %1400 = vst [vmem:[#allocation3] sm:$0xff] %v1263_v37  ;;  %v1267_v44 = vadd.f32 %v1266_v43, %v551_v32  ;;  %v1268_v46 = vpop.f32.mrb[3].mxu0  ;;  %1402 = vst [vmem:[#allocation3 + $0x10] sm:$0xff] %v1306_v40  ;;  %v1310_v47 = vadd.f32 %v1309_v45, %v559_v33  ;;  %v1311_v49 = vpop.f32.mrb[3].mxu1 }
 0x137   : > { %1401 = vst [vmem:[#allocation3 + $0x8] sm:$0xff] %v1265_v41  ;;  %v1269_v48 = vadd.f32 %v1268_v46, %v555_v34  ;;  %1403 = vst [vmem:[#allocation3 + $0x18] sm:$0xff] %v1308_v30  ;;  %v1312_v50 = vadd.f32 %v1311_v49, %v563_v35 }
 0x138   : > { %1408 = vst [vmem:[#allocation3 + $0x40] sm:$0xff] %v1267_v44  ;;  %1410 = vst [vmem:[#allocation3 + $0x50] sm:$0xff] %v1310_v47 }
 0x139   : > { %1409 = vst [vmem:[#allocation3 + $0x48] sm:$0xff] %v1269_v48  ;;  %1411 = vst [vmem:[#allocation3 + $0x58] sm:$0xff] %v1312_v50 }
 0x173   : > { %v1348_v58 = vpop.f32.mrb[4].mxu0  ;;  %v1391_v60 = vpop.f32.mrb[4].mxu1 }
 0x174   : > { %v1349_v59 = vadd.f32 %v1348_v58, %v567_v55  ;;  %v1350_v61 = vpop.f32.mrb[5].mxu0  ;;  %v1392_v62 = vadd.f32 %v1391_v60, %v575_v56  ;;  %v1393_v0 = vpop.f32.mrb[5].mxu1 }
 0x175   : > { %v1351_v63 = vadd.f32 %v1350_v61, %v571_v57  ;;  %v1352_v1 = vpop.f32.mrb[6].mxu0  ;;  %v1394_v2 = vadd.f32 %v1393_v0, %v579_v10  ;;  %v1395_v4 = vpop.f32.mrb[6].mxu1 }
 0x176   : > { %1404 = vst [vmem:[#allocation3 + $0x20] sm:$0xff] %v1349_v59  ;;  %v1353_v3 = vadd.f32 %v1352_v1, %v567_v55  ;;  %v1354_v5 = vpop.f32.mrb[7].mxu0  ;;  %1406 = vst [vmem:[#allocation3 + $0x30] sm:$0xff] %v1392_v62  ;;  %v1396_v6 = vadd.f32 %v1395_v4, %v575_v56  ;;  %v1397_v8 = vpop.f32.mrb[7].mxu1 }
 0x177   : > { %1405 = vst [vmem:[#allocation3 + $0x28] sm:$0xff] %v1351_v63  ;;  %v1355_v7 = vadd.f32 %v1354_v5, %v571_v57  ;;  %1407 = vst [vmem:[#allocation3 + $0x38] sm:$0xff] %v1394_v2  ;;  %v1398_v9 = vadd.f32 %v1397_v8, %v579_v10 }
 0x178   : > { %1412 = vst [vmem:[#allocation3 + $0x60] sm:$0xff] %v1353_v3  ;;  %1414 = vst [vmem:[#allocation3 + $0x70] sm:$0xff] %v1396_v6 }
 0x179   : > { %1413 = vst [vmem:[#allocation3 + $0x68] sm:$0xff] %v1355_v7  ;;  %1415 = vst [vmem:[#allocation3 + $0x78] sm:$0xff] %v1398_v9 }
 0x17a PF: > { %v1417_v11 = vld [vmem:[%s5246_s12 + $0x8] sm:$0xff]  ;;  %v1416_v17 = vld [vmem:[%s5246_s12] sm:$0xff]  ;;  %v7171_v19 = vmov 0   ;;  %p4843_p8 = scmp.ge.s32.totalorder %s5236_s28, 2 }
 0x17b   : > { %v1421_v12 = vld [vmem:[%s5246_s12 + $0x28] sm:$0xff]  ;;  %v1420_v18 = vld [vmem:[%s5246_s12 + $0x20] sm:$0xff]  ;;  %2266 = vmatprep.mubr.bf16.mxu1 %v7171_v19  ;;  %2225 = vmatprep.mubr.bf16.mxu0 %v7171_v19 }
 0x17c   : > { %v1425_v13 = vld [vmem:[%s5246_s12 + $0x48] sm:$0xff]  ;;  %v5452_v14 = vcombine.high %v1417_v11, %v1421_v12  ;;  %v5454_v15 = vcombine.low %v1417_v11, %v1421_v12  ;;  %v5463_v21 = vcombine.high %v1416_v17, %v1420_v18  ;;  %v5465_v22 = vcombine.low %v1416_v17, %v1420_v18  ;;  %v1424_v25 = vld [vmem:[%s5246_s12 + $0x40] sm:$0xff] }
 0x17d   : > { %v1429_v16 = vld [vmem:[%s5246_s12 + $0x68] sm:$0xff]  ;;  %v1428_v26 = vld [vmem:[%s5246_s12 + $0x60] sm:$0xff] }
 0x17e   : > { %v5461_v20 = vcombine.high %v1425_v13, %v1429_v16  ;;  %v1433_v23 = vld [vmem:[%s5246_s12 + $0x88] sm:$0xff]  ;;  %2234 = vmatprep.subr.bf16.mxu1 %v5452_v14  ;;  %v5473_v27 = vcombine.low %v1425_v13, %v1429_v16  ;;  %2193 = vmatprep.subr.bf16.mxu0 %v5463_v21  ;;  %v5476_v28 = vcombine.high %v1424_v25, %v1428_v26  ;;  %v1432_v29 = vld [vmem:[%s5246_s12 + $0x80] sm:$0xff] }
 0x17f   : > { %v1437_v24 = vld [vmem:[%s5246_s12 + $0xa8] sm:$0xff]  ;;  %2235 = vmatpush1.bf16.msra.mxu1 %v5454_v15  ;;  %v1436_v31 = vld [vmem:[%s5246_s12 + $0xa0] sm:$0xff]  ;;  %2194 = vmatpush1.bf16.msra.mxu0 %v5465_v22  ;;  %v5484_v33 = vcombine.low %v1424_v25, %v1428_v26 }
 0x180   : > { %2236 = vmatprep.subr.bf16.mxu1 %v5461_v20  ;;  %v5482_v32 = vcombine.high %v1433_v23, %v1437_v24  ;;  %2195 = vmatprep.subr.bf16.mxu0 %v5476_v28  ;;  %v1441_v34 = vld [vmem:[%s5246_s12 + $0xc8] sm:$0xff]  ;;  %v5489_v36 = vcombine.high %v1432_v29, %v1436_v31  ;;  %v1440_v37 = vld [vmem:[%s5246_s12 + $0xc0] sm:$0xff]  ;;  %v5494_v39 = vcombine.low %v1433_v23, %v1437_v24 }
 0x181   : > { %v1445_v35 = vld [vmem:[%s5246_s12 + $0xe8] sm:$0xff]  ;;  %v1444_v38 = vld [vmem:[%s5246_s12 + $0xe0] sm:$0xff]  ;;  %v5500_v41 = vcombine.low %v1432_v29, %v1436_v31 }
 0x182   : > { %v5498_v40 = vcombine.high %v1441_v34, %v1445_v35  ;;  %v1449_v42 = vld [vmem:[%s5246_s12 + $0x108] sm:$0xff]  ;;  %v5505_v30 = vcombine.high %v1440_v37, %v1444_v38  ;;  %v1448_v44 = vld [vmem:[%s5246_s12 + $0x100] sm:$0xff]  ;;  %v5510_v46 = vcombine.low %v1441_v34, %v1445_v35  ;;  %v5516_v48 = vcombine.low %v1440_v37, %v1444_v38 }
 0x183   : > { %2237 = vmatpush1.bf16.msra.mxu1 %v5473_v27  ;;  %2196 = vmatpush1.bf16.msra.mxu0 %v5484_v33  ;;  %v1453_v43 = vld [vmem:[%s5246_s12 + $0x128] sm:$0xff]  ;;  %v1452_v45 = vld [vmem:[%s5246_s12 + $0x120] sm:$0xff] }
 0x184   : > { %2238 = vmatprep.subr.bf16.mxu1 %v5482_v32  ;;  %2197 = vmatprep.subr.bf16.mxu0 %v5489_v36  ;;  %v5514_v47 = vcombine.high %v1449_v42, %v1453_v43  ;;  %v1457_v49 = vld [vmem:[%s5246_s12 + $0x148] sm:$0xff]  ;;  %v5521_v51 = vcombine.high %v1448_v44, %v1452_v45  ;;  %v1456_v52 = vld [vmem:[%s5246_s12 + $0x140] sm:$0xff]  ;;  %v5526_v54 = vcombine.low %v1449_v42, %v1453_v43 }
 0x185   : > { %v1461_v50 = vld [vmem:[%s5246_s12 + $0x168] sm:$0xff]  ;;  %v1460_v53 = vld [vmem:[%s5246_s12 + $0x160] sm:$0xff]  ;;  %v5532_v56 = vcombine.low %v1448_v44, %v1452_v45 }
 0x186   : > { %v5530_v55 = vcombine.high %v1457_v49, %v1461_v50  ;;  %v1465_v57 = vld [vmem:[%s5246_s12 + $0x188] sm:$0xff]  ;;  %v5537_v58 = vcombine.high %v1456_v52, %v1460_v53  ;;  %v1464_v59 = vld [vmem:[%s5246_s12 + $0x180] sm:$0xff]  ;;  %v5542_v61 = vcombine.low %v1457_v49, %v1461_v50  ;;  %v5548_v63 = vcombine.low %v1456_v52, %v1460_v53 }
 0x187   : > { %2239 = vmatpush1.bf16.msra.mxu1 %v5494_v39  ;;  %2198 = vmatpush1.bf16.msra.mxu0 %v5500_v41  ;;  %v1469_v10 = vld [vmem:[%s5246_s12 + $0x1a8] sm:$0xff]  ;;  %v1468_v60 = vld [vmem:[%s5246_s12 + $0x1a0] sm:$0xff] }
 0x188   : > { %2240 = vmatprep.subr.bf16.mxu1 %v5498_v40  ;;  %2199 = vmatprep.subr.bf16.mxu0 %v5505_v30  ;;  %v5546_v62 = vcombine.high %v1465_v57, %v1469_v10  ;;  %v1473_v0 = vld [vmem:[%s5246_s12 + $0x1c8] sm:$0xff]  ;;  %v5553_v2 = vcombine.high %v1464_v59, %v1468_v60  ;;  %v1472_v3 = vld [vmem:[%s5246_s12 + $0x1c0] sm:$0xff]  ;;  %v5558_v5 = vcombine.low %v1465_v57, %v1469_v10 }
 0x189   : > { %v1477_v1 = vld [vmem:[%s5246_s12 + $0x1e8] sm:$0xff]  ;;  %v1476_v4 = vld [vmem:[%s5246_s12 + $0x1e0] sm:$0xff]  ;;  %v5564_v7 = vcombine.low %v1464_v59, %v1468_v60 }
 0x18a   : > { %v5562_v6 = vcombine.high %v1473_v0, %v1477_v1  ;;  %v1481_v8 = vld [vmem:[%s5246_s12 + $0x208] sm:$0xff]  ;;  %v5569_v11 = vcombine.high %v1472_v3, %v1476_v4  ;;  %v1480_v12 = vld [vmem:[%s5246_s12 + $0x200] sm:$0xff]  ;;  %v5574_v16 = vcombine.low %v1473_v0, %v1477_v1  ;;  %v5580_v18 = vcombine.low %v1472_v3, %v1476_v4 }
 0x18b   : > { %2241 = vmatpush1.bf16.msra.mxu1 %v5510_v46  ;;  %2200 = vmatpush1.bf16.msra.mxu0 %v5516_v48  ;;  %v1485_v9 = vld [vmem:[%s5246_s12 + $0x228] sm:$0xff]  ;;  %v1484_v13 = vld [vmem:[%s5246_s12 + $0x220] sm:$0xff] }
 0x18c   : > { %2242 = vmatprep.subr.bf16.mxu1 %v5514_v47  ;;  %2201 = vmatprep.subr.bf16.mxu0 %v5521_v51  ;;  %v5578_v17 = vcombine.high %v1481_v8, %v1485_v9  ;;  %v1489_v23 = vld [vmem:[%s5246_s12 + $0x248] sm:$0xff]  ;;  %v5585_v25 = vcombine.high %v1480_v12, %v1484_v13  ;;  %v1488_v26 = vld [vmem:[%s5246_s12 + $0x240] sm:$0xff]  ;;  %v5590_v31 = vcombine.low %v1481_v8, %v1485_v9 }
 0x18d   : > { %v1493_v24 = vld [vmem:[%s5246_s12 + $0x268] sm:$0xff]  ;;  %v1492_v29 = vld [vmem:[%s5246_s12 + $0x260] sm:$0xff]  ;;  %v5596_v35 = vcombine.low %v1480_v12, %v1484_v13 }
 0x18e   : > { %v5594_v34 = vcombine.high %v1489_v23, %v1493_v24  ;;  %v1497_v37 = vld [vmem:[%s5246_s12 + $0x288] sm:$0xff]  ;;  %v5601_v42 = vcombine.high %v1488_v26, %v1492_v29  ;;  %v1496_v43 = vld [vmem:[%s5246_s12 + $0x280] sm:$0xff]  ;;  %v5606_v45 = vcombine.low %v1489_v23, %v1493_v24  ;;  %v5612_v50 = vcombine.low %v1488_v26, %v1492_v29 }
 0x18f   : > { %2243 = vmatpush1.bf16.msra.mxu1 %v5526_v54  ;;  %2202 = vmatpush1.bf16.msra.mxu0 %v5532_v56  ;;  %v1501_v38 = vld [vmem:[%s5246_s12 + $0x2a8] sm:$0xff]  ;;  %v1500_v44 = vld [vmem:[%s5246_s12 + $0x2a0] sm:$0xff] }
 0x190   : > { %2244 = vmatprep.subr.bf16.mxu1 %v5530_v55  ;;  %2203 = vmatprep.subr.bf16.mxu0 %v5537_v58  ;;  %7265 = vst [vmem:[#allocation7_spill] sm:$0xff] %v5594_v34  ;;  %7266 = vst [vmem:[#allocation8_spill] sm:$0xff] %v5601_v42  ;;  %v5610_v49 = vcombine.high %v1497_v37, %v1501_v38  ;;  %v1505_v52 = vld [vmem:[%s5246_s12 + $0x2c8] sm:$0xff]  ;;  %v5617_v57 = vcombine.high %v1496_v43, %v1500_v44  ;;  %v1504_v10 = vld [vmem:[%s5246_s12 + $0x2c0] sm:$0xff] }
 0x191   : > { %7267 = vst [vmem:[#allocation9_spill] sm:$0xff] %v5606_v45  ;;  %7269 = vst [vmem:[#allocation11_spill] sm:$0xff] %v5612_v50  ;;  %v1509_v53 = vld [vmem:[%s5246_s12 + $0x2e8] sm:$0xff]  ;;  %v1508_v59 = vld [vmem:[%s5246_s12 + $0x2e0] sm:$0xff]  ;;  %v5622_v60 = vcombine.low %v1497_v37, %v1501_v38  ;;  %v5628_v1 = vcombine.low %v1496_v43, %v1500_v44 }
 0x192   : > { %7268 = vst [vmem:[#allocation10_spill] sm:$0xff] %v5610_v49  ;;  %7270 = vst [vmem:[#allocation12_spill] sm:$0xff] %v5617_v57  ;;  %v5626_v0 = vcombine.high %v1505_v52, %v1509_v53  ;;  %v1513_v3 = vld [vmem:[%s5246_s12 + $0x308] sm:$0xff]  ;;  %v5633_v8 = vcombine.high %v1504_v10, %v1508_v59  ;;  %v1512_v9 = vld [vmem:[%s5246_s12 + $0x300] sm:$0xff]  ;;  %v5638_v13 = vcombine.low %v1505_v52, %v1509_v53 }
 0x193   : > { %2245 = vmatpush1.bf16.msra.mxu1 %v5542_v61  ;;  %2204 = vmatpush1.bf16.msra.mxu0 %v5548_v63  ;;  %7271 = vst [vmem:[#allocation13_spill] sm:$0xff] %v5622_v60  ;;  %7273 = vst [vmem:[#allocation15_spill] sm:$0xff] %v5628_v1  ;;  %v1517_v4 = vld [vmem:[%s5246_s12 + $0x328] sm:$0xff]  ;;  %v1516_v12 = vld [vmem:[%s5246_s12 + $0x320] sm:$0xff]  ;;  %v5644_v24 = vcombine.low %v1504_v10, %v1508_v59 }
 0x194   : > { %2246 = vmatprep.subr.bf16.mxu1 %v5546_v62  ;;  %2205 = vmatprep.subr.bf16.mxu0 %v5553_v2  ;;  %7272 = vst [vmem:[#allocation14_spill] sm:$0xff] %v5626_v0  ;;  %7274 = vst [vmem:[#allocation16_spill] sm:$0xff] %v5633_v8  ;;  %v5642_v23 = vcombine.high %v1513_v3, %v1517_v4  ;;  %v1521_v26 = vld [vmem:[%s5246_s12 + $0x348] sm:$0xff]  ;;  %v5649_v37 = vcombine.high %v1512_v9, %v1516_v12  ;;  %v1520_v38 = vld [vmem:[%s5246_s12 + $0x340] sm:$0xff] }
 0x195   : > { %7275 = vst [vmem:[#allocation17_spill] sm:$0xff] %v5638_v13  ;;  %7277 = vst [vmem:[#allocation19_spill] sm:$0xff] %v5644_v24  ;;  %v1525_v29 = vld [vmem:[%s5246_s12 + $0x368] sm:$0xff]  ;;  %v1524_v43 = vld [vmem:[%s5246_s12 + $0x360] sm:$0xff]  ;;  %v5654_v44 = vcombine.low %v1513_v3, %v1517_v4  ;;  %v5660_v53 = vcombine.low %v1512_v9, %v1516_v12 }
 0x196   : > { %7276 = vst [vmem:[#allocation18_spill] sm:$0xff] %v5642_v23  ;;  %7278 = vst [vmem:[#allocation20_spill] sm:$0xff] %v5649_v37  ;;  %v5658_v52 = vcombine.high %v1521_v26, %v1525_v29  ;;  %v1529_v10 = vld [vmem:[%s5246_s12 + $0x388] sm:$0xff]  ;;  %v5665_v19 = vcombine.high %v1520_v38, %v1524_v43  ;;  %v1528_v3 = vld [vmem:[%s5246_s12 + $0x380] sm:$0xff]  ;;  %v5676_v12 = vcombine.low %v1520_v38, %v1524_v43 }
 0x197   : > { %2247 = vmatpush1.bf16.msra.mxu1 %v5558_v5  ;;  %2206 = vmatpush1.bf16.msra.mxu0 %v5564_v7  ;;  %7279 = vst [vmem:[#allocation21_spill] sm:$0xff] %v5654_v44  ;;  %7281 = vst [vmem:[#allocation23_spill] sm:$0xff] %v5660_v53  ;;  %v1533_v59 = vld [vmem:[%s5246_s12 + $0x3a8] sm:$0xff]  ;;  %v1532_v4 = vld [vmem:[%s5246_s12 + $0x3a0] sm:$0xff] }
 0x198   : > { %2248 = vmatprep.subr.bf16.mxu1 %v5562_v6  ;;  %2207 = vmatprep.subr.bf16.mxu0 %v5569_v11  ;;  %7280 = vst [vmem:[#allocation22_spill] sm:$0xff] %v5658_v52  ;;  %7282 = vst [vmem:[#allocation24_spill] sm:$0xff] %v5665_v19  ;;  %v5674_v9 = vcombine.high %v1529_v10, %v1533_v59  ;;  %v5692_v43 = vcombine.low %v1528_v3, %v1532_v4 }
 0x199   : > { %7285 = vst [vmem:[#allocation27_spill] sm:$0xff] %v5676_v12 }
 0x19a   : > { %7284 = vst [vmem:[#allocation26_spill] sm:$0xff] %v5674_v9  ;;  %7289 = vst [vmem:[#allocation31_spill] sm:$0xff] %v5692_v43 }
 0x19b   : > { %2249 = vmatpush1.bf16.msra.mxu1 %v5574_v16  ;;  %2208 = vmatpush1.bf16.msra.mxu0 %v5580_v18 }
 0x19c   : > { %2250 = vmatprep.subr.bf16.mxu1 %v5578_v17  ;;  %2209 = vmatprep.subr.bf16.mxu0 %v5585_v25 }
 0x19f   : > { %2251 = vmatpush1.bf16.msra.mxu1 %v5590_v31  ;;  %2210 = vmatpush1.bf16.msra.mxu0 %v5596_v35 }
 0x1a0   : > { %2252 = vmatprep.subr.bf16.mxu1 %v5594_v34  ;;  %2211 = vmatprep.subr.bf16.mxu0 %v5601_v42 }
 0x1a3   : > { %2253 = vmatpush1.bf16.msra.mxu1 %v5606_v45  ;;  %2212 = vmatpush1.bf16.msra.mxu0 %v5612_v50 }
 0x1a4   : > { %2254 = vmatprep.subr.bf16.mxu1 %v5610_v49  ;;  %2213 = vmatprep.subr.bf16.mxu0 %v5617_v57 }
 0x1a7   : > { %2255 = vmatpush1.bf16.msra.mxu1 %v5622_v60  ;;  %2214 = vmatpush1.bf16.msra.mxu0 %v5628_v1  ;;  %v1542_v1 = vld [vmem:[%s5246_s12 + $0x3f0] sm:$0xff] }
 0x1a8   : > { %2256 = vmatprep.subr.bf16.mxu1 %v5626_v0  ;;  %2215 = vmatprep.subr.bf16.mxu0 %v5633_v8  ;;  %v7299_v8 = vmov 0   ;;  %v1538_v0 = vld [vmem:[%s5246_s12 + $0x3d0] sm:$0xff] }
 0x1ab   : > { %2257 = vmatpush1.bf16.msra.mxu1 %v5638_v13  ;;  %2216 = vmatpush1.bf16.msra.mxu0 %v5644_v24  ;;  %v1541_v24 = vld [vmem:[%s5246_s12 + $0x3e8] sm:$0xff]  ;;  %v5681_v13 = vcombine.high %v1528_v3, %v1532_v4 }
 0x1ac   : > { %2258 = vmatprep.subr.bf16.mxu1 %v5642_v23  ;;  %2217 = vmatprep.subr.bf16.mxu0 %v5649_v37  ;;  %v5670_v23 = vcombine.low %v1521_v26, %v1525_v29  ;;  %v1537_v37 = vld [vmem:[%s5246_s12 + $0x3c8] sm:$0xff]  ;;  %v1536_v26 = vld [vmem:[%s5246_s12 + $0x3c0] sm:$0xff] }
 0x1ad   : > { %7286 = vst [vmem:[#allocation28_spill] sm:$0xff] %v5681_v13  ;;  %v1540_v29 = vld [vmem:[%s5246_s12 + $0x3e0] sm:$0xff]  ;;  %v5690_v38 = vcombine.high %v1537_v37, %v1541_v24 }
 0x1ae   : > { %7283 = vst [vmem:[#allocation25_spill] sm:$0xff] %v5670_v23  ;;  %v5708_v4 = vcombine.low %v1536_v26, %v1540_v29 }
 0x1af   : > { %2259 = vmatpush1.bf16.msra.mxu1 %v5654_v44  ;;  %2218 = vmatpush1.bf16.msra.mxu0 %v5660_v53  ;;  %7288 = vst [vmem:[#allocation30_spill] sm:$0xff] %v5690_v38  ;;  %v1423_v53 = vld [vmem:[%s5246_s12 + $0x38] sm:$0xff]  ;;  %v5697_v44 = vcombine.high %v1536_v26, %v1540_v29 }
 0x1b0   : > { %2260 = vmatprep.subr.bf16.mxu1 %v5658_v52  ;;  %2219 = vmatprep.subr.bf16.mxu0 %v5665_v19  ;;  %v5686_v52 = vcombine.low %v1529_v10, %v1533_v59  ;;  %v1419_v19 = vld [vmem:[%s5246_s12 + $0x18] sm:$0xff]  ;;  %v1418_v10 = vld [vmem:[%s5246_s12 + $0x10] sm:$0xff]  ;;  %7293 = vst [vmem:[#allocation35_spill] sm:$0xff] %v5708_v4 }
 0x1b1   : > { %7290 = vst [vmem:[#allocation32_spill] sm:$0xff] %v5697_v44  ;;  %v1422_v59 = vld [vmem:[%s5246_s12 + $0x30] sm:$0xff]  ;;  %v5706_v3 = vcombine.high %v1419_v19, %v1423_v53 }
 0x1b2   : > { %7287 = vst [vmem:[#allocation29_spill] sm:$0xff] %v5686_v52  ;;  %v5724_v29 = vcombine.low %v1418_v10, %v1422_v59 }
 0x1b3   : > { %2261 = vmatpush1.bf16.msra.mxu1 %v5670_v23  ;;  %2220 = vmatpush1.bf16.msra.mxu0 %v5676_v12  ;;  %7292 = vst [vmem:[#allocation34_spill] sm:$0xff] %v5706_v3  ;;  %v1431_v12 = vld [vmem:[%s5246_s12 + $0x78] sm:$0xff]  ;;  %v5713_v23 = vcombine.high %v1418_v10, %v1422_v59 }
 0x1b4   : > { %2262 = vmatprep.subr.bf16.mxu1 %v5674_v9  ;;  %2221 = vmatprep.subr.bf16.mxu0 %v5681_v13  ;;  %v5702_v9 = vcombine.low %v1537_v37, %v1541_v24  ;;  %v1427_v13 = vld [vmem:[%s5246_s12 + $0x58] sm:$0xff]  ;;  %v1426_v24 = vld [vmem:[%s5246_s12 + $0x50] sm:$0xff]  ;;  %7297 = vst [vmem:[#allocation39_spill] sm:$0xff] %v5724_v29 }
 0x1b5   : > { %7294 = vst [vmem:[#allocation36_spill] sm:$0xff] %v5713_v23  ;;  %v1430_v37 = vld [vmem:[%s5246_s12 + $0x70] sm:$0xff]  ;;  %v5722_v26 = vcombine.high %v1427_v13, %v1431_v12 }
 0x1b6   : > { %7291 = vst [vmem:[#allocation33_spill] sm:$0xff] %v5702_v9  ;;  %v5742_v59 = vcombine.low %v1426_v24, %v1430_v37 }
 0x1b7   : > { %2263 = vmatpush1.bf16.msra.mxu1 %v5686_v52  ;;  %2222 = vmatpush1.bf16.msra.mxu0 %v5692_v43  ;;  %7296 = vst [vmem:[#allocation38_spill] sm:$0xff] %v5722_v26  ;;  %v1439_v43 = vld [vmem:[%s5246_s12 + $0xb8] sm:$0xff]  ;;  %v5729_v52 = vcombine.high %v1426_v24, %v1430_v37 }
 0x1b8   : > { %2264 = vmatprep.subr.bf16.mxu1 %v5690_v38  ;;  %2223 = vmatprep.subr.bf16.mxu0 %v5697_v44  ;;  %v5718_v38 = vcombine.low %v1419_v19, %v1423_v53  ;;  %v1435_v44 = vld [vmem:[%s5246_s12 + $0x98] sm:$0xff]  ;;  %v1434_v19 = vld [vmem:[%s5246_s12 + $0x90] sm:$0xff]  ;;  %7302 = vst [vmem:[#allocation43_spill] sm:$0xff] %v5742_v59 }
 0x1b9   : > { %7298 = vst [vmem:[#allocation40_spill] sm:$0xff] %v5729_v52  ;;  %v1438_v53 = vld [vmem:[%s5246_s12 + $0xb0] sm:$0xff]  ;;  %v5740_v10 = vcombine.high %v1435_v44, %v1439_v43  ;;  %v5754_v24 = vcombine.low %v1435_v44, %v1439_v43 }
 0x1ba   : > { %7295 = vst [vmem:[#allocation37_spill] sm:$0xff] %v5718_v38  ;;  %v1450_v44 = vld [vmem:[%s5246_s12 + $0x110] sm:$0xff] }
 0x1bb   : > { %2265 = vmatpush1.bf16.msra.mxu1 %v5702_v9  ;;  %2224 = vmatpush1.bf16.msra.mxu0 %v5708_v4  ;;  %7301 = vst [vmem:[#allocation42_spill] sm:$0xff] %v5740_v10  ;;  %v1447_v4 = vld [vmem:[%s5246_s12 + $0xf8] sm:$0xff]  ;;  %7304 = vst [vmem:[#allocation45_spill] sm:$0xff] %v5754_v24  ;;  %v1454_v43 = vld [vmem:[%s5246_s12 + $0x130] sm:$0xff] }
 0x1bc   : > { %2316 = vmatprep.subr.bf16.mxu1 %v5706_v3  ;;  %2275 = vmatprep.subr.bf16.mxu0 %v5713_v23  ;;  %v5735_v3 = vcombine.low %v1427_v13, %v1431_v12  ;;  %v1443_v23 = vld [vmem:[%s5246_s12 + $0xd8] sm:$0xff]  ;;  %v1442_v13 = vld [vmem:[%s5246_s12 + $0xd0] sm:$0xff] }
 0x1bd   : > { %v1446_v12 = vld [vmem:[%s5246_s12 + $0xf0] sm:$0xff]  ;;  %v5758_v37 = vcombine.high %v1443_v23, %v1447_v4 }
 0x1be   : > { %2267 = vmatmul.mubr.bf16.vlgmr.msra.gmra.mrb[0].mxu1 %v7299_v8  ;;  %7300 = vst [vmem:[#allocation41_spill] sm:$0xff] %v5735_v3  ;;  %2226 = vmatmul.mubr.bf16.vlgmr.msra.gmra.mrb[0].mxu0 %v7299_v8  ;;  %v5765_v9 = vcombine.high %v1442_v13, %v1446_v12 }
 0x1bf   : > { %2317 = vmatpush1.bf16.msra.mxu1 %v5718_v38  ;;  %2276 = vmatpush1.bf16.msra.mxu0 %v5724_v29  ;;  %v5747_v38 = vcombine.high %v1434_v19, %v1438_v53  ;;  %7305 = vst [vmem:[#allocation46_spill] sm:$0xff] %v5758_v37  ;;  %v1455_v29 = vld [vmem:[%s5246_s12 + $0x138] sm:$0xff] }
 0x1c0   : > { %2318 = vmatprep.subr.bf16.mxu1 %v5722_v26  ;;  %2277 = vmatprep.subr.bf16.mxu0 %v5729_v52  ;;  %v5760_v52 = vcombine.low %v1434_v19, %v1438_v53  ;;  %v1451_v26 = vld [vmem:[%s5246_s12 + $0x118] sm:$0xff]  ;;  %7307 = vst [vmem:[#allocation48_spill] sm:$0xff] %v5765_v9  ;;  %v5776_v53 = vcombine.low %v1442_v13, %v1446_v12 }
 0x1c1   : > { %7303 = vst [vmem:[#allocation44_spill] sm:$0xff] %v5747_v38  ;;  %2348 = vmatprep.mubr.bf16.mxu1 %v7299_v8  ;;  %2307 = vmatprep.mubr.bf16.mxu0 %v7299_v8  ;;  %v5774_v19 = vcombine.high %v1451_v26, %v1455_v29  ;;  %v5792_v12 = vcombine.low %v1450_v44, %v1454_v43 }
 0x1c2   : > { %7306 = vst [vmem:[#allocation47_spill] sm:$0xff] %v5760_v52  ;;  %7310 = vst [vmem:[#allocation51_spill] sm:$0xff] %v5776_v53 }
 0x1c3   : > { %2319 = vmatpush1.bf16.msra.mxu1 %v5735_v3  ;;  %2278 = vmatpush1.bf16.msra.mxu0 %v5742_v59  ;;  %7309 = vst [vmem:[#allocation50_spill] sm:$0xff] %v5774_v19  ;;  %v1463_v59 = vld [vmem:[%s5246_s12 + $0x178] sm:$0xff]  ;;  %v5781_v3 = vcombine.high %v1450_v44, %v1454_v43  ;;  %7314 = vst [vmem:[#allocation55_spill] sm:$0xff] %v5792_v12 }
 0x1c4   : > { %2320 = vmatprep.subr.bf16.mxu1 %v5740_v10  ;;  %2279 = vmatprep.subr.bf16.mxu0 %v5747_v38  ;;  %v5770_v10 = vcombine.low %v1443_v23, %v1447_v4  ;;  %v1459_v38 = vld [vmem:[%s5246_s12 + $0x158] sm:$0xff]  ;;  %v1458_v23 = vld [vmem:[%s5246_s12 + $0x150] sm:$0xff] }
 0x1c5   : > { %7311 = vst [vmem:[#allocation52_spill] sm:$0xff] %v5781_v3  ;;  %v1462_v4 = vld [vmem:[%s5246_s12 + $0x170] sm:$0xff]  ;;  %v5790_v13 = vcombine.high %v1459_v38, %v1463_v59 }
 0x1c6   : > { %7308 = vst [vmem:[#allocation49_spill] sm:$0xff] %v5770_v10  ;;  %v5808_v43 = vcombine.low %v1458_v23, %v1462_v4 }
 0x1c7   : > { %2321 = vmatpush1.bf16.msra.mxu1 %v5754_v24  ;;  %2280 = vmatpush1.bf16.msra.mxu0 %v5760_v52  ;;  %7313 = vst [vmem:[#allocation54_spill] sm:$0xff] %v5790_v13  ;;  %v1471_v52 = vld [vmem:[%s5246_s12 + $0x1b8] sm:$0xff]  ;;  %v5797_v24 = vcombine.high %v1458_v23, %v1462_v4 }
 0x1c8   : > { %2322 = vmatprep.subr.bf16.mxu1 %v5758_v37  ;;  %2281 = vmatprep.subr.bf16.mxu0 %v5765_v9  ;;  %v5786_v37 = vcombine.low %v1451_v26, %v1455_v29  ;;  %v1467_v9 = vld [vmem:[%s5246_s12 + $0x198] sm:$0xff]  ;;  %v1466_v26 = vld [vmem:[%s5246_s12 + $0x190] sm:$0xff]  ;;  %7318 = vst [vmem:[#allocation59_spill] sm:$0xff] %v5808_v43 }
 0x1c9   : > { %7315 = vst [vmem:[#allocation56_spill] sm:$0xff] %v5797_v24  ;;  %v1470_v29 = vld [vmem:[%s5246_s12 + $0x1b0] sm:$0xff]  ;;  %v5806_v44 = vcombine.high %v1467_v9, %v1471_v52 }
 0x1ca   : > { %7312 = vst [vmem:[#allocation53_spill] sm:$0xff] %v5786_v37  ;;  %v5824_v4 = vcombine.low %v1466_v26, %v1470_v29 }
 0x1cb   : > { %2323 = vmatpush1.bf16.msra.mxu1 %v5770_v10  ;;  %2282 = vmatpush1.bf16.msra.mxu0 %v5776_v53  ;;  %7317 = vst [vmem:[#allocation58_spill] sm:$0xff] %v5806_v44  ;;  %v1479_v53 = vld [vmem:[%s5246_s12 + $0x1f8] sm:$0xff]  ;;  %v5813_v10 = vcombine.high %v1466_v26, %v1470_v29 }
 0x1cc   : > { %2324 = vmatprep.subr.bf16.mxu1 %v5774_v19  ;;  %2283 = vmatprep.subr.bf16.mxu0 %v5781_v3  ;;  %v5802_v19 = vcombine.low %v1459_v38, %v1463_v59  ;;  %v1475_v3 = vld [vmem:[%s5246_s12 + $0x1d8] sm:$0xff]  ;;  %v1474_v38 = vld [vmem:[%s5246_s12 + $0x1d0] sm:$0xff]  ;;  %7322 = vst [vmem:[#allocation63_spill] sm:$0xff] %v5824_v4 }
 0x1cd   : > { %7319 = vst [vmem:[#allocation60_spill] sm:$0xff] %v5813_v10  ;;  %v1478_v59 = vld [vmem:[%s5246_s12 + $0x1f0] sm:$0xff]  ;;  %v5822_v23 = vcombine.high %v1475_v3, %v1479_v53 }
 0x1ce   : > { %7316 = vst [vmem:[#allocation57_spill] sm:$0xff] %v5802_v19  ;;  %v5840_v29 = vcombine.low %v1474_v38, %v1478_v59 }
 0x1cf   : > { %2325 = vmatpush1.bf16.msra.mxu1 %v5786_v37  ;;  %2284 = vmatpush1.bf16.msra.mxu0 %v5792_v12  ;;  %7321 = vst [vmem:[#allocation62_spill] sm:$0xff] %v5822_v23  ;;  %v1487_v12 = vld [vmem:[%s5246_s12 + $0x238] sm:$0xff]  ;;  %v5829_v37 = vcombine.high %v1474_v38, %v1478_v59 }
 0x1d0   : > { %2326 = vmatprep.subr.bf16.mxu1 %v5790_v13  ;;  %2285 = vmatprep.subr.bf16.mxu0 %v5797_v24  ;;  %v5818_v13 = vcombine.low %v1467_v9, %v1471_v52  ;;  %v1483_v24 = vld [vmem:[%s5246_s12 + $0x218] sm:$0xff]  ;;  %v1482_v52 = vld [vmem:[%s5246_s12 + $0x210] sm:$0xff]  ;;  %7326 = vst [vmem:[#allocation67_spill] sm:$0xff] %v5840_v29 }
 0x1d1   : > { %7323 = vst [vmem:[#allocation64_spill] sm:$0xff] %v5829_v37  ;;  %v1486_v9 = vld [vmem:[%s5246_s12 + $0x230] sm:$0xff]  ;;  %v5838_v26 = vcombine.high %v1483_v24, %v1487_v12 }
 0x1d2   : > { %7320 = vst [vmem:[#allocation61_spill] sm:$0xff] %v5818_v13  ;;  %v5856_v59 = vcombine.low %v1482_v52, %v1486_v9 }
 0x1d3   : > { %2327 = vmatpush1.bf16.msra.mxu1 %v5802_v19  ;;  %2286 = vmatpush1.bf16.msra.mxu0 %v5808_v43  ;;  %7325 = vst [vmem:[#allocation66_spill] sm:$0xff] %v5838_v26  ;;  %v1495_v43 = vld [vmem:[%s5246_s12 + $0x278] sm:$0xff]  ;;  %v5845_v19 = vcombine.high %v1482_v52, %v1486_v9 }
 0x1d4   : > { %2328 = vmatprep.subr.bf16.mxu1 %v5806_v44  ;;  %2287 = vmatprep.subr.bf16.mxu0 %v5813_v10  ;;  %v5834_v44 = vcombine.low %v1475_v3, %v1479_v53  ;;  %v1491_v10 = vld [vmem:[%s5246_s12 + $0x258] sm:$0xff]  ;;  %v1490_v3 = vld [vmem:[%s5246_s12 + $0x250] sm:$0xff]  ;;  %7330 = vst [vmem:[#allocation71_spill] sm:$0xff] %v5856_v59 }
 0x1d5   : > { %7327 = vst [vmem:[#allocation68_spill] sm:$0xff] %v5845_v19  ;;  %v1494_v53 = vld [vmem:[%s5246_s12 + $0x270] sm:$0xff]  ;;  %v5854_v38 = vcombine.high %v1491_v10, %v1495_v43 }
 0x1d6   : > { %7324 = vst [vmem:[#allocation65_spill] sm:$0xff] %v5834_v44  ;;  %v5872_v9 = vcombine.low %v1490_v3, %v1494_v53 }
 0x1d7   : > { %2329 = vmatpush1.bf16.msra.mxu1 %v5818_v13  ;;  %2288 = vmatpush1.bf16.msra.mxu0 %v5824_v4  ;;  %7329 = vst [vmem:[#allocation70_spill] sm:$0xff] %v5854_v38  ;;  %v1503_v4 = vld [vmem:[%s5246_s12 + $0x2b8] sm:$0xff]  ;;  %v5861_v13 = vcombine.high %v1490_v3, %v1494_v53 }
 0x1d8   : > { %2330 = vmatprep.subr.bf16.mxu1 %v5822_v23  ;;  %2289 = vmatprep.subr.bf16.mxu0 %v5829_v37  ;;  %v5850_v23 = vcombine.low %v1483_v24, %v1487_v12  ;;  %v1499_v37 = vld [vmem:[%s5246_s12 + $0x298] sm:$0xff]  ;;  %v1498_v24 = vld [vmem:[%s5246_s12 + $0x290] sm:$0xff]  ;;  %7334 = vst [vmem:[#allocation75_spill] sm:$0xff] %v5872_v9 }
 0x1d9   : > { %7331 = vst [vmem:[#allocation72_spill] sm:$0xff] %v5861_v13  ;;  %v1502_v12 = vld [vmem:[%s5246_s12 + $0x2b0] sm:$0xff]  ;;  %v5870_v52 = vcombine.high %v1499_v37, %v1503_v4 }
 0x1da   : > { %7328 = vst [vmem:[#allocation69_spill] sm:$0xff] %v5850_v23  ;;  %v5888_v53 = vcombine.low %v1498_v24, %v1502_v12 }
 0x1db   : > { %2331 = vmatpush1.bf16.msra.mxu1 %v5834_v44  ;;  %2290 = vmatpush1.bf16.msra.mxu0 %v5840_v29  ;;  %7333 = vst [vmem:[#allocation74_spill] sm:$0xff] %v5870_v52  ;;  %v1511_v29 = vld [vmem:[%s5246_s12 + $0x2f8] sm:$0xff]  ;;  %v5877_v44 = vcombine.high %v1498_v24, %v1502_v12 }
 0x1dc   : > { %2332 = vmatprep.subr.bf16.mxu1 %v5838_v26  ;;  %2291 = vmatprep.subr.bf16.mxu0 %v5845_v19  ;;  %v5866_v26 = vcombine.low %v1491_v10, %v1495_v43  ;;  %v1507_v19 = vld [vmem:[%s5246_s12 + $0x2d8] sm:$0xff]  ;;  %v1506_v10 = vld [vmem:[%s5246_s12 + $0x2d0] sm:$0xff]  ;;  %7338 = vst [vmem:[#allocation79_spill] sm:$0xff] %v5888_v53 }
 0x1dd   : > { %7335 = vst [vmem:[#allocation76_spill] sm:$0xff] %v5877_v44  ;;  %v1510_v43 = vld [vmem:[%s5246_s12 + $0x2f0] sm:$0xff]  ;;  %v5886_v3 = vcombine.high %v1507_v19, %v1511_v29 }
 0x1de   : > { %7332 = vst [vmem:[#allocation73_spill] sm:$0xff] %v5866_v26  ;;  %v5904_v12 = vcombine.low %v1506_v10, %v1510_v43 }
 0x1df   : > { %2333 = vmatpush1.bf16.msra.mxu1 %v5850_v23  ;;  %2292 = vmatpush1.bf16.msra.mxu0 %v5856_v59  ;;  %7337 = vst [vmem:[#allocation78_spill] sm:$0xff] %v5886_v3  ;;  %v1519_v59 = vld [vmem:[%s5246_s12 + $0x338] sm:$0xff]  ;;  %v5893_v23 = vcombine.high %v1506_v10, %v1510_v43 }
 0x1e0   : > { %2334 = vmatprep.subr.bf16.mxu1 %v5854_v38  ;;  %2293 = vmatprep.subr.bf16.mxu0 %v5861_v13  ;;  %v5882_v38 = vcombine.low %v1499_v37, %v1503_v4  ;;  %v1515_v13 = vld [vmem:[%s5246_s12 + $0x318] sm:$0xff]  ;;  %v1514_v37 = vld [vmem:[%s5246_s12 + $0x310] sm:$0xff]  ;;  %7342 = vst [vmem:[#allocation83_spill] sm:$0xff] %v5904_v12 }
 0x1e1   : > { %7339 = vst [vmem:[#allocation80_spill] sm:$0xff] %v5893_v23  ;;  %v1518_v4 = vld [vmem:[%s5246_s12 + $0x330] sm:$0xff]  ;;  %v5902_v24 = vcombine.high %v1515_v13, %v1519_v59 }
 0x1e2   : > { %7336 = vst [vmem:[#allocation77_spill] sm:$0xff] %v5882_v38  ;;  %v5920_v43 = vcombine.low %v1514_v37, %v1518_v4 }
 0x1e3   : > { %2335 = vmatpush1.bf16.msra.mxu1 %v5866_v26  ;;  %2294 = vmatpush1.bf16.msra.mxu0 %v5872_v9  ;;  %7341 = vst [vmem:[#allocation82_spill] sm:$0xff] %v5902_v24  ;;  %v1527_v9 = vld [vmem:[%s5246_s12 + $0x378] sm:$0xff]  ;;  %v5909_v26 = vcombine.high %v1514_v37, %v1518_v4 }
 0x1e4   : > { %2336 = vmatprep.subr.bf16.mxu1 %v5870_v52  ;;  %2295 = vmatprep.subr.bf16.mxu0 %v5877_v44  ;;  %v5898_v52 = vcombine.low %v1507_v19, %v1511_v29  ;;  %v1523_v44 = vld [vmem:[%s5246_s12 + $0x358] sm:$0xff]  ;;  %v1522_v19 = vld [vmem:[%s5246_s12 + $0x350] sm:$0xff]  ;;  %7346 = vst [vmem:[#allocation87_spill] sm:$0xff] %v5920_v43 }
 0x1e5   : > { %7343 = vst [vmem:[#allocation84_spill] sm:$0xff] %v5909_v26  ;;  %v1526_v29 = vld [vmem:[%s5246_s12 + $0x370] sm:$0xff]  ;;  %v5918_v10 = vcombine.high %v1523_v44, %v1527_v9 }
 0x1e6   : > { %7340 = vst [vmem:[#allocation81_spill] sm:$0xff] %v5898_v52  ;;  %v5936_v4 = vcombine.low %v1522_v19, %v1526_v29 }
 0x1e7   : > { %2337 = vmatpush1.bf16.msra.mxu1 %v5882_v38  ;;  %2296 = vmatpush1.bf16.msra.mxu0 %v5888_v53  ;;  %7345 = vst [vmem:[#allocation86_spill] sm:$0xff] %v5918_v10  ;;  %v1535_v53 = vld [vmem:[%s5246_s12 + $0x3b8] sm:$0xff]  ;;  %v5925_v38 = vcombine.high %v1522_v19, %v1526_v29  ;;  %v5955_v29 = vcombine.high %v1538_v0, %v1542_v1 }
 0x1e8   : > { %2338 = vmatprep.subr.bf16.mxu1 %v5886_v3  ;;  %2297 = vmatprep.subr.bf16.mxu0 %v5893_v23  ;;  %v5914_v3 = vcombine.low %v1515_v13, %v1519_v59  ;;  %v1531_v23 = vld [vmem:[%s5246_s12 + $0x398] sm:$0xff]  ;;  %v1530_v13 = vld [vmem:[%s5246_s12 + $0x390] sm:$0xff]  ;;  %7350 = vst [vmem:[#allocation91_spill] sm:$0xff] %v5936_v4 }
 0x1e9   : > { %7347 = vst [vmem:[#allocation88_spill] sm:$0xff] %v5925_v38  ;;  %v1534_v59 = vld [vmem:[%s5246_s12 + $0x3b0] sm:$0xff]  ;;  %v5934_v37 = vcombine.high %v1531_v23, %v1535_v53  ;;  %7355 = vst [vmem:[#allocation96_spill] sm:$0xff] %v5955_v29 }
 0x1ea   : > { %7344 = vst [vmem:[#allocation85_spill] sm:$0xff] %v5914_v3  ;;  %v5952_v19 = vcombine.low %v1530_v13, %v1534_v59 }
 0x1eb   : > { %2339 = vmatpush1.bf16.msra.mxu1 %v5898_v52  ;;  %2298 = vmatpush1.bf16.msra.mxu0 %v5904_v12  ;;  %7349 = vst [vmem:[#allocation90_spill] sm:$0xff] %v5934_v37  ;;  %v1543_v12 = vld [vmem:[%s5246_s12 + $0x3f8] sm:$0xff]  ;;  %v5941_v52 = vcombine.high %v1530_v13, %v1534_v59 }
 0x1ec   : > { %2340 = vmatprep.subr.bf16.mxu1 %v5902_v24  ;;  %2299 = vmatprep.subr.bf16.mxu0 %v5909_v26  ;;  %v5930_v24 = vcombine.low %v1523_v44, %v1527_v9  ;;  %v1539_v26 = vld [vmem:[%s5246_s12 + $0x3d8] sm:$0xff]  ;;  %v5946_v44 = vcombine.low %v1531_v23, %v1535_v53  ;;  %7354 = vst [vmem:[#allocation95_spill] sm:$0xff] %v5952_v19 }
 0x1ed   : > { %7351 = vst [vmem:[#allocation92_spill] sm:$0xff] %v5941_v52  ;;  %v5950_v9 = vcombine.high %v1539_v26, %v1543_v12  ;;  %v5962_v23 = vcombine.low %v1538_v0, %v1542_v1  ;;  %v1547_v0 = vld [vmem:[#allocation3 + $0x10] sm:$0x3]  ;;  %v1548_v1 = vld [vmem:[#allocation3 + $0x18] sm:$0x3] }
 0x1ee   : > { %7348 = vst [vmem:[#allocation89_spill] sm:$0xff] %v5930_v24  ;;  %7352 = vst [vmem:[#allocation93_spill] sm:$0xff] %v5946_v44 }
 0x1ef   : > { %2341 = vmatpush1.bf16.msra.mxu1 %v5914_v3  ;;  %2300 = vmatpush1.bf16.msra.mxu0 %v5920_v43  ;;  %7353 = vst [vmem:[#allocation94_spill] sm:$0xff] %v5950_v9  ;;  %7357 = vst [vmem:[#allocation98_spill] sm:$0xff] %v5962_v23  ;;  %v1550_v3 = vld [vmem:[#allocation3 + $0x28] sm:$0x3] }
 0x1f0   : > { %2342 = vmatprep.subr.bf16.mxu1 %v5918_v10  ;;  %2301 = vmatprep.subr.bf16.mxu0 %v5925_v38  ;;  %v5958_v38 = vcombine.low %v1539_v26, %v1543_v12 }
 0x1f2   : > { %7356 = vst [vmem:[#allocation97_spill] sm:$0xff] %v5958_v38 }
 0x1f3   : > { %2343 = vmatpush1.bf16.msra.mxu1 %v5930_v24  ;;  %2302 = vmatpush1.bf16.msra.mxu0 %v5936_v4 }
 0x1f4   : > { %2344 = vmatprep.subr.bf16.mxu1 %v5934_v37  ;;  %2303 = vmatprep.subr.bf16.mxu0 %v5941_v52  ;;  %v1545_v52 = vld [vmem:[#allocation3] sm:$0x3]  ;;  %v1546_v37 = vld [vmem:[#allocation3 + $0x8] sm:$0x3] }
 0x1f7   : > { %2345 = vmatpush1.bf16.msra.mxu1 %v5946_v44  ;;  %2304 = vmatpush1.bf16.msra.mxu0 %v5952_v19 }
 0x1f8   : > { %2346 = vmatprep.subr.bf16.mxu1 %v5950_v9  ;;  %2305 = vmatprep.subr.bf16.mxu0 %v5955_v29 }
 0x1fb   : > { %2347 = vmatpush1.bf16.msra.mxu1 %v5958_v38  ;;  %2306 = vmatpush1.bf16.msra.mxu0 %v5962_v23 }
 0x1fe   : > { %2349 = vmatmul.mubr.bf16.vlgmr.msra.gmra.mrb[4].mxu1 %v7299_v8  ;;  %2308 = vmatmul.mubr.bf16.vlgmr.msra.gmra.mrb[4].mxu0 %v7299_v8 }
 0x291   : > { %v2268_v53 = vpop.f32.mrb[0].mxu1  ;;  %v2227_v26 = vpop.f32.mrb[0].mxu0 }
 0x292   : > { %v2270_v13 = vpop.f32.mrb[1].mxu1  ;;  %v2229_v59 = vpop.f32.mrb[1].mxu0  ;;  %v2359_v29 = vadd.f32 %v2268_v53, %v1547_v0  ;;  %v2357_v4 = vadd.f32 %v2227_v26, %v1545_v52 }
 0x293   : > { %v2272_v12 = vpop.f32.mrb[2].mxu1  ;;  %v2231_v44 = vpop.f32.mrb[2].mxu0  ;;  %v2360_v38 = vadd.f32 %v2270_v13, %v1548_v1  ;;  %v2358_v23 = vadd.f32 %v2229_v59, %v1546_v37 }
 0x294   : > { %v2273_v9 = vpop.f32.mrb[3].mxu1  ;;  %v2232_v19 = vpop.f32.mrb[3].mxu0  ;;  %v2367_v24 = vmul.f32 0.5, %v2359_v29  ;;  %v2365_v43 = vmul.f32 0.5, %v2357_v4  ;;  %v1551_v12 = vld [vmem:[#allocation3 + $0x30] sm:$0x3] }
 0x295   : > { %v2368_v10 = vmul.f32 0.5, %v2360_v38  ;;  %v2366_v8 = vmul.f32 0.5, %v2358_v23  ;;  %v1552_v9 = vld [vmem:[#allocation3 + $0x38] sm:$0x3]  ;;  %v1549_v44 = vld [vmem:[#allocation3 + $0x20] sm:$0x3] }
 0x296   : > { %4957 = vtanh.f32 %v2367_v24 }
 0x297   : > { %4959 = vtanh.f32 %v2368_v10 }
 0x298   : > { %4961 = vtanh.f32 %v2365_v43 }
 0x299   : > { %4963 = vtanh.f32 %v2366_v8 }
 0x2a0   : > { %v4958_v29 = vpop.eup %4957 }
 0x2a1   : > { %v4960_v10 = vpop.eup %4959  ;;  %v2379_v8 = vmul.f32 0.5, %v4958_v29 }
 0x2a2   : > { %v4962_v26 = vpop.eup %4961 }
 0x2a3   : > { %v4964_v1 = vpop.eup %4963 }
 0x2d1   : > { %v2350_v19 = vpop.f32.mrb[4].mxu1  ;;  %v2309_v53 = vpop.f32.mrb[4].mxu0 }
 0x2d2   : > { %v2363_v60 = vadd.f32 %v2350_v19, %v1551_v12  ;;  %v2352_v57 = vpop.f32.mrb[5].mxu1  ;;  %v2361_v52 = vadd.f32 %v2309_v53, %v1549_v44  ;;  %v2311_v37 = vpop.f32.mrb[5].mxu0  ;;  %v2380_v12 = vmul.f32 0.5, %v4960_v10  ;;  %v2377_v19 = vmul.f32 0.5, %v4962_v26 }
 0x2d3   : > { %v2364_v0 = vadd.f32 %v2352_v57, %v1552_v9  ;;  %v2354_v13 = vpop.f32.mrb[6].mxu1  ;;  %v2362_v4 = vadd.f32 %v2311_v37, %v1550_v3  ;;  %v2313_v24 = vpop.f32.mrb[6].mxu0  ;;  %v2378_v57 = vmul.f32 0.5, %v4964_v1  ;;  %v2385_v9 = vadd.f32 0.5, %v2379_v8 }
 0x2d4   : > { %4965 = vtanh.f32 %v2363_v60  ;;  %v2355_v38 = vpop.f32.mrb[7].mxu1  ;;  %v2369_v43 = vmul.f32 0.5, %v2361_v52  ;;  %v2314_v23 = vpop.f32.mrb[7].mxu0  ;;  %v2386_v44 = vadd.f32 0.5, %v2380_v12  ;;  %v2383_v53 = vadd.f32 0.5, %v2377_v19 }
 0x2d5   : > { %4967 = vtanh.f32 %v2364_v0  ;;  %v2370_v59 = vmul.f32 0.5, %v2362_v4  ;;  %v2384_v13 = vadd.f32 0.5, %v2378_v57  ;;  %v2391_v37 = vmul.f32 0.0, %v2385_v9 }
 0x2d6   : > { %4969 = vtanh.f32 %v2369_v43  ;;  %v2392_v0 = vmul.f32 0.0, %v2386_v44 }
 0x2d7   : > { %4971 = vtanh.f32 %v2370_v59 }
 0x2de   : > { %v4966_v60 = vpop.eup %4965 }
 0x2df   : > { %v4968_v3 = vpop.eup %4967  ;;  %v2393_v38 = vmul.f32 %v4966_v60, %v2383_v53 }
 0x2e0   : > { %v2394_v52 = vmul.f32 %v4968_v3, %v2384_v13  ;;  %v4970_v29 = vpop.eup %4969 }
 0x2e1   : > { %v5969_v24 = vadd.f32 %v2393_v38, %v2391_v37  ;;  %v4972_v10 = vpop.eup %4971  ;;  %v2381_v43 = vmul.f32 0.5, %v4970_v29 }
 0x2e2   : > { %v5971_v4 = vadd.f32 %v2394_v52, %v2392_v0  ;;  %v2382_v23 = vmul.f32 0.5, %v4972_v10 }
 0x2e3   : > { %4973 = vtanh.f32 %v5969_v24  ;;  %v2387_v26 = vadd.f32 0.5, %v2381_v43 }
 0x2e4   : > { %4975 = vtanh.f32 %v5971_v4  ;;  %v2388_v59 = vadd.f32 0.5, %v2382_v23 }
 0x2e9   : > { %2403 = sbr.rel (%p4843_p8) target bundleno = 754 (0x2f2), region = 64 }
 0x2ed   : > { %v4974_v1 = vpop.eup %4973 }
 0x2ee   : > { %v4976_v8 = vpop.eup %4975  ;;  %v5975_v12 = vmul.f32 %v4974_v1, %v2387_v26 }
 0x2ef   : > { %v2400_v19 = vmul.f32 %v4976_v8, %v2388_v59 }
 0x2f0   : > { %2404 = vst [vmem:[#allocation2] sm:$0x3] %v5975_v12 }
 0x2f1   : > { %2405 = vst [vmem:[#allocation2 + $0x8] sm:$0x3] %v2400_v19 }
 0x2f2 PF: > { %2457 = vmatprep.subr.bf16.mxu1 %v5452_v14  ;;  %2416 = vmatprep.subr.bf16.mxu0 %v5463_v21  ;;  %v5983_v57 = vpack.c.bf16 %v2400_v19, %v2400_v19  ;;  %v7358_v9 = vld [vmem:[#allocation12_spill] sm:$0xff]  ;;  %v7359_v44 = vld [vmem:[#allocation13_spill] sm:$0xff]  ;;  %v7360_v53 = vld [vmem:[#allocation15_spill] sm:$0xff] }
 0x2f3   : > { %2458 = vmatpush1.bf16.msra.mxu1 %v5454_v15  ;;  %2417 = vmatpush1.bf16.msra.mxu0 %v5465_v22  ;;  %v7361_v60 = vld [vmem:[#allocation14_spill] sm:$0xff]  ;;  %v7362_v13 = vld [vmem:[#allocation16_spill] sm:$0xff]  ;;  %v7363_v3 = vld [vmem:[#allocation17_spill] sm:$0xff] }
 0x2f4   : > { %2459 = vmatprep.subr.bf16.mxu1 %v5461_v20  ;;  %2418 = vmatprep.subr.bf16.mxu0 %v5476_v28  ;;  %v7364_v37 = vld [vmem:[#allocation19_spill] sm:$0xff]  ;;  %v7365_v38 = vld [vmem:[#allocation18_spill] sm:$0xff]  ;;  %v7366_v0 = vld [vmem:[#allocation20_spill] sm:$0xff] }
 0x2f5   : > { %2489 = vmatprep.mubr.bf16.mxu1 %v5983_v57  ;;  %2448 = vmatprep.mubr.bf16.mxu0 %v5983_v57  ;;  %v7367_v52 = vld [vmem:[#allocation21_spill] sm:$0xff]  ;;  %v7368_v29 = vld [vmem:[#allocation23_spill] sm:$0xff]  ;;  %v7369_v10 = vld [vmem:[#allocation22_spill] sm:$0xff] }
 0x2f6   : > { %v7370_v43 = vld [vmem:[#allocation24_spill] sm:$0xff]  ;;  %v7371_v23 = vld [vmem:[#allocation25_spill] sm:$0xff]  ;;  %v7372_v26 = vld [vmem:[#allocation27_spill] sm:$0xff] }
 0x2f7   : > { %2460 = vmatpush1.bf16.msra.mxu1 %v5473_v27  ;;  %2419 = vmatpush1.bf16.msra.mxu0 %v5484_v33  ;;  %v7373_v59 = vld [vmem:[#allocation26_spill] sm:$0xff]  ;;  %v7374_v1 = vld [vmem:[#allocation28_spill] sm:$0xff]  ;;  %v7375_v8 = vld [vmem:[#allocation29_spill] sm:$0xff] }
 0x2f8   : > { %2461 = vmatprep.subr.bf16.mxu1 %v5482_v32  ;;  %2420 = vmatprep.subr.bf16.mxu0 %v5489_v36  ;;  %v7376_v19 = vld [vmem:[#allocation31_spill] sm:$0xff] }
 0x2fb   : > { %2462 = vmatpush1.bf16.msra.mxu1 %v5494_v39  ;;  %2421 = vmatpush1.bf16.msra.mxu0 %v5500_v41 }
 0x2fc   : > { %2463 = vmatprep.subr.bf16.mxu1 %v5498_v40  ;;  %2422 = vmatprep.subr.bf16.mxu0 %v5505_v30 }
 0x2ff   : > { %2464 = vmatpush1.bf16.msra.mxu1 %v5510_v46  ;;  %2423 = vmatpush1.bf16.msra.mxu0 %v5516_v48 }
 0x300   : > { %2465 = vmatprep.subr.bf16.mxu1 %v5514_v47  ;;  %2424 = vmatprep.subr.bf16.mxu0 %v5521_v51 }
 0x303   : > { %2466 = vmatpush1.bf16.msra.mxu1 %v5526_v54  ;;  %2425 = vmatpush1.bf16.msra.mxu0 %v5532_v56 }
 0x304   : > { %2467 = vmatprep.subr.bf16.mxu1 %v5530_v55  ;;  %2426 = vmatprep.subr.bf16.mxu0 %v5537_v58 }
 0x307   : > { %2468 = vmatpush1.bf16.msra.mxu1 %v5542_v61  ;;  %2427 = vmatpush1.bf16.msra.mxu0 %v5548_v63 }
 0x308   : > { %2469 = vmatprep.subr.bf16.mxu1 %v5546_v62  ;;  %2428 = vmatprep.subr.bf16.mxu0 %v5553_v2 }
 0x30b   : > { %2470 = vmatpush1.bf16.msra.mxu1 %v5558_v5  ;;  %2429 = vmatpush1.bf16.msra.mxu0 %v5564_v7 }
 0x30c   : > { %2471 = vmatprep.subr.bf16.mxu1 %v5562_v6  ;;  %2430 = vmatprep.subr.bf16.mxu0 %v5569_v11 }
 0x30f   : > { %2472 = vmatpush1.bf16.msra.mxu1 %v5574_v16  ;;  %2431 = vmatpush1.bf16.msra.mxu0 %v5580_v18 }
 0x310   : > { %2473 = vmatprep.subr.bf16.mxu1 %v5578_v17  ;;  %2432 = vmatprep.subr.bf16.mxu0 %v5585_v25 }
 0x313   : > { %2474 = vmatpush1.bf16.msra.mxu1 %v5590_v31  ;;  %2433 = vmatpush1.bf16.msra.mxu0 %v5596_v35 }
 0x314   : > { %2475 = vmatprep.subr.bf16.mxu1 %v5594_v34  ;;  %2434 = vmatprep.subr.bf16.mxu0 %v5601_v42 }
 0x317   : > { %2476 = vmatpush1.bf16.msra.mxu1 %v5606_v45  ;;  %2435 = vmatpush1.bf16.msra.mxu0 %v5612_v50 }
 0x318   : > { %2477 = vmatprep.subr.bf16.mxu1 %v5610_v49  ;;  %2436 = vmatprep.subr.bf16.mxu0 %v7358_v9  ;;  %v7377_v9 = vld [vmem:[#allocation30_spill] sm:$0xff] }
 0x31b   : > { %2478 = vmatpush1.bf16.msra.mxu1 %v7359_v44  ;;  %2437 = vmatpush1.bf16.msra.mxu0 %v7360_v53  ;;  %v7378_v44 = vld [vmem:[#allocation32_spill] sm:$0xff]  ;;  %v6049_v53 = vpack.c.bf16 %v5975_v12, %v5975_v12 }
 0x31c   : > { %2479 = vmatprep.subr.bf16.mxu1 %v7361_v60  ;;  %2438 = vmatprep.subr.bf16.mxu0 %v7362_v13  ;;  %v7379_v60 = vld [vmem:[#allocation33_spill] sm:$0xff]  ;;  %v7380_v13 = vld [vmem:[#allocation35_spill] sm:$0xff]  ;;  %v7386_v12 = vld [vmem:[#allocation40_spill] sm:$0xff] }
 0x31f   : > { %2480 = vmatpush1.bf16.msra.mxu1 %v7363_v3  ;;  %2439 = vmatpush1.bf16.msra.mxu0 %v7364_v37  ;;  %v7381_v3 = vld [vmem:[#allocation34_spill] sm:$0xff]  ;;  %v7382_v37 = vld [vmem:[#allocation36_spill] sm:$0xff] }
 0x320   : > { %2481 = vmatprep.subr.bf16.mxu1 %v7365_v38  ;;  %2440 = vmatprep.subr.bf16.mxu0 %v7366_v0  ;;  %v7383_v38 = vld [vmem:[#allocation37_spill] sm:$0xff]  ;;  %v7384_v0 = vld [vmem:[#allocation39_spill] sm:$0xff] }
 0x323   : > { %2482 = vmatpush1.bf16.msra.mxu1 %v7367_v52  ;;  %2441 = vmatpush1.bf16.msra.mxu0 %v7368_v29  ;;  %v7385_v52 = vld [vmem:[#allocation38_spill] sm:$0xff]  ;;  %v7387_v29 = vld [vmem:[#allocation41_spill] sm:$0xff] }
 0x324   : > { %2483 = vmatprep.subr.bf16.mxu1 %v7369_v10  ;;  %2442 = vmatprep.subr.bf16.mxu0 %v7370_v43  ;;  %v7388_v10 = vld [vmem:[#allocation43_spill] sm:$0xff]  ;;  %v7389_v43 = vld [vmem:[#allocation42_spill] sm:$0xff] }
 0x327   : > { %2484 = vmatpush1.bf16.msra.mxu1 %v7371_v23  ;;  %2443 = vmatpush1.bf16.msra.mxu0 %v7372_v26  ;;  %v7390_v23 = vld [vmem:[#allocation44_spill] sm:$0xff]  ;;  %v7391_v26 = vld [vmem:[#allocation45_spill] sm:$0xff] }
 0x328   : > { %2485 = vmatprep.subr.bf16.mxu1 %v7373_v59  ;;  %2444 = vmatprep.subr.bf16.mxu0 %v7374_v1  ;;  %v7392_v59 = vld [vmem:[#allocation47_spill] sm:$0xff]  ;;  %v7393_v1 = vld [vmem:[#allocation46_spill] sm:$0xff] }
 0x32b   : > { %2486 = vmatpush1.bf16.msra.mxu1 %v7375_v8  ;;  %2445 = vmatpush1.bf16.msra.mxu0 %v7376_v19  ;;  %v7394_v8 = vld [vmem:[#allocation48_spill] sm:$0xff]  ;;  %v7395_v19 = vld [vmem:[#allocation49_spill] sm:$0xff] }
 0x32c   : > { %2487 = vmatprep.subr.bf16.mxu1 %v7377_v9  ;;  %2446 = vmatprep.subr.bf16.mxu0 %v7378_v44  ;;  %v7396_v9 = vld [vmem:[#allocation51_spill] sm:$0xff]  ;;  %v7398_v44 = vld [vmem:[#allocation52_spill] sm:$0xff] }
 0x32f   : > { %2488 = vmatpush1.bf16.msra.mxu1 %v7379_v60  ;;  %2447 = vmatpush1.bf16.msra.mxu0 %v7380_v13  ;;  %v7399_v60 = vld [vmem:[#allocation53_spill] sm:$0xff]  ;;  %v7400_v13 = vld [vmem:[#allocation55_spill] sm:$0xff] }
 0x330   : > { %2539 = vmatprep.subr.bf16.mxu1 %v7381_v3  ;;  %2498 = vmatprep.subr.bf16.mxu0 %v7382_v37  ;;  %v7401_v3 = vld [vmem:[#allocation54_spill] sm:$0xff]  ;;  %v7402_v37 = vld [vmem:[#allocation56_spill] sm:$0xff] }
 0x332   : > { %2490 = vmatmul.mubr.bf16.vlgmr.msra.gmra.mrb[8].mxu1 %v6049_v53  ;;  %2449 = vmatmul.mubr.bf16.vlgmr.msra.gmra.mrb[8].mxu0 %v6049_v53 }
 0x333   : > { %2540 = vmatpush1.bf16.msra.mxu1 %v7383_v38  ;;  %2499 = vmatpush1.bf16.msra.mxu0 %v7384_v0  ;;  %v7403_v38 = vld [vmem:[#allocation57_spill] sm:$0xff]  ;;  %v7404_v0 = vld [vmem:[#allocation59_spill] sm:$0xff] }
 0x334   : > { %2541 = vmatprep.subr.bf16.mxu1 %v7385_v52  ;;  %2500 = vmatprep.subr.bf16.mxu0 %v7386_v12  ;;  %v7405_v52 = vld [vmem:[#allocation58_spill] sm:$0xff]  ;;  %v7406_v12 = vld [vmem:[#allocation60_spill] sm:$0xff] }
 0x335   : > { %2571 = vmatprep.mubr.bf16.mxu1 %v5983_v57  ;;  %2530 = vmatprep.mubr.bf16.mxu0 %v5983_v57  ;;  %v7397_v57 = vld [vmem:[#allocation50_spill] sm:$0xff] }
 0x337   : > { %2542 = vmatpush1.bf16.msra.mxu1 %v7387_v29  ;;  %2501 = vmatpush1.bf16.msra.mxu0 %v7388_v10  ;;  %v7407_v29 = vld [vmem:[#allocation61_spill] sm:$0xff]  ;;  %v7408_v10 = vld [vmem:[#allocation63_spill] sm:$0xff] }
 0x338   : > { %2543 = vmatprep.subr.bf16.mxu1 %v7389_v43  ;;  %2502 = vmatprep.subr.bf16.mxu0 %v7390_v23  ;;  %v7409_v43 = vld [vmem:[#allocation62_spill] sm:$0xff]  ;;  %v7410_v23 = vld [vmem:[#allocation64_spill] sm:$0xff] }
 0x33b   : > { %2544 = vmatpush1.bf16.msra.mxu1 %v7391_v26  ;;  %2503 = vmatpush1.bf16.msra.mxu0 %v7392_v59  ;;  %v7411_v26 = vld [vmem:[#allocation65_spill] sm:$0xff]  ;;  %v7412_v59 = vld [vmem:[#allocation67_spill] sm:$0xff] }
 0x33c   : > { %2545 = vmatprep.subr.bf16.mxu1 %v7393_v1  ;;  %2504 = vmatprep.subr.bf16.mxu0 %v7394_v8  ;;  %v7413_v1 = vld [vmem:[#allocation66_spill] sm:$0xff]  ;;  %v7414_v8 = vld [vmem:[#allocation68_spill] sm:$0xff] }
 0x33f   : > { %2546 = vmatpush1.bf16.msra.mxu1 %v7395_v19  ;;  %2505 = vmatpush1.bf16.msra.mxu0 %v7396_v9  ;;  %v7415_v19 = vld [vmem:[#allocation69_spill] sm:$0xff]  ;;  %v7416_v9 = vld [vmem:[#allocation71_spill] sm:$0xff] }
 0x340   : > { %2547 = vmatprep.subr.bf16.mxu1 %v7397_v57  ;;  %2506 = vmatprep.subr.bf16.mxu0 %v7398_v44  ;;  %v7417_v57 = vld [vmem:[#allocation70_spill] sm:$0xff]  ;;  %v7418_v44 = vld [vmem:[#allocation72_spill] sm:$0xff] }
 0x343   : > { %2548 = vmatpush1.bf16.msra.mxu1 %v7399_v60  ;;  %2507 = vmatpush1.bf16.msra.mxu0 %v7400_v13  ;;  %v7419_v60 = vld [vmem:[#allocation73_spill] sm:$0xff]  ;;  %v7420_v13 = vld [vmem:[#allocation75_spill] sm:$0xff] }
 0x344   : > { %2549 = vmatprep.subr.bf16.mxu1 %v7401_v3  ;;  %2508 = vmatprep.subr.bf16.mxu0 %v7402_v37  ;;  %v7421_v3 = vld [vmem:[#allocation74_spill] sm:$0xff]  ;;  %v7422_v37 = vld [vmem:[#allocation76_spill] sm:$0xff] }
 0x347   : > { %2550 = vmatpush1.bf16.msra.mxu1 %v7403_v38  ;;  %2509 = vmatpush1.bf16.msra.mxu0 %v7404_v0  ;;  %v7423_v38 = vld [vmem:[#allocation77_spill] sm:$0xff]  ;;  %v7424_v0 = vld [vmem:[#allocation79_spill] sm:$0xff] }
 0x348   : > { %2551 = vmatprep.subr.bf16.mxu1 %v7405_v52  ;;  %2510 = vmatprep.subr.bf16.mxu0 %v7406_v12  ;;  %v7425_v52 = vld [vmem:[#allocation78_spill] sm:$0xff]  ;;  %v7426_v12 = vld [vmem:[#allocation80_spill] sm:$0xff] }
 0x34b   : > { %2552 = vmatpush1.bf16.msra.mxu1 %v7407_v29  ;;  %2511 = vmatpush1.bf16.msra.mxu0 %v7408_v10  ;;  %v7427_v29 = vld [vmem:[#allocation81_spill] sm:$0xff]  ;;  %v7428_v10 = vld [vmem:[#allocation83_spill] sm:$0xff] }
 0x34c   : > { %2553 = vmatprep.subr.bf16.mxu1 %v7409_v43  ;;  %2512 = vmatprep.subr.bf16.mxu0 %v7410_v23  ;;  %v7429_v43 = vld [vmem:[#allocation82_spill] sm:$0xff]  ;;  %v7430_v23 = vld [vmem:[#allocation84_spill] sm:$0xff] }
 0x34f   : > { %2554 = vmatpush1.bf16.msra.mxu1 %v7411_v26  ;;  %2513 = vmatpush1.bf16.msra.mxu0 %v7412_v59  ;;  %v7431_v26 = vld [vmem:[#allocation85_spill] sm:$0xff]  ;;  %v7432_v59 = vld [vmem:[#allocation87_spill] sm:$0xff] }
 0x350   : > { %2555 = vmatprep.subr.bf16.mxu1 %v7413_v1  ;;  %2514 = vmatprep.subr.bf16.mxu0 %v7414_v8  ;;  %v7433_v1 = vld [vmem:[#allocation86_spill] sm:$0xff]  ;;  %v7434_v8 = vld [vmem:[#allocation88_spill] sm:$0xff] }
 0x353   : > { %2556 = vmatpush1.bf16.msra.mxu1 %v7415_v19  ;;  %2515 = vmatpush1.bf16.msra.mxu0 %v7416_v9  ;;  %v7435_v19 = vld [vmem:[#allocation89_spill] sm:$0xff]  ;;  %v7436_v9 = vld [vmem:[#allocation91_spill] sm:$0xff] }
 0x354   : > { %2557 = vmatprep.subr.bf16.mxu1 %v7417_v57  ;;  %2516 = vmatprep.subr.bf16.mxu0 %v7418_v44  ;;  %v7437_v57 = vld [vmem:[#allocation90_spill] sm:$0xff]  ;;  %v7438_v44 = vld [vmem:[#allocation92_spill] sm:$0xff] }
 0x357   : > { %2558 = vmatpush1.bf16.msra.mxu1 %v7419_v60  ;;  %2517 = vmatpush1.bf16.msra.mxu0 %v7420_v13  ;;  %v7439_v60 = vld [vmem:[#allocation93_spill] sm:$0xff]  ;;  %v7440_v13 = vld [vmem:[#allocation95_spill] sm:$0xff] }
 0x358   : > { %2559 = vmatprep.subr.bf16.mxu1 %v7421_v3  ;;  %2518 = vmatprep.subr.bf16.mxu0 %v7422_v37  ;;  %v7441_v3 = vld [vmem:[#allocation94_spill] sm:$0xff]  ;;  %v7442_v37 = vld [vmem:[#allocation96_spill] sm:$0xff] }
 0x35b   : > { %2560 = vmatpush1.bf16.msra.mxu1 %v7423_v38  ;;  %2519 = vmatpush1.bf16.msra.mxu0 %v7424_v0  ;;  %v7443_v38 = vld [vmem:[#allocation97_spill] sm:$0xff]  ;;  %v7444_v0 = vld [vmem:[#allocation98_spill] sm:$0xff] }
 0x35c   : > { %2561 = vmatprep.subr.bf16.mxu1 %v7425_v52  ;;  %2520 = vmatprep.subr.bf16.mxu0 %v7426_v12 }
 0x35f   : > { %2562 = vmatpush1.bf16.msra.mxu1 %v7427_v29  ;;  %2521 = vmatpush1.bf16.msra.mxu0 %v7428_v10 }
 0x360   : > { %2563 = vmatprep.subr.bf16.mxu1 %v7429_v43  ;;  %2522 = vmatprep.subr.bf16.mxu0 %v7430_v23 }
 0x363   : > { %2564 = vmatpush1.bf16.msra.mxu1 %v7431_v26  ;;  %2523 = vmatpush1.bf16.msra.mxu0 %v7432_v59 }
 0x364   : > { %2565 = vmatprep.subr.bf16.mxu1 %v7433_v1  ;;  %2524 = vmatprep.subr.bf16.mxu0 %v7434_v8  ;;  %v2408_v8 = vld [vmem:[#allocation3 + $0x10] sm:$0xc] }
 0x367   : > { %2566 = vmatpush1.bf16.msra.mxu1 %v7435_v19  ;;  %2525 = vmatpush1.bf16.msra.mxu0 %v7436_v9  ;;  %v2409_v9 = vld [vmem:[#allocation3 + $0x18] sm:$0xc] }
 0x368   : > { %2567 = vmatprep.subr.bf16.mxu1 %v7437_v57  ;;  %2526 = vmatprep.subr.bf16.mxu0 %v7438_v44  ;;  %v2406_v44 = vld [vmem:[#allocation3] sm:$0xc] }
 0x36b   : > { %2568 = vmatpush1.bf16.msra.mxu1 %v7439_v60  ;;  %2527 = vmatpush1.bf16.msra.mxu0 %v7440_v13 }
 0x36c   : > { %2569 = vmatprep.subr.bf16.mxu1 %v7441_v3  ;;  %2528 = vmatprep.subr.bf16.mxu0 %v7442_v37  ;;  %v2407_v3 = vld [vmem:[#allocation3 + $0x8] sm:$0xc] }
 0x36f   : > { %2570 = vmatpush1.bf16.msra.mxu1 %v7443_v38  ;;  %2529 = vmatpush1.bf16.msra.mxu0 %v7444_v0 }
 0x372   : > { %2572 = vmatmul.mubr.bf16.vlgmr.msra.gmra.mrb[12].mxu1 %v6049_v53  ;;  %2531 = vmatmul.mubr.bf16.vlgmr.msra.gmra.mrb[12].mxu0 %v6049_v53 }
 0x405   : > { %v2491_v52 = vpop.f32.mrb[8].mxu1  ;;  %v2450_v12 = vpop.f32.mrb[8].mxu0 }
 0x406   : > { %v2493_v29 = vpop.f32.mrb[9].mxu1  ;;  %v2452_v10 = vpop.f32.mrb[9].mxu0  ;;  %v2590_v1 = vrot.slane %v2491_v52, 6  ;;  %v2588_v57 = vrot.slane %v2450_v12, 6  ;;  %v2412_v52 = vld [vmem:[#allocation3 + $0x30] sm:$0xc] }
 0x407   : > { %v2495_v43 = vpop.f32.mrb[10].mxu1  ;;  %v2454_v23 = vpop.f32.mrb[10].mxu0  ;;  %v2591_v19 = vrot.slane %v2493_v29, 6  ;;  %v2589_v60 = vrot.slane %v2452_v10, 6  ;;  %v2413_v29 = vld [vmem:[#allocation3 + $0x38] sm:$0xc] }
 0x408   : > { %v2496_v26 = vpop.f32.mrb[11].mxu1  ;;  %v2455_v59 = vpop.f32.mrb[11].mxu0  ;;  %v2606_v13 = vadd.f32 %v2590_v1, %v2408_v8  ;;  %v2604_v38 = vadd.f32 %v2588_v57, %v2406_v44  ;;  %v2410_v23 = vld [vmem:[#allocation3 + $0x20] sm:$0xc]  ;;  %v2411_v1 = vld [vmem:[#allocation3 + $0x28] sm:$0xc] }
 0x409   : > { %v2607_v37 = vadd.f32 %v2591_v19, %v2409_v9  ;;  %v2605_v53 = vadd.f32 %v2589_v60, %v2407_v3 }
 0x40a   : > { %v2614_v0 = vmul.f32 0.5, %v2606_v13  ;;  %v2612_v50 = vmul.f32 0.5, %v2604_v38 }
 0x40b   : > { %v2615_v49 = vmul.f32 0.5, %v2607_v37  ;;  %v2613_v45 = vmul.f32 0.5, %v2605_v53 }
 0x40c   : > { %4977 = vtanh.f32 %v2614_v0 }
 0x40d   : > { %4979 = vtanh.f32 %v2615_v49 }
 0x40e   : > { %4981 = vtanh.f32 %v2612_v50 }
 0x40f   : > { %4983 = vtanh.f32 %v2613_v45 }
 0x416   : > { %v4978_v37 = vpop.eup %4977 }
 0x417   : > { %v4980_v38 = vpop.eup %4979  ;;  %v2626_v42 = vmul.f32 0.5, %v4978_v37 }
 0x418   : > { %v4982_v0 = vpop.eup %4981  ;;  %v2627_v34 = vmul.f32 0.5, %v4980_v38 }
 0x445   : > { %v2573_v43 = vpop.f32.mrb[12].mxu1  ;;  %v2532_v12 = vpop.f32.mrb[12].mxu0 }
 0x446   : > { %v2594_v26 = vrot.slane %v2573_v43, 6  ;;  %v2575_v10 = vpop.f32.mrb[13].mxu1  ;;  %v2592_v59 = vrot.slane %v2532_v12, 6  ;;  %v2534_v8 = vpop.f32.mrb[13].mxu0 }
 0x447   : > { %v2595_v19 = vrot.slane %v2575_v10, 6  ;;  %v2577_v9 = vpop.f32.mrb[14].mxu1  ;;  %v2593_v57 = vrot.slane %v2534_v8, 6  ;;  %v2536_v44 = vpop.f32.mrb[14].mxu0  ;;  %v2624_v10 = vmul.f32 0.5, %v4982_v0 }
 0x448   : > { %v2610_v60 = vadd.f32 %v2594_v26, %v2412_v52  ;;  %v2578_v13 = vpop.f32.mrb[15].mxu1  ;;  %v2608_v3 = vadd.f32 %v2592_v59, %v2410_v23  ;;  %v2537_v49 = vpop.f32.mrb[15].mxu0  ;;  %v2632_v52 = vadd.f32 0.5, %v2626_v42  ;;  %v2640_v23 = vrot.slane %v5969_v24, 6 }
 0x449   : > { %v2611_v50 = vadd.f32 %v2595_v19, %v2413_v29  ;;  %v2609_v45 = vadd.f32 %v2593_v57, %v2411_v1  ;;  %v4984_v12 = vpop.eup %4983  ;;  %v2633_v26 = vadd.f32 0.5, %v2627_v34  ;;  %v2641_v29 = vrot.slane %v5971_v4, 6 }
 0x44a   : > { %4985 = vtanh.f32 %v2610_v60  ;;  %v2616_v53 = vmul.f32 0.5, %v2608_v3  ;;  %v2625_v8 = vmul.f32 0.5, %v4984_v12  ;;  %v2630_v59 = vadd.f32 0.5, %v2624_v10 }
 0x44b   : > { %4987 = vtanh.f32 %v2611_v50  ;;  %v2617_v43 = vmul.f32 0.5, %v2609_v45  ;;  %v2644_v57 = vmul.f32 %v2640_v23, %v2632_v52  ;;  %v2645_v60 = vmul.f32 %v2641_v29, %v2633_v26 }
 0x44c   : > { %4989 = vtanh.f32 %v2616_v53  ;;  %v2631_v19 = vadd.f32 0.5, %v2625_v8 }
 0x44d   : > { %4991 = vtanh.f32 %v2617_v43 }
 0x454   : > { %v4986_v1 = vpop.eup %4985 }
 0x455   : > { %v4988_v9 = vpop.eup %4987  ;;  %v2646_v44 = vmul.f32 %v4986_v1, %v2630_v59 }
 0x456   : > { %v2647_v13 = vmul.f32 %v4988_v9, %v2631_v19  ;;  %v4990_v50 = vpop.eup %4989 }
 0x457   : > { %v6125_v3 = vadd.f32 %v2646_v44, %v2644_v57  ;;  %v4992_v42 = vpop.eup %4991  ;;  %v2628_v34 = vmul.f32 0.5, %v4990_v50 }
 0x458   : > { %v6127_v49 = vadd.f32 %v2647_v13, %v2645_v60  ;;  %v2629_v24 = vmul.f32 0.5, %v4992_v42 }
 0x459   : > { %4993 = vtanh.f32 %v6125_v3  ;;  %v2634_v4 = vadd.f32 0.5, %v2628_v34 }
 0x45a   : > { %4995 = vtanh.f32 %v6127_v49  ;;  %v2635_v45 = vadd.f32 0.5, %v2629_v24 }
 0x45f   : > { %2656 = sbr.rel (%p4843_p8) target bundleno = 1128 (0x468), region = 68 }
 0x463   : > { %v4994_v37 = vpop.eup %4993 }
 0x464   : > { %v4996_v38 = vpop.eup %4995  ;;  %v6131_v53 = vmul.f32 %v4994_v37, %v2634_v4 }
 0x465   : > { %v2653_v0 = vmul.f32 %v4996_v38, %v2635_v45 }
 0x466   : > { %2657 = vst [vmem:[#allocation2] sm:$0xc] %v6131_v53 }
 0x467   : > { %2658 = vst [vmem:[#allocation2 + $0x8] sm:$0xc] %v2653_v0 }
 0x468 PF: > { %2716 = vmatprep.subr.bf16.mxu1 %v5452_v14  ;;  %2675 = vmatprep.subr.bf16.mxu0 %v5463_v21  ;;  %v2668_v43 = vpack.c.bf16 %v2653_v0, %v2653_v0  ;;  %v7445_v10 = vld [vmem:[#allocation7_spill] sm:$0xff]  ;;  %v7446_v8 = vld [vmem:[#allocation8_spill] sm:$0xff]  ;;  %v7447_v52 = vld [vmem:[#allocation9_spill] sm:$0xff]  ;;  %v2667_v0 = vpack.c.bf16 %v6131_v53, %v6131_v53 }
 0x469   : > { %2717 = vmatpush1.bf16.msra.mxu1 %v5454_v15  ;;  %2676 = vmatpush1.bf16.msra.mxu0 %v5465_v22  ;;  %v7448_v23 = vld [vmem:[#allocation11_spill] sm:$0xff]  ;;  %v7449_v26 = vld [vmem:[#allocation10_spill] sm:$0xff]  ;;  %v7450_v29 = vld [vmem:[#allocation12_spill] sm:$0xff] }
 0x46a   : > { %2718 = vmatprep.subr.bf16.mxu1 %v5461_v20  ;;  %2677 = vmatprep.subr.bf16.mxu0 %v5476_v28  ;;  %v6142_v12 = vrot.slane %v2668_v43, 1  ;;  %v7451_v59 = vld [vmem:[#allocation13_spill] sm:$0xff]  ;;  %v7452_v1 = vld [vmem:[#allocation15_spill] sm:$0xff]  ;;  %v7453_v19 = vld [vmem:[#allocation14_spill] sm:$0xff] }
 0x46b   : > { %v7454_v9 = vld [vmem:[#allocation16_spill] sm:$0xff]  ;;  %v7455_v57 = vld [vmem:[#allocation17_spill] sm:$0xff]  ;;  %v7456_v44 = vld [vmem:[#allocation19_spill] sm:$0xff] }
 0x46c   : > { %2748 = vmatprep.mubr.bf16.mxu1 %v6142_v12  ;;  %2707 = vmatprep.mubr.bf16.mxu0 %v6142_v12  ;;  %v7457_v60 = vld [vmem:[#allocation18_spill] sm:$0xff]  ;;  %v7458_v13 = vld [vmem:[#allocation20_spill] sm:$0xff]  ;;  %v7459_v50 = vld [vmem:[#allocation21_spill] sm:$0xff] }
 0x46d   : > { %2719 = vmatpush1.bf16.msra.mxu1 %v5473_v27  ;;  %2678 = vmatpush1.bf16.msra.mxu0 %v5484_v33  ;;  %v7460_v42 = vld [vmem:[#allocation23_spill] sm:$0xff]  ;;  %v7461_v34 = vld [vmem:[#allocation22_spill] sm:$0xff]  ;;  %v7462_v24 = vld [vmem:[#allocation24_spill] sm:$0xff] }
 0x46e   : > { %2720 = vmatprep.subr.bf16.mxu1 %v5482_v32  ;;  %2679 = vmatprep.subr.bf16.mxu0 %v5489_v36  ;;  %v7463_v4 = vld [vmem:[#allocation25_spill] sm:$0xff]  ;;  %v7464_v45 = vld [vmem:[#allocation27_spill] sm:$0xff]  ;;  %v7465_v37 = vld [vmem:[#allocation26_spill] sm:$0xff] }
 0x46f   : > { %v7466_v38 = vld [vmem:[#allocation28_spill] sm:$0xff]  ;;  %v7467_v43 = vld [vmem:[#allocation29_spill] sm:$0xff] }
 0x470   : > { %v7475_v53 = vld [vmem:[#allocation37_spill] sm:$0xff] }
 0x471   : > { %2721 = vmatpush1.bf16.msra.mxu1 %v5494_v39  ;;  %2680 = vmatpush1.bf16.msra.mxu0 %v5500_v41 }
 0x472   : > { %2722 = vmatprep.subr.bf16.mxu1 %v5498_v40  ;;  %2681 = vmatprep.subr.bf16.mxu0 %v5505_v30 }
 0x475   : > { %2723 = vmatpush1.bf16.msra.mxu1 %v5510_v46  ;;  %2682 = vmatpush1.bf16.msra.mxu0 %v5516_v48 }
 0x476   : > { %2724 = vmatprep.subr.bf16.mxu1 %v5514_v47  ;;  %2683 = vmatprep.subr.bf16.mxu0 %v5521_v51 }
 0x479   : > { %2725 = vmatpush1.bf16.msra.mxu1 %v5526_v54  ;;  %2684 = vmatpush1.bf16.msra.mxu0 %v5532_v56 }
 0x47a   : > { %2726 = vmatprep.subr.bf16.mxu1 %v5530_v55  ;;  %2685 = vmatprep.subr.bf16.mxu0 %v5537_v58 }
 0x47d   : > { %2727 = vmatpush1.bf16.msra.mxu1 %v5542_v61  ;;  %2686 = vmatpush1.bf16.msra.mxu0 %v5548_v63 }
 0x47e   : > { %2728 = vmatprep.subr.bf16.mxu1 %v5546_v62  ;;  %2687 = vmatprep.subr.bf16.mxu0 %v5553_v2 }
 0x481   : > { %2729 = vmatpush1.bf16.msra.mxu1 %v5558_v5  ;;  %2688 = vmatpush1.bf16.msra.mxu0 %v5564_v7 }
 0x482   : > { %2730 = vmatprep.subr.bf16.mxu1 %v5562_v6  ;;  %2689 = vmatprep.subr.bf16.mxu0 %v5569_v11 }
 0x485   : > { %2731 = vmatpush1.bf16.msra.mxu1 %v5574_v16  ;;  %2690 = vmatpush1.bf16.msra.mxu0 %v5580_v18 }
 0x486   : > { %2732 = vmatprep.subr.bf16.mxu1 %v5578_v17  ;;  %2691 = vmatprep.subr.bf16.mxu0 %v5585_v25 }
 0x489   : > { %2733 = vmatpush1.bf16.msra.mxu1 %v5590_v31  ;;  %2692 = vmatpush1.bf16.msra.mxu0 %v5596_v35 }
 0x48a   : > { %2734 = vmatprep.subr.bf16.mxu1 %v7445_v10  ;;  %2693 = vmatprep.subr.bf16.mxu0 %v7446_v8  ;;  %v7468_v10 = vld [vmem:[#allocation31_spill] sm:$0xff]  ;;  %v7469_v8 = vld [vmem:[#allocation30_spill] sm:$0xff] }
 0x48d   : > { %2735 = vmatpush1.bf16.msra.mxu1 %v7447_v52  ;;  %2694 = vmatpush1.bf16.msra.mxu0 %v7448_v23  ;;  %v7470_v52 = vld [vmem:[#allocation32_spill] sm:$0xff]  ;;  %v6204_v23 = vrot.slane %v2667_v0, 1  ;;  %v7491_v0 = vld [vmem:[#allocation53_spill] sm:$0xff] }
 0x48e   : > { %2736 = vmatprep.subr.bf16.mxu1 %v7449_v26  ;;  %2695 = vmatprep.subr.bf16.mxu0 %v7450_v29  ;;  %v7471_v26 = vld [vmem:[#allocation33_spill] sm:$0xff]  ;;  %v7472_v29 = vld [vmem:[#allocation35_spill] sm:$0xff] }
 0x491   : > { %2737 = vmatpush1.bf16.msra.mxu1 %v7451_v59  ;;  %2696 = vmatpush1.bf16.msra.mxu0 %v7452_v1  ;;  %v7473_v59 = vld [vmem:[#allocation34_spill] sm:$0xff]  ;;  %v7474_v1 = vld [vmem:[#allocation36_spill] sm:$0xff] }
 0x492   : > { %2738 = vmatprep.subr.bf16.mxu1 %v7453_v19  ;;  %2697 = vmatprep.subr.bf16.mxu0 %v7454_v9  ;;  %v7476_v19 = vld [vmem:[#allocation39_spill] sm:$0xff]  ;;  %v7477_v9 = vld [vmem:[#allocation38_spill] sm:$0xff] }
 0x495   : > { %2739 = vmatpush1.bf16.msra.mxu1 %v7455_v57  ;;  %2698 = vmatpush1.bf16.msra.mxu0 %v7456_v44  ;;  %v7478_v57 = vld [vmem:[#allocation40_spill] sm:$0xff]  ;;  %v7479_v44 = vld [vmem:[#allocation41_spill] sm:$0xff] }
 0x496   : > { %2740 = vmatprep.subr.bf16.mxu1 %v7457_v60  ;;  %2699 = vmatprep.subr.bf16.mxu0 %v7458_v13  ;;  %v7480_v60 = vld [vmem:[#allocation43_spill] sm:$0xff]  ;;  %v7481_v13 = vld [vmem:[#allocation42_spill] sm:$0xff] }
 0x499   : > { %2741 = vmatpush1.bf16.msra.mxu1 %v7459_v50  ;;  %2700 = vmatpush1.bf16.msra.mxu0 %v7460_v42  ;;  %v7482_v50 = vld [vmem:[#allocation44_spill] sm:$0xff]  ;;  %v7483_v42 = vld [vmem:[#allocation45_spill] sm:$0xff] }
 0x49a   : > { %2742 = vmatprep.subr.bf16.mxu1 %v7461_v34  ;;  %2701 = vmatprep.subr.bf16.mxu0 %v7462_v24  ;;  %v7484_v34 = vld [vmem:[#allocation47_spill] sm:$0xff]  ;;  %v7485_v24 = vld [vmem:[#allocation46_spill] sm:$0xff] }
 0x49d   : > { %2743 = vmatpush1.bf16.msra.mxu1 %v7463_v4  ;;  %2702 = vmatpush1.bf16.msra.mxu0 %v7464_v45  ;;  %v7486_v4 = vld [vmem:[#allocation48_spill] sm:$0xff]  ;;  %v7487_v45 = vld [vmem:[#allocation49_spill] sm:$0xff] }
 0x49e   : > { %2744 = vmatprep.subr.bf16.mxu1 %v7465_v37  ;;  %2703 = vmatprep.subr.bf16.mxu0 %v7466_v38  ;;  %v7488_v37 = vld [vmem:[#allocation51_spill] sm:$0xff]  ;;  %v7490_v38 = vld [vmem:[#allocation52_spill] sm:$0xff] }
 0x4a1   : > { %2745 = vmatpush1.bf16.msra.mxu1 %v7467_v43  ;;  %2704 = vmatpush1.bf16.msra.mxu0 %v7468_v10  ;;  %v7492_v43 = vld [vmem:[#allocation55_spill] sm:$0xff]  ;;  %v7493_v10 = vld [vmem:[#allocation54_spill] sm:$0xff] }
 0x4a2   : > { %2746 = vmatprep.subr.bf16.mxu1 %v7469_v8  ;;  %2705 = vmatprep.subr.bf16.mxu0 %v7470_v52  ;;  %v7494_v8 = vld [vmem:[#allocation56_spill] sm:$0xff]  ;;  %v7495_v52 = vld [vmem:[#allocation57_spill] sm:$0xff] }
 0x4a5   : > { %2747 = vmatpush1.bf16.msra.mxu1 %v7471_v26  ;;  %2706 = vmatpush1.bf16.msra.mxu0 %v7472_v29  ;;  %v7496_v26 = vld [vmem:[#allocation59_spill] sm:$0xff]  ;;  %v7497_v29 = vld [vmem:[#allocation58_spill] sm:$0xff] }
 0x4a6   : > { %2798 = vmatprep.subr.bf16.mxu1 %v7473_v59  ;;  %2757 = vmatprep.subr.bf16.mxu0 %v7474_v1  ;;  %v7498_v59 = vld [vmem:[#allocation60_spill] sm:$0xff]  ;;  %v7499_v1 = vld [vmem:[#allocation61_spill] sm:$0xff] }
 0x4a8   : > { %2749 = vmatmul.mubr.bf16.vlgmr.msra.gmra.mrb[16].mxu1 %v6204_v23  ;;  %2708 = vmatmul.mubr.bf16.vlgmr.msra.gmra.mrb[16].mxu0 %v6204_v23 }
 0x4a9   : > { %2799 = vmatpush1.bf16.msra.mxu1 %v7475_v53  ;;  %2758 = vmatpush1.bf16.msra.mxu0 %v7476_v19  ;;  %v7500_v53 = vld [vmem:[#allocation63_spill] sm:$0xff]  ;;  %v7501_v19 = vld [vmem:[#allocation62_spill] sm:$0xff] }
 0x4aa   : > { %2800 = vmatprep.subr.bf16.mxu1 %v7477_v9  ;;  %2759 = vmatprep.subr.bf16.mxu0 %v7478_v57  ;;  %v7502_v9 = vld [vmem:[#allocation64_spill] sm:$0xff]  ;;  %v7503_v57 = vld [vmem:[#allocation65_spill] sm:$0xff] }
 0x4ab   : > { %2830 = vmatprep.mubr.bf16.mxu1 %v6142_v12  ;;  %2789 = vmatprep.mubr.bf16.mxu0 %v6142_v12  ;;  %v7489_v12 = vld [vmem:[#allocation50_spill] sm:$0xff] }
 0x4ad   : > { %2801 = vmatpush1.bf16.msra.mxu1 %v7479_v44  ;;  %2760 = vmatpush1.bf16.msra.mxu0 %v7480_v60  ;;  %v7504_v44 = vld [vmem:[#allocation67_spill] sm:$0xff]  ;;  %v7505_v60 = vld [vmem:[#allocation66_spill] sm:$0xff] }
 0x4ae   : > { %2802 = vmatprep.subr.bf16.mxu1 %v7481_v13  ;;  %2761 = vmatprep.subr.bf16.mxu0 %v7482_v50  ;;  %v7506_v13 = vld [vmem:[#allocation68_spill] sm:$0xff]  ;;  %v7507_v50 = vld [vmem:[#allocation69_spill] sm:$0xff] }
 0x4b1   : > { %2803 = vmatpush1.bf16.msra.mxu1 %v7483_v42  ;;  %2762 = vmatpush1.bf16.msra.mxu0 %v7484_v34  ;;  %v7508_v42 = vld [vmem:[#allocation71_spill] sm:$0xff]  ;;  %v7509_v34 = vld [vmem:[#allocation70_spill] sm:$0xff] }
 0x4b2   : > { %2804 = vmatprep.subr.bf16.mxu1 %v7485_v24  ;;  %2763 = vmatprep.subr.bf16.mxu0 %v7486_v4  ;;  %v7510_v24 = vld [vmem:[#allocation72_spill] sm:$0xff]  ;;  %v7511_v4 = vld [vmem:[#allocation73_spill] sm:$0xff] }
 0x4b5   : > { %2805 = vmatpush1.bf16.msra.mxu1 %v7487_v45  ;;  %2764 = vmatpush1.bf16.msra.mxu0 %v7488_v37  ;;  %v7512_v45 = vld [vmem:[#allocation75_spill] sm:$0xff]  ;;  %v7513_v37 = vld [vmem:[#allocation74_spill] sm:$0xff] }
 0x4b6   : > { %2806 = vmatprep.subr.bf16.mxu1 %v7489_v12  ;;  %2765 = vmatprep.subr.bf16.mxu0 %v7490_v38  ;;  %v7514_v12 = vld [vmem:[#allocation76_spill] sm:$0xff]  ;;  %v7515_v38 = vld [vmem:[#allocation77_spill] sm:$0xff] }
 0x4b9   : > { %2807 = vmatpush1.bf16.msra.mxu1 %v7491_v0  ;;  %2766 = vmatpush1.bf16.msra.mxu0 %v7492_v43  ;;  %v7516_v0 = vld [vmem:[#allocation79_spill] sm:$0xff]  ;;  %v7517_v43 = vld [vmem:[#allocation78_spill] sm:$0xff] }
 0x4ba   : > { %2808 = vmatprep.subr.bf16.mxu1 %v7493_v10  ;;  %2767 = vmatprep.subr.bf16.mxu0 %v7494_v8  ;;  %v7518_v10 = vld [vmem:[#allocation80_spill] sm:$0xff]  ;;  %v7519_v8 = vld [vmem:[#allocation81_spill] sm:$0xff] }
 0x4bd   : > { %2809 = vmatpush1.bf16.msra.mxu1 %v7495_v52  ;;  %2768 = vmatpush1.bf16.msra.mxu0 %v7496_v26  ;;  %v7520_v52 = vld [vmem:[#allocation83_spill] sm:$0xff]  ;;  %v7521_v26 = vld [vmem:[#allocation82_spill] sm:$0xff] }
 0x4be   : > { %2810 = vmatprep.subr.bf16.mxu1 %v7497_v29  ;;  %2769 = vmatprep.subr.bf16.mxu0 %v7498_v59  ;;  %v7522_v29 = vld [vmem:[#allocation84_spill] sm:$0xff]  ;;  %v7523_v59 = vld [vmem:[#allocation85_spill] sm:$0xff] }
 0x4c1   : > { %2811 = vmatpush1.bf16.msra.mxu1 %v7499_v1  ;;  %2770 = vmatpush1.bf16.msra.mxu0 %v7500_v53  ;;  %v7524_v1 = vld [vmem:[#allocation87_spill] sm:$0xff]  ;;  %v7525_v53 = vld [vmem:[#allocation86_spill] sm:$0xff] }
 0x4c2   : > { %2812 = vmatprep.subr.bf16.mxu1 %v7501_v19  ;;  %2771 = vmatprep.subr.bf16.mxu0 %v7502_v9  ;;  %v7526_v19 = vld [vmem:[#allocation88_spill] sm:$0xff]  ;;  %v7527_v9 = vld [vmem:[#allocation89_spill] sm:$0xff] }
 0x4c5   : > { %2813 = vmatpush1.bf16.msra.mxu1 %v7503_v57  ;;  %2772 = vmatpush1.bf16.msra.mxu0 %v7504_v44  ;;  %v7528_v57 = vld [vmem:[#allocation91_spill] sm:$0xff]  ;;  %v7529_v44 = vld [vmem:[#allocation90_spill] sm:$0xff] }
 0x4c6   : > { %2814 = vmatprep.subr.bf16.mxu1 %v7505_v60  ;;  %2773 = vmatprep.subr.bf16.mxu0 %v7506_v13  ;;  %v7530_v60 = vld [vmem:[#allocation92_spill] sm:$0xff]  ;;  %v7531_v13 = vld [vmem:[#allocation93_spill] sm:$0xff] }
 0x4c9   : > { %2815 = vmatpush1.bf16.msra.mxu1 %v7507_v50  ;;  %2774 = vmatpush1.bf16.msra.mxu0 %v7508_v42  ;;  %v7532_v50 = vld [vmem:[#allocation95_spill] sm:$0xff]  ;;  %v7533_v42 = vld [vmem:[#allocation94_spill] sm:$0xff] }
 0x4ca   : > { %2816 = vmatprep.subr.bf16.mxu1 %v7509_v34  ;;  %2775 = vmatprep.subr.bf16.mxu0 %v7510_v24  ;;  %v7534_v34 = vld [vmem:[#allocation96_spill] sm:$0xff]  ;;  %v7535_v24 = vld [vmem:[#allocation97_spill] sm:$0xff] }
 0x4cd   : > { %2817 = vmatpush1.bf16.msra.mxu1 %v7511_v4  ;;  %2776 = vmatpush1.bf16.msra.mxu0 %v7512_v45  ;;  %v7536_v4 = vld [vmem:[#allocation98_spill] sm:$0xff] }
 0x4ce   : > { %2818 = vmatprep.subr.bf16.mxu1 %v7513_v37  ;;  %2777 = vmatprep.subr.bf16.mxu0 %v7514_v12 }
 0x4d1   : > { %2819 = vmatpush1.bf16.msra.mxu1 %v7515_v38  ;;  %2778 = vmatpush1.bf16.msra.mxu0 %v7516_v0 }
 0x4d2   : > { %2820 = vmatprep.subr.bf16.mxu1 %v7517_v43  ;;  %2779 = vmatprep.subr.bf16.mxu0 %v7518_v10 }
 0x4d5   : > { %2821 = vmatpush1.bf16.msra.mxu1 %v7519_v8  ;;  %2780 = vmatpush1.bf16.msra.mxu0 %v7520_v52 }
 0x4d6   : > { %2822 = vmatprep.subr.bf16.mxu1 %v7521_v26  ;;  %2781 = vmatprep.subr.bf16.mxu0 %v7522_v29  ;;  %v2661_v26 = vld [vmem:[#allocation3 + $0x10] sm:$0x30] }
 0x4d9   : > { %2823 = vmatpush1.bf16.msra.mxu1 %v7523_v59  ;;  %2782 = vmatpush1.bf16.msra.mxu0 %v7524_v1  ;;  %v2662_v59 = vld [vmem:[#allocation3 + $0x18] sm:$0x30] }
 0x4da   : > { %2824 = vmatprep.subr.bf16.mxu1 %v7525_v53  ;;  %2783 = vmatprep.subr.bf16.mxu0 %v7526_v19  ;;  %v2659_v53 = vld [vmem:[#allocation3] sm:$0x30] }
 0x4dd   : > { %2825 = vmatpush1.bf16.msra.mxu1 %v7527_v9  ;;  %2784 = vmatpush1.bf16.msra.mxu0 %v7528_v57  ;;  %v2660_v57 = vld [vmem:[#allocation3 + $0x8] sm:$0x30] }
 0x4de   : > { %2826 = vmatprep.subr.bf16.mxu1 %v7529_v44  ;;  %2785 = vmatprep.subr.bf16.mxu0 %v7530_v60 }
 0x4e1   : > { %2827 = vmatpush1.bf16.msra.mxu1 %v7531_v13  ;;  %2786 = vmatpush1.bf16.msra.mxu0 %v7532_v50 }
 0x4e2   : > { %2828 = vmatprep.subr.bf16.mxu1 %v7533_v42  ;;  %2787 = vmatprep.subr.bf16.mxu0 %v7534_v34 }
 0x4e5   : > { %2829 = vmatpush1.bf16.msra.mxu1 %v7535_v24  ;;  %2788 = vmatpush1.bf16.msra.mxu0 %v7536_v4  ;;  %v2665_v24 = vld [vmem:[#allocation3 + $0x30] sm:$0x30] }
 0x4e8   : > { %2831 = vmatmul.mubr.bf16.vlgmr.msra.gmra.mrb[20].mxu1 %v6204_v23  ;;  %2790 = vmatmul.mubr.bf16.vlgmr.msra.gmra.mrb[20].mxu0 %v6204_v23 }
 0x57b   : > { %v2750_v45 = vpop.f32.mrb[16].mxu1  ;;  %v2709_v37 = vpop.f32.mrb[16].mxu0 }
 0x57c   : > { %v2752_v12 = vpop.f32.mrb[17].mxu1  ;;  %v2711_v38 = vpop.f32.mrb[17].mxu0  ;;  %v2849_v52 = vrot.slane %v2750_v45, 4  ;;  %v2847_v1 = vrot.slane %v2709_v37, 4  ;;  %v2666_v45 = vld [vmem:[#allocation3 + $0x38] sm:$0x30] }
 0x57d   : > { %v2754_v0 = vpop.f32.mrb[18].mxu1  ;;  %v2713_v43 = vpop.f32.mrb[18].mxu0  ;;  %v2850_v29 = vrot.slane %v2752_v12, 4  ;;  %v2848_v19 = vrot.slane %v2711_v38, 4  ;;  %v2663_v12 = vld [vmem:[#allocation3 + $0x20] sm:$0x30] }
 0x57e   : > { %v2755_v10 = vpop.f32.mrb[19].mxu1  ;;  %v2714_v8 = vpop.f32.mrb[19].mxu0  ;;  %v2865_v9 = vadd.f32 %v2849_v52, %v2661_v26  ;;  %v2863_v60 = vadd.f32 %v2847_v1, %v2659_v53 }
 0x57f   : > { %v2866_v44 = vadd.f32 %v2850_v29, %v2662_v59  ;;  %v2864_v23 = vadd.f32 %v2848_v19, %v2660_v57  ;;  %v2664_v10 = vld [vmem:[#allocation3 + $0x28] sm:$0x30] }
 0x580   : > { %v2873_v13 = vmul.f32 0.5, %v2865_v9  ;;  %v2871_v42 = vmul.f32 0.5, %v2863_v60 }
 0x581   : > { %v2874_v50 = vmul.f32 0.5, %v2866_v44  ;;  %v2872_v34 = vmul.f32 0.5, %v2864_v23 }
 0x582   : > { %4997 = vtanh.f32 %v2873_v13 }
 0x583   : > { %4999 = vtanh.f32 %v2874_v50 }
 0x584   : > { %5001 = vtanh.f32 %v2871_v42 }
 0x585   : > { %5003 = vtanh.f32 %v2872_v34 }
 0x58c   : > { %v4998_v60 = vpop.eup %4997 }
 0x58d   : > { %v5000_v23 = vpop.eup %4999 }
 0x58e   : > { %v5002_v50 = vpop.eup %5001 }
 0x58f   : > { %v5004_v34 = vpop.eup %5003 }
 0x5bb   : > { %v2832_v4 = vpop.f32.mrb[20].mxu1  ;;  %v2791_v37 = vpop.f32.mrb[20].mxu0 }
 0x5bc   : > { %v2853_v0 = vrot.slane %v2832_v4, 4  ;;  %v2834_v38 = vpop.f32.mrb[21].mxu1  ;;  %v2851_v43 = vrot.slane %v2791_v37, 4  ;;  %v2793_v8 = vpop.f32.mrb[21].mxu0  ;;  %v2885_v4 = vmul.f32 0.5, %v4998_v60  ;;  %v2886_v37 = vmul.f32 0.5, %v5000_v23 }
 0x5bd   : > { %v2854_v52 = vrot.slane %v2834_v38, 4  ;;  %v2836_v26 = vpop.f32.mrb[22].mxu1  ;;  %v2852_v29 = vrot.slane %v2793_v8, 4  ;;  %v2795_v59 = vpop.f32.mrb[22].mxu0  ;;  %v2883_v38 = vmul.f32 0.5, %v5002_v50  ;;  %v2884_v8 = vmul.f32 0.5, %v5004_v34 }
 0x5be   : > { %v2869_v1 = vadd.f32 %v2853_v0, %v2665_v24  ;;  %v2837_v53 = vpop.f32.mrb[23].mxu1  ;;  %v2867_v19 = vadd.f32 %v2851_v43, %v2663_v12  ;;  %v2796_v9 = vpop.f32.mrb[23].mxu0  ;;  %v2891_v24 = vadd.f32 0.5, %v2885_v4  ;;  %v2899_v12 = vrot.slane %v6125_v3, 6 }
 0x5bf   : > { %v2870_v57 = vadd.f32 %v2854_v52, %v2666_v45  ;;  %v2868_v44 = vadd.f32 %v2852_v29, %v2664_v10  ;;  %v2892_v0 = vadd.f32 0.5, %v2886_v37  ;;  %v2900_v45 = vrot.slane %v6127_v49, 6 }
 0x5c0   : > { %5005 = vtanh.f32 %v2869_v1  ;;  %v2875_v13 = vmul.f32 0.5, %v2867_v19  ;;  %v2889_v43 = vadd.f32 0.5, %v2883_v38  ;;  %v2890_v52 = vadd.f32 0.5, %v2884_v8 }
 0x5c1   : > { %5007 = vtanh.f32 %v2870_v57  ;;  %v2876_v42 = vmul.f32 0.5, %v2868_v44  ;;  %v2903_v29 = vmul.f32 %v2899_v12, %v2891_v24  ;;  %v2904_v1 = vmul.f32 %v2900_v45, %v2892_v0 }
 0x5c2   : > { %5009 = vtanh.f32 %v2875_v13 }
 0x5c3   : > { %5011 = vtanh.f32 %v2876_v42 }
 0x5ca   : > { %v5006_v10 = vpop.eup %5005 }
 0x5cb   : > { %v5008_v26 = vpop.eup %5007  ;;  %v2905_v59 = vmul.f32 %v5006_v10, %v2889_v43 }
 0x5cc   : > { %v2906_v53 = vmul.f32 %v5008_v26, %v2890_v52  ;;  %v5010_v57 = vpop.eup %5009 }
 0x5cd   : > { %v6280_v19 = vadd.f32 %v2905_v59, %v2903_v29  ;;  %v5012_v44 = vpop.eup %5011  ;;  %v2887_v3 = vmul.f32 0.5, %v5010_v57 }
 0x5ce   : > { %v6282_v9 = vadd.f32 %v2906_v53, %v2904_v1  ;;  %v2888_v49 = vmul.f32 0.5, %v5012_v44 }
 0x5cf   : > { %5013 = vtanh.f32 %v6280_v19  ;;  %v2893_v60 = vadd.f32 0.5, %v2887_v3 }
 0x5d0   : > { %5015 = vtanh.f32 %v6282_v9  ;;  %v2894_v23 = vadd.f32 0.5, %v2888_v49 }
 0x5d5   : > { %2915 = sbr.rel (%p4843_p8) target bundleno = 1502 (0x5de), region = 72 }
 0x5d9   : > { %v5014_v13 = vpop.eup %5013 }
 0x5da   : > { %v5016_v50 = vpop.eup %5015  ;;  %v6286_v42 = vmul.f32 %v5014_v13, %v2893_v60 }
 0x5db   : > { %v2912_v34 = vmul.f32 %v5016_v50, %v2894_v23 }
 0x5dc   : > { %2916 = vst [vmem:[#allocation2] sm:$0x30] %v6286_v42 }
 0x5dd   : > { %2917 = vst [vmem:[#allocation2 + $0x8] sm:$0x30] %v2912_v34 }
 0x5de PF: > { %2975 = vmatprep.subr.bf16.mxu1 %v5452_v14  ;;  %2934 = vmatprep.subr.bf16.mxu0 %v5463_v21  ;;  %v2927_v4 = vpack.c.bf16 %v2912_v34, %v2912_v34  ;;  %v7537_v38 = vld [vmem:[#allocation7_spill] sm:$0xff]  ;;  %v7538_v8 = vld [vmem:[#allocation8_spill] sm:$0xff]  ;;  %v7539_v24 = vld [vmem:[#allocation9_spill] sm:$0xff]  ;;  %v2926_v34 = vpack.c.bf16 %v6286_v42, %v6286_v42 }
 0x5df   : > { %2976 = vmatpush1.bf16.msra.mxu1 %v5454_v15  ;;  %2935 = vmatpush1.bf16.msra.mxu0 %v5465_v22  ;;  %v7540_v12 = vld [vmem:[#allocation11_spill] sm:$0xff]  ;;  %v7541_v0 = vld [vmem:[#allocation10_spill] sm:$0xff]  ;;  %v7542_v45 = vld [vmem:[#allocation12_spill] sm:$0xff] }
 0x5e0   : > { %2977 = vmatprep.subr.bf16.mxu1 %v5461_v20  ;;  %2936 = vmatprep.subr.bf16.mxu0 %v5476_v28  ;;  %v6297_v37 = vrot.slane %v2927_v4, 2  ;;  %v7543_v43 = vld [vmem:[#allocation13_spill] sm:$0xff]  ;;  %v7544_v10 = vld [vmem:[#allocation15_spill] sm:$0xff]  ;;  %v7545_v52 = vld [vmem:[#allocation14_spill] sm:$0xff] }
 0x5e1   : > { %v7546_v26 = vld [vmem:[#allocation16_spill] sm:$0xff]  ;;  %v7547_v29 = vld [vmem:[#allocation17_spill] sm:$0xff]  ;;  %v7548_v59 = vld [vmem:[#allocation19_spill] sm:$0xff] }
 0x5e2   : > { %3007 = vmatprep.mubr.bf16.mxu1 %v6297_v37  ;;  %2966 = vmatprep.mubr.bf16.mxu0 %v6297_v37  ;;  %v7549_v1 = vld [vmem:[#allocation18_spill] sm:$0xff]  ;;  %v7550_v53 = vld [vmem:[#allocation20_spill] sm:$0xff]  ;;  %v7551_v57 = vld [vmem:[#allocation21_spill] sm:$0xff] }
 0x5e3   : > { %2978 = vmatpush1.bf16.msra.mxu1 %v5473_v27  ;;  %2937 = vmatpush1.bf16.msra.mxu0 %v5484_v33  ;;  %v7552_v44 = vld [vmem:[#allocation23_spill] sm:$0xff]  ;;  %v7553_v3 = vld [vmem:[#allocation22_spill] sm:$0xff]  ;;  %v7554_v49 = vld [vmem:[#allocation24_spill] sm:$0xff] }
 0x5e4   : > { %2979 = vmatprep.subr.bf16.mxu1 %v5482_v32  ;;  %2938 = vmatprep.subr.bf16.mxu0 %v5489_v36  ;;  %v7555_v60 = vld [vmem:[#allocation25_spill] sm:$0xff]  ;;  %v7556_v23 = vld [vmem:[#allocation27_spill] sm:$0xff]  ;;  %v7557_v13 = vld [vmem:[#allocation26_spill] sm:$0xff] }
 0x5e5   : > { %v7558_v50 = vld [vmem:[#allocation28_spill] sm:$0xff]  ;;  %v7559_v4 = vld [vmem:[#allocation29_spill] sm:$0xff] }
 0x5e6   : > { %v7567_v42 = vld [vmem:[#allocation37_spill] sm:$0xff] }
 0x5e7   : > { %2980 = vmatpush1.bf16.msra.mxu1 %v5494_v39  ;;  %2939 = vmatpush1.bf16.msra.mxu0 %v5500_v41 }
 0x5e8   : > { %2981 = vmatprep.subr.bf16.mxu1 %v5498_v40  ;;  %2940 = vmatprep.subr.bf16.mxu0 %v5505_v30 }
 0x5eb   : > { %2982 = vmatpush1.bf16.msra.mxu1 %v5510_v46  ;;  %2941 = vmatpush1.bf16.msra.mxu0 %v5516_v48 }
 0x5ec   : > { %2983 = vmatprep.subr.bf16.mxu1 %v5514_v47  ;;  %2942 = vmatprep.subr.bf16.mxu0 %v5521_v51 }
 0x5ef   : > { %2984 = vmatpush1.bf16.msra.mxu1 %v5526_v54  ;;  %2943 = vmatpush1.bf16.msra.mxu0 %v5532_v56 }
 0x5f0   : > { %2985 = vmatprep.subr.bf16.mxu1 %v5530_v55  ;;  %2944 = vmatprep.subr.bf16.mxu0 %v5537_v58 }
 0x5f3   : > { %2986 = vmatpush1.bf16.msra.mxu1 %v5542_v61  ;;  %2945 = vmatpush1.bf16.msra.mxu0 %v5548_v63 }
 0x5f4   : > { %2987 = vmatprep.subr.bf16.mxu1 %v5546_v62  ;;  %2946 = vmatprep.subr.bf16.mxu0 %v5553_v2 }
 0x5f7   : > { %2988 = vmatpush1.bf16.msra.mxu1 %v5558_v5  ;;  %2947 = vmatpush1.bf16.msra.mxu0 %v5564_v7 }
 0x5f8   : > { %2989 = vmatprep.subr.bf16.mxu1 %v5562_v6  ;;  %2948 = vmatprep.subr.bf16.mxu0 %v5569_v11 }
 0x5fb   : > { %2990 = vmatpush1.bf16.msra.mxu1 %v5574_v16  ;;  %2949 = vmatpush1.bf16.msra.mxu0 %v5580_v18 }
 0x5fc   : > { %2991 = vmatprep.subr.bf16.mxu1 %v5578_v17  ;;  %2950 = vmatprep.subr.bf16.mxu0 %v5585_v25 }
 0x5ff   : > { %2992 = vmatpush1.bf16.msra.mxu1 %v5590_v31  ;;  %2951 = vmatpush1.bf16.msra.mxu0 %v5596_v35 }
 0x600   : > { %2993 = vmatprep.subr.bf16.mxu1 %v7537_v38  ;;  %2952 = vmatprep.subr.bf16.mxu0 %v7538_v8  ;;  %v7560_v38 = vld [vmem:[#allocation31_spill] sm:$0xff]  ;;  %v7561_v8 = vld [vmem:[#allocation30_spill] sm:$0xff] }
 0x603   : > { %2994 = vmatpush1.bf16.msra.mxu1 %v7539_v24  ;;  %2953 = vmatpush1.bf16.msra.mxu0 %v7540_v12  ;;  %v7562_v24 = vld [vmem:[#allocation32_spill] sm:$0xff]  ;;  %v6359_v12 = vrot.slane %v2926_v34, 2  ;;  %v7583_v34 = vld [vmem:[#allocation53_spill] sm:$0xff] }
 0x604   : > { %2995 = vmatprep.subr.bf16.mxu1 %v7541_v0  ;;  %2954 = vmatprep.subr.bf16.mxu0 %v7542_v45  ;;  %v7563_v0 = vld [vmem:[#allocation33_spill] sm:$0xff]  ;;  %v7564_v45 = vld [vmem:[#allocation35_spill] sm:$0xff] }
 0x607   : > { %2996 = vmatpush1.bf16.msra.mxu1 %v7543_v43  ;;  %2955 = vmatpush1.bf16.msra.mxu0 %v7544_v10  ;;  %v7565_v43 = vld [vmem:[#allocation34_spill] sm:$0xff]  ;;  %v7566_v10 = vld [vmem:[#allocation36_spill] sm:$0xff] }
 0x608   : > { %2997 = vmatprep.subr.bf16.mxu1 %v7545_v52  ;;  %2956 = vmatprep.subr.bf16.mxu0 %v7546_v26  ;;  %v7568_v52 = vld [vmem:[#allocation39_spill] sm:$0xff]  ;;  %v7569_v26 = vld [vmem:[#allocation38_spill] sm:$0xff] }
 0x60b   : > { %2998 = vmatpush1.bf16.msra.mxu1 %v7547_v29  ;;  %2957 = vmatpush1.bf16.msra.mxu0 %v7548_v59  ;;  %v7570_v29 = vld [vmem:[#allocation40_spill] sm:$0xff]  ;;  %v7571_v59 = vld [vmem:[#allocation41_spill] sm:$0xff] }
 0x60c   : > { %2999 = vmatprep.subr.bf16.mxu1 %v7549_v1  ;;  %2958 = vmatprep.subr.bf16.mxu0 %v7550_v53  ;;  %v7572_v1 = vld [vmem:[#allocation43_spill] sm:$0xff]  ;;  %v7573_v53 = vld [vmem:[#allocation42_spill] sm:$0xff] }
 0x60f   : > { %3000 = vmatpush1.bf16.msra.mxu1 %v7551_v57  ;;  %2959 = vmatpush1.bf16.msra.mxu0 %v7552_v44  ;;  %v7574_v57 = vld [vmem:[#allocation44_spill] sm:$0xff]  ;;  %v7575_v44 = vld [vmem:[#allocation45_spill] sm:$0xff] }
 0x610   : > { %3001 = vmatprep.subr.bf16.mxu1 %v7553_v3  ;;  %2960 = vmatprep.subr.bf16.mxu0 %v7554_v49  ;;  %v7576_v3 = vld [vmem:[#allocation47_spill] sm:$0xff]  ;;  %v7577_v49 = vld [vmem:[#allocation46_spill] sm:$0xff] }
 0x613   : > { %3002 = vmatpush1.bf16.msra.mxu1 %v7555_v60  ;;  %2961 = vmatpush1.bf16.msra.mxu0 %v7556_v23  ;;  %v7578_v60 = vld [vmem:[#allocation48_spill] sm:$0xff]  ;;  %v7579_v23 = vld [vmem:[#allocation49_spill] sm:$0xff] }
 0x614   : > { %3003 = vmatprep.subr.bf16.mxu1 %v7557_v13  ;;  %2962 = vmatprep.subr.bf16.mxu0 %v7558_v50  ;;  %v7580_v13 = vld [vmem:[#allocation51_spill] sm:$0xff]  ;;  %v7582_v50 = vld [vmem:[#allocation52_spill] sm:$0xff] }
 0x617   : > { %3004 = vmatpush1.bf16.msra.mxu1 %v7559_v4  ;;  %2963 = vmatpush1.bf16.msra.mxu0 %v7560_v38  ;;  %v7584_v4 = vld [vmem:[#allocation55_spill] sm:$0xff]  ;;  %v7585_v38 = vld [vmem:[#allocation54_spill] sm:$0xff] }
 0x618   : > { %3005 = vmatprep.subr.bf16.mxu1 %v7561_v8  ;;  %2964 = vmatprep.subr.bf16.mxu0 %v7562_v24  ;;  %v7586_v8 = vld [vmem:[#allocation56_spill] sm:$0xff]  ;;  %v7587_v24 = vld [vmem:[#allocation57_spill] sm:$0xff] }
 0x61b   : > { %3006 = vmatpush1.bf16.msra.mxu1 %v7563_v0  ;;  %2965 = vmatpush1.bf16.msra.mxu0 %v7564_v45  ;;  %v7588_v0 = vld [vmem:[#allocation59_spill] sm:$0xff]  ;;  %v7589_v45 = vld [vmem:[#allocation58_spill] sm:$0xff] }
 0x61c   : > { %3057 = vmatprep.subr.bf16.mxu1 %v7565_v43  ;;  %3016 = vmatprep.subr.bf16.mxu0 %v7566_v10  ;;  %v7590_v43 = vld [vmem:[#allocation60_spill] sm:$0xff]  ;;  %v7591_v10 = vld [vmem:[#allocation61_spill] sm:$0xff] }
 0x61e   : > { %3008 = vmatmul.mubr.bf16.vlgmr.msra.gmra.mrb[24].mxu1 %v6359_v12  ;;  %2967 = vmatmul.mubr.bf16.vlgmr.msra.gmra.mrb[24].mxu0 %v6359_v12 }
 0x61f   : > { %3058 = vmatpush1.bf16.msra.mxu1 %v7567_v42  ;;  %3017 = vmatpush1.bf16.msra.mxu0 %v7568_v52  ;;  %v7592_v42 = vld [vmem:[#allocation63_spill] sm:$0xff]  ;;  %v7593_v52 = vld [vmem:[#allocation62_spill] sm:$0xff] }
 0x620   : > { %3059 = vmatprep.subr.bf16.mxu1 %v7569_v26  ;;  %3018 = vmatprep.subr.bf16.mxu0 %v7570_v29  ;;  %v7594_v26 = vld [vmem:[#allocation64_spill] sm:$0xff]  ;;  %v7595_v29 = vld [vmem:[#allocation65_spill] sm:$0xff] }
 0x621   : > { %3089 = vmatprep.mubr.bf16.mxu1 %v6297_v37  ;;  %3048 = vmatprep.mubr.bf16.mxu0 %v6297_v37  ;;  %v7581_v37 = vld [vmem:[#allocation50_spill] sm:$0xff] }
 0x623   : > { %3060 = vmatpush1.bf16.msra.mxu1 %v7571_v59  ;;  %3019 = vmatpush1.bf16.msra.mxu0 %v7572_v1  ;;  %v7596_v59 = vld [vmem:[#allocation67_spill] sm:$0xff]  ;;  %v7597_v1 = vld [vmem:[#allocation66_spill] sm:$0xff] }
 0x624   : > { %3061 = vmatprep.subr.bf16.mxu1 %v7573_v53  ;;  %3020 = vmatprep.subr.bf16.mxu0 %v7574_v57  ;;  %v7598_v53 = vld [vmem:[#allocation68_spill] sm:$0xff]  ;;  %v7599_v57 = vld [vmem:[#allocation69_spill] sm:$0xff] }
 0x627   : > { %3062 = vmatpush1.bf16.msra.mxu1 %v7575_v44  ;;  %3021 = vmatpush1.bf16.msra.mxu0 %v7576_v3  ;;  %v7600_v44 = vld [vmem:[#allocation71_spill] sm:$0xff]  ;;  %v7601_v3 = vld [vmem:[#allocation70_spill] sm:$0xff] }
 0x628   : > { %3063 = vmatprep.subr.bf16.mxu1 %v7577_v49  ;;  %3022 = vmatprep.subr.bf16.mxu0 %v7578_v60  ;;  %v7602_v49 = vld [vmem:[#allocation72_spill] sm:$0xff]  ;;  %v7603_v60 = vld [vmem:[#allocation73_spill] sm:$0xff] }
 0x62b   : > { %3064 = vmatpush1.bf16.msra.mxu1 %v7579_v23  ;;  %3023 = vmatpush1.bf16.msra.mxu0 %v7580_v13  ;;  %v7604_v23 = vld [vmem:[#allocation75_spill] sm:$0xff]  ;;  %v7605_v13 = vld [vmem:[#allocation74_spill] sm:$0xff] }
 0x62c   : > { %3065 = vmatprep.subr.bf16.mxu1 %v7581_v37  ;;  %3024 = vmatprep.subr.bf16.mxu0 %v7582_v50  ;;  %v7606_v37 = vld [vmem:[#allocation76_spill] sm:$0xff]  ;;  %v7607_v50 = vld [vmem:[#allocation77_spill] sm:$0xff] }
 0x62f   : > { %3066 = vmatpush1.bf16.msra.mxu1 %v7583_v34  ;;  %3025 = vmatpush1.bf16.msra.mxu0 %v7584_v4  ;;  %v7608_v34 = vld [vmem:[#allocation79_spill] sm:$0xff]  ;;  %v7609_v4 = vld [vmem:[#allocation78_spill] sm:$0xff] }
 0x630   : > { %3067 = vmatprep.subr.bf16.mxu1 %v7585_v38  ;;  %3026 = vmatprep.subr.bf16.mxu0 %v7586_v8  ;;  %v7610_v38 = vld [vmem:[#allocation80_spill] sm:$0xff]  ;;  %v7611_v8 = vld [vmem:[#allocation81_spill] sm:$0xff] }
 0x633   : > { %3068 = vmatpush1.bf16.msra.mxu1 %v7587_v24  ;;  %3027 = vmatpush1.bf16.msra.mxu0 %v7588_v0  ;;  %v7612_v24 = vld [vmem:[#allocation83_spill] sm:$0xff]  ;;  %v7613_v0 = vld [vmem:[#allocation82_spill] sm:$0xff] }
 0x634   : > { %3069 = vmatprep.subr.bf16.mxu1 %v7589_v45  ;;  %3028 = vmatprep.subr.bf16.mxu0 %v7590_v43  ;;  %v7614_v45 = vld [vmem:[#allocation84_spill] sm:$0xff]  ;;  %v7615_v43 = vld [vmem:[#allocation85_spill] sm:$0xff] }
 0x637   : > { %3070 = vmatpush1.bf16.msra.mxu1 %v7591_v10  ;;  %3029 = vmatpush1.bf16.msra.mxu0 %v7592_v42  ;;  %v7616_v10 = vld [vmem:[#allocation87_spill] sm:$0xff]  ;;  %v7617_v42 = vld [vmem:[#allocation86_spill] sm:$0xff] }
 0x638   : > { %3071 = vmatprep.subr.bf16.mxu1 %v7593_v52  ;;  %3030 = vmatprep.subr.bf16.mxu0 %v7594_v26  ;;  %v7618_v52 = vld [vmem:[#allocation88_spill] sm:$0xff]  ;;  %v7619_v26 = vld [vmem:[#allocation89_spill] sm:$0xff] }
 0x63b   : > { %3072 = vmatpush1.bf16.msra.mxu1 %v7595_v29  ;;  %3031 = vmatpush1.bf16.msra.mxu0 %v7596_v59  ;;  %v7620_v29 = vld [vmem:[#allocation91_spill] sm:$0xff]  ;;  %v7621_v59 = vld [vmem:[#allocation90_spill] sm:$0xff] }
 0x63c   : > { %3073 = vmatprep.subr.bf16.mxu1 %v7597_v1  ;;  %3032 = vmatprep.subr.bf16.mxu0 %v7598_v53  ;;  %v7622_v1 = vld [vmem:[#allocation92_spill] sm:$0xff]  ;;  %v7623_v53 = vld [vmem:[#allocation93_spill] sm:$0xff] }
 0x63f   : > { %3074 = vmatpush1.bf16.msra.mxu1 %v7599_v57  ;;  %3033 = vmatpush1.bf16.msra.mxu0 %v7600_v44  ;;  %v7624_v57 = vld [vmem:[#allocation95_spill] sm:$0xff]  ;;  %v7625_v44 = vld [vmem:[#allocation94_spill] sm:$0xff] }
 0x640   : > { %3075 = vmatprep.subr.bf16.mxu1 %v7601_v3  ;;  %3034 = vmatprep.subr.bf16.mxu0 %v7602_v49  ;;  %v7626_v3 = vld [vmem:[#allocation96_spill] sm:$0xff]  ;;  %v7627_v49 = vld [vmem:[#allocation97_spill] sm:$0xff] }
 0x643   : > { %3076 = vmatpush1.bf16.msra.mxu1 %v7603_v60  ;;  %3035 = vmatpush1.bf16.msra.mxu0 %v7604_v23  ;;  %v7628_v60 = vld [vmem:[#allocation98_spill] sm:$0xff] }
 0x644   : > { %3077 = vmatprep.subr.bf16.mxu1 %v7605_v13  ;;  %3036 = vmatprep.subr.bf16.mxu0 %v7606_v37 }
 0x647   : > { %3078 = vmatpush1.bf16.msra.mxu1 %v7607_v50  ;;  %3037 = vmatpush1.bf16.msra.mxu0 %v7608_v34 }
 0x648   : > { %3079 = vmatprep.subr.bf16.mxu1 %v7609_v4  ;;  %3038 = vmatprep.subr.bf16.mxu0 %v7610_v38 }
 0x64b   : > { %3080 = vmatpush1.bf16.msra.mxu1 %v7611_v8  ;;  %3039 = vmatpush1.bf16.msra.mxu0 %v7612_v24 }
 0x64c   : > { %3081 = vmatprep.subr.bf16.mxu1 %v7613_v0  ;;  %3040 = vmatprep.subr.bf16.mxu0 %v7614_v45  ;;  %v2920_v0 = vld [vmem:[#allocation3 + $0x10] sm:$0xc0] }
 0x64f   : > { %3082 = vmatpush1.bf16.msra.mxu1 %v7615_v43  ;;  %3041 = vmatpush1.bf16.msra.mxu0 %v7616_v10  ;;  %v2921_v43 = vld [vmem:[#allocation3 + $0x18] sm:$0xc0] }
 0x650   : > { %3083 = vmatprep.subr.bf16.mxu1 %v7617_v42  ;;  %3042 = vmatprep.subr.bf16.mxu0 %v7618_v52  ;;  %v2918_v42 = vld [vmem:[#allocation3] sm:$0xc0] }
 0x653   : > { %3084 = vmatpush1.bf16.msra.mxu1 %v7619_v26  ;;  %3043 = vmatpush1.bf16.msra.mxu0 %v7620_v29  ;;  %v2919_v29 = vld [vmem:[#allocation3 + $0x8] sm:$0xc0] }
 0x654   : > { %3085 = vmatprep.subr.bf16.mxu1 %v7621_v59  ;;  %3044 = vmatprep.subr.bf16.mxu0 %v7622_v1 }
 0x657   : > { %3086 = vmatpush1.bf16.msra.mxu1 %v7623_v53  ;;  %3045 = vmatpush1.bf16.msra.mxu0 %v7624_v57 }
 0x658   : > { %3087 = vmatprep.subr.bf16.mxu1 %v7625_v44  ;;  %3046 = vmatprep.subr.bf16.mxu0 %v7626_v3 }
 0x65b   : > { %3088 = vmatpush1.bf16.msra.mxu1 %v7627_v49  ;;  %3047 = vmatpush1.bf16.msra.mxu0 %v7628_v60  ;;  %v2924_v49 = vld [vmem:[#allocation3 + $0x30] sm:$0xc0] }
 0x65e   : > { %3090 = vmatmul.mubr.bf16.vlgmr.msra.gmra.mrb[28].mxu1 %v6359_v12  ;;  %3049 = vmatmul.mubr.bf16.vlgmr.msra.gmra.mrb[28].mxu0 %v6359_v12 }
 0x6f1   : > { %v3009_v23 = vpop.f32.mrb[24].mxu1  ;;  %v2968_v13 = vpop.f32.mrb[24].mxu0 }
 0x6f2   : > { %v3011_v37 = vpop.f32.mrb[25].mxu1  ;;  %v2970_v50 = vpop.f32.mrb[25].mxu0  ;;  %v3108_v24 = vrot.slane %v3009_v23, 2  ;;  %v3106_v10 = vrot.slane %v2968_v13, 2  ;;  %v2925_v23 = vld [vmem:[#allocation3 + $0x38] sm:$0xc0] }
 0x6f3   : > { %v3013_v34 = vpop.f32.mrb[26].mxu1  ;;  %v2972_v4 = vpop.f32.mrb[26].mxu0  ;;  %v3109_v45 = vrot.slane %v3011_v37, 2  ;;  %v3107_v52 = vrot.slane %v2970_v50, 2  ;;  %v2922_v37 = vld [vmem:[#allocation3 + $0x20] sm:$0xc0] }
 0x6f4   : > { %v3014_v38 = vpop.f32.mrb[27].mxu1  ;;  %v2973_v8 = vpop.f32.mrb[27].mxu0  ;;  %v3124_v26 = vadd.f32 %v3108_v24, %v2920_v0  ;;  %v3122_v1 = vadd.f32 %v3106_v10, %v2918_v42 }
 0x6f5   : > { %v3125_v59 = vadd.f32 %v3109_v45, %v2921_v43  ;;  %v3123_v12 = vadd.f32 %v3107_v52, %v2919_v29  ;;  %v2923_v38 = vld [vmem:[#allocation3 + $0x28] sm:$0xc0] }
 0x6f6   : > { %v3132_v53 = vmul.f32 0.5, %v3124_v26  ;;  %v3130_v44 = vmul.f32 0.5, %v3122_v1 }
 0x6f7   : > { %v3133_v57 = vmul.f32 0.5, %v3125_v59  ;;  %v3131_v3 = vmul.f32 0.5, %v3123_v12 }
 0x6f8   : > { %5017 = vtanh.f32 %v3132_v53 }
 0x6f9   : > { %5019 = vtanh.f32 %v3133_v57 }
 0x6fa   : > { %5021 = vtanh.f32 %v3130_v44 }
 0x6fb   : > { %5023 = vtanh.f32 %v3131_v3 }
 0x702   : > { %v5018_v1 = vpop.eup %5017 }
 0x703   : > { %v5020_v12 = vpop.eup %5019 }
 0x704   : > { %v5022_v57 = vpop.eup %5021 }
 0x705   : > { %v5024_v3 = vpop.eup %5023 }
 0x731   : > { %v3091_v60 = vpop.f32.mrb[28].mxu1  ;;  %v3050_v13 = vpop.f32.mrb[28].mxu0 }
 0x732   : > { %v3112_v34 = vrot.slane %v3091_v60, 2  ;;  %v3093_v50 = vpop.f32.mrb[29].mxu1  ;;  %v3110_v4 = vrot.slane %v3050_v13, 2  ;;  %v3052_v8 = vpop.f32.mrb[29].mxu0  ;;  %v3144_v60 = vmul.f32 0.5, %v5018_v1  ;;  %v3145_v13 = vmul.f32 0.5, %v5020_v12 }
 0x733   : > { %v3113_v24 = vrot.slane %v3093_v50, 2  ;;  %v3095_v0 = vpop.f32.mrb[30].mxu1  ;;  %v3111_v45 = vrot.slane %v3052_v8, 2  ;;  %v3054_v43 = vpop.f32.mrb[30].mxu0  ;;  %v3142_v50 = vmul.f32 0.5, %v5022_v57  ;;  %v3143_v8 = vmul.f32 0.5, %v5024_v3 }
 0x734   : > { %v3128_v10 = vadd.f32 %v3112_v34, %v2924_v49  ;;  %v3096_v42 = vpop.f32.mrb[31].mxu1  ;;  %v3126_v52 = vadd.f32 %v3110_v4, %v2922_v37  ;;  %v3055_v26 = vpop.f32.mrb[31].mxu0  ;;  %v3150_v49 = vadd.f32 0.5, %v3144_v60  ;;  %v3158_v37 = vrot.slane %v6280_v19, 6 }
 0x735   : > { %v3129_v29 = vadd.f32 %v3113_v24, %v2925_v23  ;;  %v3127_v59 = vadd.f32 %v3111_v45, %v2923_v38  ;;  %v3151_v34 = vadd.f32 0.5, %v3145_v13  ;;  %v3159_v23 = vrot.slane %v6282_v9, 6 }
 0x736   : > { %5025 = vtanh.f32 %v3128_v10  ;;  %v3134_v53 = vmul.f32 0.5, %v3126_v52  ;;  %v3148_v4 = vadd.f32 0.5, %v3142_v50  ;;  %v3149_v24 = vadd.f32 0.5, %v3143_v8 }
 0x737   : > { %5027 = vtanh.f32 %v3129_v29  ;;  %v3135_v44 = vmul.f32 0.5, %v3127_v59  ;;  %v3162_v45 = vmul.f32 %v3158_v37, %v3150_v49  ;;  %v3163_v10 = vmul.f32 %v3159_v23, %v3151_v34 }
 0x738   : > { %5029 = vtanh.f32 %v3134_v53 }
 0x739   : > { %5031 = vtanh.f32 %v3135_v44 }
 0x740   : > { %v5026_v38 = vpop.eup %5025 }
 0x741   : > { %v5028_v0 = vpop.eup %5027  ;;  %v3164_v43 = vmul.f32 %v5026_v38, %v3148_v4 }
 0x742   : > { %v3165_v42 = vmul.f32 %v5028_v0, %v3149_v24  ;;  %v5030_v29 = vpop.eup %5029 }
 0x743   : > { %v6435_v52 = vadd.f32 %v3164_v43, %v3162_v45  ;;  %v5032_v59 = vpop.eup %5031  ;;  %v3146_v19 = vmul.f32 0.5, %v5030_v29 }
 0x744   : > { %v6437_v26 = vadd.f32 %v3165_v42, %v3163_v10  ;;  %v3147_v9 = vmul.f32 0.5, %v5032_v59 }
 0x745   : > { %5033 = vtanh.f32 %v6435_v52  ;;  %v3152_v1 = vadd.f32 0.5, %v3146_v19 }
 0x746   : > { %5035 = vtanh.f32 %v6437_v26  ;;  %v3153_v12 = vadd.f32 0.5, %v3147_v9 }
 0x74b   : > { %3174 = sbr.rel (%p4843_p8) target bundleno = 1876 (0x754), region = 76 }
 0x74f   : > { %v5034_v53 = vpop.eup %5033 }
 0x750   : > { %v5036_v57 = vpop.eup %5035  ;;  %v6441_v44 = vmul.f32 %v5034_v53, %v3152_v1 }
 0x751   : > { %v3171_v3 = vmul.f32 %v5036_v57, %v3153_v12 }
 0x752   : > { %3175 = vst [vmem:[#allocation2] sm:$0xc0] %v6441_v44 }
 0x753   : > { %3176 = vst [vmem:[#allocation2 + $0x8] sm:$0xc0] %v3171_v3 }
 0x754 PF: > { %3234 = vmatprep.subr.bf16.mxu1 %v5452_v14  ;;  %3193 = vmatprep.subr.bf16.mxu0 %v5463_v21  ;;  %v3186_v60 = vpack.c.bf16 %v3171_v3, %v3171_v3  ;;  %v7629_v50 = vld [vmem:[#allocation7_spill] sm:$0xff]  ;;  %v7630_v8 = vld [vmem:[#allocation8_spill] sm:$0xff]  ;;  %v7631_v49 = vld [vmem:[#allocation9_spill] sm:$0xff]  ;;  %v3185_v3 = vpack.c.bf16 %v6441_v44, %v6441_v44 }
 0x755   : > { %3235 = vmatpush1.bf16.msra.mxu1 %v5454_v15  ;;  %3194 = vmatpush1.bf16.msra.mxu0 %v5465_v22  ;;  %v7632_v37 = vld [vmem:[#allocation11_spill] sm:$0xff]  ;;  %v7633_v34 = vld [vmem:[#allocation10_spill] sm:$0xff]  ;;  %v7634_v23 = vld [vmem:[#allocation12_spill] sm:$0xff] }
 0x756   : > { %3236 = vmatprep.subr.bf16.mxu1 %v5461_v20  ;;  %3195 = vmatprep.subr.bf16.mxu0 %v5476_v28  ;;  %v6452_v13 = vrot.slane %v3186_v60, 3  ;;  %v7635_v4 = vld [vmem:[#allocation13_spill] sm:$0xff]  ;;  %v7636_v38 = vld [vmem:[#allocation15_spill] sm:$0xff]  ;;  %v7637_v24 = vld [vmem:[#allocation14_spill] sm:$0xff] }
 0x757   : > { %v7638_v0 = vld [vmem:[#allocation16_spill] sm:$0xff]  ;;  %v7639_v45 = vld [vmem:[#allocation17_spill] sm:$0xff]  ;;  %v7640_v43 = vld [vmem:[#allocation19_spill] sm:$0xff] }
 0x758   : > { %3266 = vmatprep.mubr.bf16.mxu1 %v6452_v13  ;;  %3225 = vmatprep.mubr.bf16.mxu0 %v6452_v13  ;;  %v7641_v10 = vld [vmem:[#allocation18_spill] sm:$0xff]  ;;  %v7642_v42 = vld [vmem:[#allocation20_spill] sm:$0xff]  ;;  %v7643_v29 = vld [vmem:[#allocation21_spill] sm:$0xff] }
 0x759   : > { %3237 = vmatpush1.bf16.msra.mxu1 %v5473_v27  ;;  %3196 = vmatpush1.bf16.msra.mxu0 %v5484_v33  ;;  %v7644_v59 = vld [vmem:[#allocation23_spill] sm:$0xff]  ;;  %v7645_v19 = vld [vmem:[#allocation22_spill] sm:$0xff]  ;;  %v7646_v9 = vld [vmem:[#allocation24_spill] sm:$0xff] }
 0x75a   : > { %3238 = vmatprep.subr.bf16.mxu1 %v5482_v32  ;;  %3197 = vmatprep.subr.bf16.mxu0 %v5489_v36  ;;  %v7647_v1 = vld [vmem:[#allocation25_spill] sm:$0xff]  ;;  %v7648_v12 = vld [vmem:[#allocation27_spill] sm:$0xff]  ;;  %v7649_v53 = vld [vmem:[#allocation26_spill] sm:$0xff] }
 0x75b   : > { %v7650_v57 = vld [vmem:[#allocation28_spill] sm:$0xff]  ;;  %v7651_v60 = vld [vmem:[#allocation29_spill] sm:$0xff] }
 0x75c   : > { %v7659_v44 = vld [vmem:[#allocation37_spill] sm:$0xff] }
 0x75d   : > { %3239 = vmatpush1.bf16.msra.mxu1 %v5494_v39  ;;  %3198 = vmatpush1.bf16.msra.mxu0 %v5500_v41 }
 0x75e   : > { %3240 = vmatprep.subr.bf16.mxu1 %v5498_v40  ;;  %3199 = vmatprep.subr.bf16.mxu0 %v5505_v30 }
 0x761   : > { %3241 = vmatpush1.bf16.msra.mxu1 %v5510_v46  ;;  %3200 = vmatpush1.bf16.msra.mxu0 %v5516_v48 }
 0x762   : > { %3242 = vmatprep.subr.bf16.mxu1 %v5514_v47  ;;  %3201 = vmatprep.subr.bf16.mxu0 %v5521_v51 }
 0x765   : > { %3243 = vmatpush1.bf16.msra.mxu1 %v5526_v54  ;;  %3202 = vmatpush1.bf16.msra.mxu0 %v5532_v56 }
 0x766   : > { %3244 = vmatprep.subr.bf16.mxu1 %v5530_v55  ;;  %3203 = vmatprep.subr.bf16.mxu0 %v5537_v58 }
 0x769   : > { %3245 = vmatpush1.bf16.msra.mxu1 %v5542_v61  ;;  %3204 = vmatpush1.bf16.msra.mxu0 %v5548_v63 }
 0x76a   : > { %3246 = vmatprep.subr.bf16.mxu1 %v5546_v62  ;;  %3205 = vmatprep.subr.bf16.mxu0 %v5553_v2 }
 0x76d   : > { %3247 = vmatpush1.bf16.msra.mxu1 %v5558_v5  ;;  %3206 = vmatpush1.bf16.msra.mxu0 %v5564_v7 }
 0x76e   : > { %3248 = vmatprep.subr.bf16.mxu1 %v5562_v6  ;;  %3207 = vmatprep.subr.bf16.mxu0 %v5569_v11 }
 0x771   : > { %3249 = vmatpush1.bf16.msra.mxu1 %v5574_v16  ;;  %3208 = vmatpush1.bf16.msra.mxu0 %v5580_v18 }
 0x772   : > { %3250 = vmatprep.subr.bf16.mxu1 %v5578_v17  ;;  %3209 = vmatprep.subr.bf16.mxu0 %v5585_v25 }
 0x775   : > { %3251 = vmatpush1.bf16.msra.mxu1 %v5590_v31  ;;  %3210 = vmatpush1.bf16.msra.mxu0 %v5596_v35 }
 0x776   : > { %3252 = vmatprep.subr.bf16.mxu1 %v7629_v50  ;;  %3211 = vmatprep.subr.bf16.mxu0 %v7630_v8  ;;  %v7652_v50 = vld [vmem:[#allocation31_spill] sm:$0xff]  ;;  %v7653_v8 = vld [vmem:[#allocation30_spill] sm:$0xff] }
 0x779   : > { %3253 = vmatpush1.bf16.msra.mxu1 %v7631_v49  ;;  %3212 = vmatpush1.bf16.msra.mxu0 %v7632_v37  ;;  %v7654_v49 = vld [vmem:[#allocation32_spill] sm:$0xff]  ;;  %v6514_v37 = vrot.slane %v3185_v3, 3  ;;  %v7675_v3 = vld [vmem:[#allocation53_spill] sm:$0xff] }
 0x77a   : > { %3254 = vmatprep.subr.bf16.mxu1 %v7633_v34  ;;  %3213 = vmatprep.subr.bf16.mxu0 %v7634_v23  ;;  %v7655_v34 = vld [vmem:[#allocation33_spill] sm:$0xff]  ;;  %v7656_v23 = vld [vmem:[#allocation35_spill] sm:$0xff] }
 0x77d   : > { %3255 = vmatpush1.bf16.msra.mxu1 %v7635_v4  ;;  %3214 = vmatpush1.bf16.msra.mxu0 %v7636_v38  ;;  %v7657_v4 = vld [vmem:[#allocation34_spill] sm:$0xff]  ;;  %v7658_v38 = vld [vmem:[#allocation36_spill] sm:$0xff] }
 0x77e   : > { %3256 = vmatprep.subr.bf16.mxu1 %v7637_v24  ;;  %3215 = vmatprep.subr.bf16.mxu0 %v7638_v0  ;;  %v7660_v24 = vld [vmem:[#allocation39_spill] sm:$0xff]  ;;  %v7661_v0 = vld [vmem:[#allocation38_spill] sm:$0xff] }
 0x781   : > { %3257 = vmatpush1.bf16.msra.mxu1 %v7639_v45  ;;  %3216 = vmatpush1.bf16.msra.mxu0 %v7640_v43  ;;  %v7662_v45 = vld [vmem:[#allocation40_spill] sm:$0xff]  ;;  %v7663_v43 = vld [vmem:[#allocation41_spill] sm:$0xff] }
 0x782   : > { %3258 = vmatprep.subr.bf16.mxu1 %v7641_v10  ;;  %3217 = vmatprep.subr.bf16.mxu0 %v7642_v42  ;;  %v7664_v10 = vld [vmem:[#allocation43_spill] sm:$0xff]  ;;  %v7665_v42 = vld [vmem:[#allocation42_spill] sm:$0xff] }
 0x785   : > { %3259 = vmatpush1.bf16.msra.mxu1 %v7643_v29  ;;  %3218 = vmatpush1.bf16.msra.mxu0 %v7644_v59  ;;  %v7666_v29 = vld [vmem:[#allocation44_spill] sm:$0xff]  ;;  %v7667_v59 = vld [vmem:[#allocation45_spill] sm:$0xff] }
 0x786   : > { %3260 = vmatprep.subr.bf16.mxu1 %v7645_v19  ;;  %3219 = vmatprep.subr.bf16.mxu0 %v7646_v9  ;;  %v7668_v19 = vld [vmem:[#allocation47_spill] sm:$0xff]  ;;  %v7669_v9 = vld [vmem:[#allocation46_spill] sm:$0xff] }
 0x789   : > { %3261 = vmatpush1.bf16.msra.mxu1 %v7647_v1  ;;  %3220 = vmatpush1.bf16.msra.mxu0 %v7648_v12  ;;  %v7670_v1 = vld [vmem:[#allocation48_spill] sm:$0xff]  ;;  %v7671_v12 = vld [vmem:[#allocation49_spill] sm:$0xff] }
 0x78a   : > { %3262 = vmatprep.subr.bf16.mxu1 %v7649_v53  ;;  %3221 = vmatprep.subr.bf16.mxu0 %v7650_v57  ;;  %v7672_v53 = vld [vmem:[#allocation51_spill] sm:$0xff]  ;;  %v7674_v57 = vld [vmem:[#allocation52_spill] sm:$0xff] }
 0x78d   : > { %3263 = vmatpush1.bf16.msra.mxu1 %v7651_v60  ;;  %3222 = vmatpush1.bf16.msra.mxu0 %v7652_v50  ;;  %v7676_v60 = vld [vmem:[#allocation55_spill] sm:$0xff]  ;;  %v7677_v50 = vld [vmem:[#allocation54_spill] sm:$0xff] }
 0x78e   : > { %3264 = vmatprep.subr.bf16.mxu1 %v7653_v8  ;;  %3223 = vmatprep.subr.bf16.mxu0 %v7654_v49  ;;  %v7678_v8 = vld [vmem:[#allocation56_spill] sm:$0xff]  ;;  %v7679_v49 = vld [vmem:[#allocation57_spill] sm:$0xff] }
 0x791   : > { %3265 = vmatpush1.bf16.msra.mxu1 %v7655_v34  ;;  %3224 = vmatpush1.bf16.msra.mxu0 %v7656_v23  ;;  %v7680_v34 = vld [vmem:[#allocation59_spill] sm:$0xff]  ;;  %v7681_v23 = vld [vmem:[#allocation58_spill] sm:$0xff] }
 0x792   : > { %3316 = vmatprep.subr.bf16.mxu1 %v7657_v4  ;;  %3275 = vmatprep.subr.bf16.mxu0 %v7658_v38  ;;  %v7682_v4 = vld [vmem:[#allocation60_spill] sm:$0xff]  ;;  %v7683_v38 = vld [vmem:[#allocation61_spill] sm:$0xff] }
 0x794   : > { %3267 = vmatmul.mubr.bf16.vlgmr.msra.gmra.mrb[32].mxu1 %v6514_v37  ;;  %3226 = vmatmul.mubr.bf16.vlgmr.msra.gmra.mrb[32].mxu0 %v6514_v37 }
 0x795   : > { %3317 = vmatpush1.bf16.msra.mxu1 %v7659_v44  ;;  %3276 = vmatpush1.bf16.msra.mxu0 %v7660_v24  ;;  %v7684_v44 = vld [vmem:[#allocation63_spill] sm:$0xff]  ;;  %v7685_v24 = vld [vmem:[#allocation62_spill] sm:$0xff] }
 0x796   : > { %3318 = vmatprep.subr.bf16.mxu1 %v7661_v0  ;;  %3277 = vmatprep.subr.bf16.mxu0 %v7662_v45  ;;  %v7686_v0 = vld [vmem:[#allocation64_spill] sm:$0xff]  ;;  %v7687_v45 = vld [vmem:[#allocation65_spill] sm:$0xff] }
 0x797   : > { %3348 = vmatprep.mubr.bf16.mxu1 %v6452_v13  ;;  %3307 = vmatprep.mubr.bf16.mxu0 %v6452_v13  ;;  %v7673_v13 = vld [vmem:[#allocation50_spill] sm:$0xff] }
 0x799   : > { %3319 = vmatpush1.bf16.msra.mxu1 %v7663_v43  ;;  %3278 = vmatpush1.bf16.msra.mxu0 %v7664_v10  ;;  %v7688_v43 = vld [vmem:[#allocation67_spill] sm:$0xff]  ;;  %v7689_v10 = vld [vmem:[#allocation66_spill] sm:$0xff] }
 0x79a   : > { %3320 = vmatprep.subr.bf16.mxu1 %v7665_v42  ;;  %3279 = vmatprep.subr.bf16.mxu0 %v7666_v29  ;;  %v7690_v42 = vld [vmem:[#allocation68_spill] sm:$0xff]  ;;  %v7691_v29 = vld [vmem:[#allocation69_spill] sm:$0xff] }
 0x79d   : > { %3321 = vmatpush1.bf16.msra.mxu1 %v7667_v59  ;;  %3280 = vmatpush1.bf16.msra.mxu0 %v7668_v19  ;;  %v7692_v59 = vld [vmem:[#allocation71_spill] sm:$0xff]  ;;  %v7693_v19 = vld [vmem:[#allocation70_spill] sm:$0xff] }
 0x79e   : > { %3322 = vmatprep.subr.bf16.mxu1 %v7669_v9  ;;  %3281 = vmatprep.subr.bf16.mxu0 %v7670_v1  ;;  %v7694_v9 = vld [vmem:[#allocation72_spill] sm:$0xff]  ;;  %v7695_v1 = vld [vmem:[#allocation73_spill] sm:$0xff] }
 0x7a1   : > { %3323 = vmatpush1.bf16.msra.mxu1 %v7671_v12  ;;  %3282 = vmatpush1.bf16.msra.mxu0 %v7672_v53  ;;  %v7696_v12 = vld [vmem:[#allocation75_spill] sm:$0xff]  ;;  %v7697_v53 = vld [vmem:[#allocation74_spill] sm:$0xff] }
 0x7a2   : > { %3324 = vmatprep.subr.bf16.mxu1 %v7673_v13  ;;  %3283 = vmatprep.subr.bf16.mxu0 %v7674_v57  ;;  %v7698_v13 = vld [vmem:[#allocation76_spill] sm:$0xff]  ;;  %v7699_v57 = vld [vmem:[#allocation77_spill] sm:$0xff] }
 0x7a5   : > { %3325 = vmatpush1.bf16.msra.mxu1 %v7675_v3  ;;  %3284 = vmatpush1.bf16.msra.mxu0 %v7676_v60  ;;  %v7700_v3 = vld [vmem:[#allocation79_spill] sm:$0xff]  ;;  %v7701_v60 = vld [vmem:[#allocation78_spill] sm:$0xff] }
 0x7a6   : > { %3326 = vmatprep.subr.bf16.mxu1 %v7677_v50  ;;  %3285 = vmatprep.subr.bf16.mxu0 %v7678_v8  ;;  %v7702_v50 = vld [vmem:[#allocation80_spill] sm:$0xff]  ;;  %v7703_v8 = vld [vmem:[#allocation81_spill] sm:$0xff] }
 0x7a9   : > { %3327 = vmatpush1.bf16.msra.mxu1 %v7679_v49  ;;  %3286 = vmatpush1.bf16.msra.mxu0 %v7680_v34  ;;  %v7704_v49 = vld [vmem:[#allocation83_spill] sm:$0xff]  ;;  %v7705_v34 = vld [vmem:[#allocation82_spill] sm:$0xff] }
 0x7aa   : > { %3328 = vmatprep.subr.bf16.mxu1 %v7681_v23  ;;  %3287 = vmatprep.subr.bf16.mxu0 %v7682_v4  ;;  %v7706_v23 = vld [vmem:[#allocation84_spill] sm:$0xff]  ;;  %v7707_v4 = vld [vmem:[#allocation85_spill] sm:$0xff] }
 0x7ad   : > { %3329 = vmatpush1.bf16.msra.mxu1 %v7683_v38  ;;  %3288 = vmatpush1.bf16.msra.mxu0 %v7684_v44  ;;  %v7708_v38 = vld [vmem:[#allocation87_spill] sm:$0xff]  ;;  %v7709_v44 = vld [vmem:[#allocation86_spill] sm:$0xff] }
 0x7ae   : > { %3330 = vmatprep.subr.bf16.mxu1 %v7685_v24  ;;  %3289 = vmatprep.subr.bf16.mxu0 %v7686_v0  ;;  %v7710_v24 = vld [vmem:[#allocation88_spill] sm:$0xff]  ;;  %v7711_v0 = vld [vmem:[#allocation89_spill] sm:$0xff] }
 0x7b1   : > { %3331 = vmatpush1.bf16.msra.mxu1 %v7687_v45  ;;  %3290 = vmatpush1.bf16.msra.mxu0 %v7688_v43  ;;  %v7712_v45 = vld [vmem:[#allocation91_spill] sm:$0xff]  ;;  %v7713_v43 = vld [vmem:[#allocation90_spill] sm:$0xff] }
 0x7b2   : > { %3332 = vmatprep.subr.bf16.mxu1 %v7689_v10  ;;  %3291 = vmatprep.subr.bf16.mxu0 %v7690_v42  ;;  %v7714_v10 = vld [vmem:[#allocation92_spill] sm:$0xff]  ;;  %v7715_v42 = vld [vmem:[#allocation93_spill] sm:$0xff] }
 0x7b5   : > { %3333 = vmatpush1.bf16.msra.mxu1 %v7691_v29  ;;  %3292 = vmatpush1.bf16.msra.mxu0 %v7692_v59  ;;  %v7716_v29 = vld [vmem:[#allocation95_spill] sm:$0xff]  ;;  %v7717_v59 = vld [vmem:[#allocation94_spill] sm:$0xff] }
 0x7b6   : > { %3334 = vmatprep.subr.bf16.mxu1 %v7693_v19  ;;  %3293 = vmatprep.subr.bf16.mxu0 %v7694_v9  ;;  %v7718_v19 = vld [vmem:[#allocation96_spill] sm:$0xff]  ;;  %v7719_v9 = vld [vmem:[#allocation97_spill] sm:$0xff] }
 0x7b9   : > { %3335 = vmatpush1.bf16.msra.mxu1 %v7695_v1  ;;  %3294 = vmatpush1.bf16.msra.mxu0 %v7696_v12  ;;  %v7720_v1 = vld [vmem:[#allocation98_spill] sm:$0xff] }
 0x7ba   : > { %3336 = vmatprep.subr.bf16.mxu1 %v7697_v53  ;;  %3295 = vmatprep.subr.bf16.mxu0 %v7698_v13 }
 0x7bd   : > { %3337 = vmatpush1.bf16.msra.mxu1 %v7699_v57  ;;  %3296 = vmatpush1.bf16.msra.mxu0 %v7700_v3 }
 0x7be   : > { %3338 = vmatprep.subr.bf16.mxu1 %v7701_v60  ;;  %3297 = vmatprep.subr.bf16.mxu0 %v7702_v50 }
 0x7c1   : > { %3339 = vmatpush1.bf16.msra.mxu1 %v7703_v8  ;;  %3298 = vmatpush1.bf16.msra.mxu0 %v7704_v49  ;;  %v3179_v49 = vld [vmem:[#allocation3 + $0x50] sm:$0x3] }
 0x7c2   : > { %3340 = vmatprep.subr.bf16.mxu1 %v7705_v34  ;;  %3299 = vmatprep.subr.bf16.mxu0 %v7706_v23  ;;  %v3180_v34 = vld [vmem:[#allocation3 + $0x58] sm:$0x3]  ;;  %v3177_v23 = vld [vmem:[#allocation3 + $0x40] sm:$0x3] }
 0x7c5   : > { %3341 = vmatpush1.bf16.msra.mxu1 %v7707_v4  ;;  %3300 = vmatpush1.bf16.msra.mxu0 %v7708_v38  ;;  %v3178_v38 = vld [vmem:[#allocation3 + $0x48] sm:$0x3] }
 0x7c6   : > { %3342 = vmatprep.subr.bf16.mxu1 %v7709_v44  ;;  %3301 = vmatprep.subr.bf16.mxu0 %v7710_v24 }
 0x7c9   : > { %3343 = vmatpush1.bf16.msra.mxu1 %v7711_v0  ;;  %3302 = vmatpush1.bf16.msra.mxu0 %v7712_v45 }
 0x7ca   : > { %3344 = vmatprep.subr.bf16.mxu1 %v7713_v43  ;;  %3303 = vmatprep.subr.bf16.mxu0 %v7714_v10 }
 0x7cd   : > { %3345 = vmatpush1.bf16.msra.mxu1 %v7715_v42  ;;  %3304 = vmatpush1.bf16.msra.mxu0 %v7716_v29  ;;  %v3183_v42 = vld [vmem:[#allocation3 + $0x70] sm:$0x3]  ;;  %v3181_v29 = vld [vmem:[#allocation3 + $0x60] sm:$0x3] }
 0x7ce   : > { %3346 = vmatprep.subr.bf16.mxu1 %v7717_v59  ;;  %3305 = vmatprep.subr.bf16.mxu0 %v7718_v19  ;;  %v3184_v59 = vld [vmem:[#allocation3 + $0x78] sm:$0x3]  ;;  %v3182_v19 = vld [vmem:[#allocation3 + $0x68] sm:$0x3] }
 0x7d1   : > { %3347 = vmatpush1.bf16.msra.mxu1 %v7719_v9  ;;  %3306 = vmatpush1.bf16.msra.mxu0 %v7720_v1 }
 0x7d4   : > { %3349 = vmatmul.mubr.bf16.vlgmr.msra.gmra.mrb[36].mxu1 %v6514_v37  ;;  %3308 = vmatmul.mubr.bf16.vlgmr.msra.gmra.mrb[36].mxu0 %v6514_v37 }
 0x867   : > { %v3268_v12 = vpop.f32.mrb[32].mxu1  ;;  %v3227_v53 = vpop.f32.mrb[32].mxu0 }
 0x868   : > { %v3270_v13 = vpop.f32.mrb[33].mxu1  ;;  %v3229_v57 = vpop.f32.mrb[33].mxu0  ;;  %v3359_v4 = vadd.f32 %v3268_v12, %v3179_v49  ;;  %v3357_v24 = vadd.f32 %v3227_v53, %v3177_v23 }
 0x869   : > { %v3272_v3 = vpop.f32.mrb[34].mxu1  ;;  %v3231_v60 = vpop.f32.mrb[34].mxu0  ;;  %v3360_v44 = vadd.f32 %v3270_v13, %v3180_v34  ;;  %v3358_v0 = vadd.f32 %v3229_v57, %v3178_v38 }
 0x86a   : > { %v3273_v50 = vpop.f32.mrb[35].mxu1  ;;  %v3232_v8 = vpop.f32.mrb[35].mxu0  ;;  %v3367_v45 = vmul.f32 0.5, %v3359_v4  ;;  %v3365_v10 = vmul.f32 0.5, %v3357_v24 }
 0x86b   : > { %v3368_v43 = vmul.f32 0.5, %v3360_v44  ;;  %v3366_v37 = vmul.f32 0.5, %v3358_v0 }
 0x86c   : > { %5037 = vtanh.f32 %v3367_v45 }
 0x86d   : > { %5039 = vtanh.f32 %v3368_v43 }
 0x86e   : > { %5041 = vtanh.f32 %v3365_v10 }
 0x86f   : > { %5043 = vtanh.f32 %v3366_v37 }
 0x876   : > { %v5038_v49 = vpop.eup %5037 }
 0x877   : > { %v5040_v4 = vpop.eup %5039  ;;  %v3379_v45 = vmul.f32 0.5, %v5038_v49 }
 0x878   : > { %v5042_v44 = vpop.eup %5041  ;;  %v3380_v43 = vmul.f32 0.5, %v5040_v4 }
 0x879   : > { %v5044_v0 = vpop.eup %5043  ;;  %v3377_v10 = vmul.f32 0.5, %v5042_v44 }
 0x87a   : > { %v3378_v37 = vmul.f32 0.5, %v5044_v0 }
 0x8a7   : > { %v3350_v9 = vpop.f32.mrb[36].mxu1  ;;  %v3309_v1 = vpop.f32.mrb[36].mxu0 }
 0x8a8   : > { %v3363_v3 = vadd.f32 %v3350_v9, %v3183_v42  ;;  %v3352_v12 = vpop.f32.mrb[37].mxu1  ;;  %v3361_v60 = vadd.f32 %v3309_v1, %v3181_v29  ;;  %v3311_v13 = vpop.f32.mrb[37].mxu0  ;;  %v3385_v42 = vadd.f32 0.5, %v3379_v45  ;;  %v3393_v29 = vrot.slane %v6435_v52, 6 }
 0x8a9   : > { %v3364_v53 = vadd.f32 %v3352_v12, %v3184_v59  ;;  %v3354_v57 = vpop.f32.mrb[38].mxu1  ;;  %v3362_v50 = vadd.f32 %v3311_v13, %v3182_v19  ;;  %v3313_v8 = vpop.f32.mrb[38].mxu0  ;;  %v3386_v59 = vadd.f32 0.5, %v3380_v43  ;;  %v3394_v19 = vrot.slane %v6437_v26, 6 }
 0x8aa   : > { %5045 = vtanh.f32 %v3363_v3  ;;  %v3355_v34 = vpop.f32.mrb[39].mxu1  ;;  %v3314_v23 = vpop.f32.mrb[39].mxu0  ;;  %v3369_v38 = vmul.f32 0.5, %v3361_v60  ;;  %v3383_v9 = vadd.f32 0.5, %v3377_v10  ;;  %v3384_v3 = vadd.f32 0.5, %v3378_v37 }
 0x8ab   : > { %5047 = vtanh.f32 %v3364_v53  ;;  %v3370_v24 = vmul.f32 0.5, %v3362_v50  ;;  %v3397_v60 = vmul.f32 %v3393_v29, %v3385_v42  ;;  %v3398_v53 = vmul.f32 %v3394_v19, %v3386_v59 }
 0x8ac   : > { %5049 = vtanh.f32 %v3369_v38 }
 0x8ad   : > { %5051 = vtanh.f32 %v3370_v24 }
 0x8b4   : > { %v5046_v1 = vpop.eup %5045 }
 0x8b5   : > { %v5048_v12 = vpop.eup %5047  ;;  %v3399_v13 = vmul.f32 %v5046_v1, %v3383_v9 }
 0x8b6   : > { %v3400_v57 = vmul.f32 %v5048_v12, %v3384_v3  ;;  %v5050_v49 = vpop.eup %5049 }
 0x8b7   : > { %v6590_v50 = vadd.f32 %v3399_v13, %v3397_v60  ;;  %v5052_v34 = vpop.eup %5051  ;;  %v3381_v52 = vmul.f32 0.5, %v5050_v49 }
 0x8b8   : > { %v6592_v8 = vadd.f32 %v3400_v57, %v3398_v53  ;;  %v3382_v26 = vmul.f32 0.5, %v5052_v34 }
 0x8b9   : > { %5053 = vtanh.f32 %v6590_v50  ;;  %v3387_v23 = vadd.f32 0.5, %v3381_v52 }
 0x8ba   : > { %5055 = vtanh.f32 %v6592_v8  ;;  %v3388_v4 = vadd.f32 0.5, %v3382_v26 }
 0x8bf   : > { %3409 = sbr.rel (%p4843_p8) target bundleno = 2248 (0x8c8), region = 80 }
 0x8c3   : > { %v5054_v38 = vpop.eup %5053 }
 0x8c4   : > { %v5056_v44 = vpop.eup %5055  ;;  %v6596_v24 = vmul.f32 %v5054_v38, %v3387_v23 }
 0x8c5   : > { %v3406_v0 = vmul.f32 %v5056_v44, %v3388_v4 }
 0x8c6   : > { %3410 = vst [vmem:[#allocation2 + $0x10] sm:$0x3] %v6596_v24 }
 0x8c7   : > { %3411 = vst [vmem:[#allocation2 + $0x18] sm:$0x3] %v3406_v0 }
 0x8c8 PF: > { %3463 = vmatprep.subr.bf16.mxu1 %v5452_v14  ;;  %3422 = vmatprep.subr.bf16.mxu0 %v5463_v21  ;;  %v6603_v45 = vpack.c.bf16 %v3406_v0, %v3406_v0  ;;  %v7721_v43 = vld [vmem:[#allocation7_spill] sm:$0xff]  ;;  %v7722_v10 = vld [vmem:[#allocation8_spill] sm:$0xff]  ;;  %v7723_v37 = vld [vmem:[#allocation9_spill] sm:$0xff] }
 0x8c9   : > { %3464 = vmatpush1.bf16.msra.mxu1 %v5454_v15  ;;  %3423 = vmatpush1.bf16.msra.mxu0 %v5465_v22  ;;  %v7724_v42 = vld [vmem:[#allocation11_spill] sm:$0xff]  ;;  %v7725_v29 = vld [vmem:[#allocation10_spill] sm:$0xff]  ;;  %v7726_v59 = vld [vmem:[#allocation12_spill] sm:$0xff] }
 0x8ca   : > { %3465 = vmatprep.subr.bf16.mxu1 %v5461_v20  ;;  %3424 = vmatprep.subr.bf16.mxu0 %v5476_v28  ;;  %v7727_v19 = vld [vmem:[#allocation13_spill] sm:$0xff]  ;;  %v7728_v9 = vld [vmem:[#allocation15_spill] sm:$0xff]  ;;  %v7729_v1 = vld [vmem:[#allocation14_spill] sm:$0xff] }
 0x8cb   : > { %3495 = vmatprep.mubr.bf16.mxu1 %v6603_v45  ;;  %3454 = vmatprep.mubr.bf16.mxu0 %v6603_v45  ;;  %v7730_v3 = vld [vmem:[#allocation16_spill] sm:$0xff]  ;;  %v7731_v12 = vld [vmem:[#allocation17_spill] sm:$0xff]  ;;  %v7732_v60 = vld [vmem:[#allocation19_spill] sm:$0xff] }
 0x8cc   : > { %v7733_v13 = vld [vmem:[#allocation18_spill] sm:$0xff]  ;;  %v7734_v53 = vld [vmem:[#allocation20_spill] sm:$0xff]  ;;  %v7735_v57 = vld [vmem:[#allocation21_spill] sm:$0xff] }
 0x8cd   : > { %3466 = vmatpush1.bf16.msra.mxu1 %v5473_v27  ;;  %3425 = vmatpush1.bf16.msra.mxu0 %v5484_v33  ;;  %v7736_v49 = vld [vmem:[#allocation23_spill] sm:$0xff]  ;;  %v7737_v34 = vld [vmem:[#allocation22_spill] sm:$0xff]  ;;  %v7738_v52 = vld [vmem:[#allocation24_spill] sm:$0xff] }
 0x8ce   : > { %3467 = vmatprep.subr.bf16.mxu1 %v5482_v32  ;;  %3426 = vmatprep.subr.bf16.mxu0 %v5489_v36  ;;  %v7739_v26 = vld [vmem:[#allocation25_spill] sm:$0xff]  ;;  %v7740_v23 = vld [vmem:[#allocation27_spill] sm:$0xff]  ;;  %v7741_v4 = vld [vmem:[#allocation26_spill] sm:$0xff] }
 0x8cf   : > { %v7742_v38 = vld [vmem:[#allocation28_spill] sm:$0xff]  ;;  %v7743_v44 = vld [vmem:[#allocation29_spill] sm:$0xff]  ;;  %v7744_v0 = vld [vmem:[#allocation31_spill] sm:$0xff] }
 0x8d1   : > { %3468 = vmatpush1.bf16.msra.mxu1 %v5494_v39  ;;  %3427 = vmatpush1.bf16.msra.mxu0 %v5500_v41 }
 0x8d2   : > { %3469 = vmatprep.subr.bf16.mxu1 %v5498_v40  ;;  %3428 = vmatprep.subr.bf16.mxu0 %v5505_v30 }
 0x8d5   : > { %3470 = vmatpush1.bf16.msra.mxu1 %v5510_v46  ;;  %3429 = vmatpush1.bf16.msra.mxu0 %v5516_v48 }
 0x8d6   : > { %3471 = vmatprep.subr.bf16.mxu1 %v5514_v47  ;;  %3430 = vmatprep.subr.bf16.mxu0 %v5521_v51 }
 0x8d9   : > { %3472 = vmatpush1.bf16.msra.mxu1 %v5526_v54  ;;  %3431 = vmatpush1.bf16.msra.mxu0 %v5532_v56 }
 0x8da   : > { %3473 = vmatprep.subr.bf16.mxu1 %v5530_v55  ;;  %3432 = vmatprep.subr.bf16.mxu0 %v5537_v58 }
 0x8dd   : > { %3474 = vmatpush1.bf16.msra.mxu1 %v5542_v61  ;;  %3433 = vmatpush1.bf16.msra.mxu0 %v5548_v63 }
 0x8de   : > { %3475 = vmatprep.subr.bf16.mxu1 %v5546_v62  ;;  %3434 = vmatprep.subr.bf16.mxu0 %v5553_v2 }
 0x8e1   : > { %3476 = vmatpush1.bf16.msra.mxu1 %v5558_v5  ;;  %3435 = vmatpush1.bf16.msra.mxu0 %v5564_v7 }
 0x8e2   : > { %3477 = vmatprep.subr.bf16.mxu1 %v5562_v6  ;;  %3436 = vmatprep.subr.bf16.mxu0 %v5569_v11 }
 0x8e5   : > { %3478 = vmatpush1.bf16.msra.mxu1 %v5574_v16  ;;  %3437 = vmatpush1.bf16.msra.mxu0 %v5580_v18 }
 0x8e6   : > { %3479 = vmatprep.subr.bf16.mxu1 %v5578_v17  ;;  %3438 = vmatprep.subr.bf16.mxu0 %v5585_v25 }
 0x8e9   : > { %3480 = vmatpush1.bf16.msra.mxu1 %v5590_v31  ;;  %3439 = vmatpush1.bf16.msra.mxu0 %v5596_v35 }
 0x8ea   : > { %3481 = vmatprep.subr.bf16.mxu1 %v7721_v43  ;;  %3440 = vmatprep.subr.bf16.mxu0 %v7722_v10  ;;  %v7745_v43 = vld [vmem:[#allocation30_spill] sm:$0xff]  ;;  %v7746_v10 = vld [vmem:[#allocation32_spill] sm:$0xff] }
 0x8ed   : > { %3482 = vmatpush1.bf16.msra.mxu1 %v7723_v37  ;;  %3441 = vmatpush1.bf16.msra.mxu0 %v7724_v42  ;;  %v6669_v37 = vpack.c.bf16 %v6596_v24, %v6596_v24  ;;  %v7747_v42 = vld [vmem:[#allocation33_spill] sm:$0xff]  ;;  %v7754_v24 = vld [vmem:[#allocation40_spill] sm:$0xff] }
 0x8ee   : > { %3483 = vmatprep.subr.bf16.mxu1 %v7725_v29  ;;  %3442 = vmatprep.subr.bf16.mxu0 %v7726_v59  ;;  %v7748_v29 = vld [vmem:[#allocation35_spill] sm:$0xff]  ;;  %v7749_v59 = vld [vmem:[#allocation34_spill] sm:$0xff] }
 0x8f1   : > { %3484 = vmatpush1.bf16.msra.mxu1 %v7727_v19  ;;  %3443 = vmatpush1.bf16.msra.mxu0 %v7728_v9  ;;  %v7750_v19 = vld [vmem:[#allocation36_spill] sm:$0xff]  ;;  %v7751_v9 = vld [vmem:[#allocation37_spill] sm:$0xff] }
 0x8f2   : > { %3485 = vmatprep.subr.bf16.mxu1 %v7729_v1  ;;  %3444 = vmatprep.subr.bf16.mxu0 %v7730_v3  ;;  %v7752_v1 = vld [vmem:[#allocation39_spill] sm:$0xff]  ;;  %v7753_v3 = vld [vmem:[#allocation38_spill] sm:$0xff] }
 0x8f5   : > { %3486 = vmatpush1.bf16.msra.mxu1 %v7731_v12  ;;  %3445 = vmatpush1.bf16.msra.mxu0 %v7732_v60  ;;  %v7755_v12 = vld [vmem:[#allocation41_spill] sm:$0xff]  ;;  %v7756_v60 = vld [vmem:[#allocation43_spill] sm:$0xff] }
 0x8f6   : > { %3487 = vmatprep.subr.bf16.mxu1 %v7733_v13  ;;  %3446 = vmatprep.subr.bf16.mxu0 %v7734_v53  ;;  %v7757_v13 = vld [vmem:[#allocation42_spill] sm:$0xff]  ;;  %v7758_v53 = vld [vmem:[#allocation44_spill] sm:$0xff] }
 0x8f9   : > { %3488 = vmatpush1.bf16.msra.mxu1 %v7735_v57  ;;  %3447 = vmatpush1.bf16.msra.mxu0 %v7736_v49  ;;  %v7759_v57 = vld [vmem:[#allocation45_spill] sm:$0xff]  ;;  %v7760_v49 = vld [vmem:[#allocation47_spill] sm:$0xff] }
 0x8fa   : > { %3489 = vmatprep.subr.bf16.mxu1 %v7737_v34  ;;  %3448 = vmatprep.subr.bf16.mxu0 %v7738_v52  ;;  %v7761_v34 = vld [vmem:[#allocation46_spill] sm:$0xff]  ;;  %v7762_v52 = vld [vmem:[#allocation48_spill] sm:$0xff] }
 0x8fd   : > { %3490 = vmatpush1.bf16.msra.mxu1 %v7739_v26  ;;  %3449 = vmatpush1.bf16.msra.mxu0 %v7740_v23  ;;  %v7763_v26 = vld [vmem:[#allocation49_spill] sm:$0xff]  ;;  %v7764_v23 = vld [vmem:[#allocation51_spill] sm:$0xff] }
 0x8fe   : > { %3491 = vmatprep.subr.bf16.mxu1 %v7741_v4  ;;  %3450 = vmatprep.subr.bf16.mxu0 %v7742_v38  ;;  %v7766_v4 = vld [vmem:[#allocation52_spill] sm:$0xff]  ;;  %v7767_v38 = vld [vmem:[#allocation53_spill] sm:$0xff] }
 0x901   : > { %3492 = vmatpush1.bf16.msra.mxu1 %v7743_v44  ;;  %3451 = vmatpush1.bf16.msra.mxu0 %v7744_v0  ;;  %v7768_v44 = vld [vmem:[#allocation55_spill] sm:$0xff]  ;;  %v7769_v0 = vld [vmem:[#allocation54_spill] sm:$0xff] }
 0x902   : > { %3493 = vmatprep.subr.bf16.mxu1 %v7745_v43  ;;  %3452 = vmatprep.subr.bf16.mxu0 %v7746_v10  ;;  %v7770_v43 = vld [vmem:[#allocation56_spill] sm:$0xff]  ;;  %v7771_v10 = vld [vmem:[#allocation57_spill] sm:$0xff] }
 0x905   : > { %3494 = vmatpush1.bf16.msra.mxu1 %v7747_v42  ;;  %3453 = vmatpush1.bf16.msra.mxu0 %v7748_v29  ;;  %v7772_v42 = vld [vmem:[#allocation59_spill] sm:$0xff]  ;;  %v7773_v29 = vld [vmem:[#allocation58_spill] sm:$0xff] }
 0x906   : > { %3545 = vmatprep.subr.bf16.mxu1 %v7749_v59  ;;  %3504 = vmatprep.subr.bf16.mxu0 %v7750_v19  ;;  %v7774_v59 = vld [vmem:[#allocation60_spill] sm:$0xff]  ;;  %v7775_v19 = vld [vmem:[#allocation61_spill] sm:$0xff] }
 0x908   : > { %3496 = vmatmul.mubr.bf16.vlgmr.msra.gmra.mrb[40].mxu1 %v6669_v37  ;;  %3455 = vmatmul.mubr.bf16.vlgmr.msra.gmra.mrb[40].mxu0 %v6669_v37 }
 0x909   : > { %3546 = vmatpush1.bf16.msra.mxu1 %v7751_v9  ;;  %3505 = vmatpush1.bf16.msra.mxu0 %v7752_v1  ;;  %v7776_v9 = vld [vmem:[#allocation63_spill] sm:$0xff]  ;;  %v7777_v1 = vld [vmem:[#allocation62_spill] sm:$0xff] }
 0x90a   : > { %3547 = vmatprep.subr.bf16.mxu1 %v7753_v3  ;;  %3506 = vmatprep.subr.bf16.mxu0 %v7754_v24  ;;  %v7778_v3 = vld [vmem:[#allocation64_spill] sm:$0xff]  ;;  %v7779_v24 = vld [vmem:[#allocation65_spill] sm:$0xff] }
 0x90b   : > { %3577 = vmatprep.mubr.bf16.mxu1 %v6603_v45  ;;  %3536 = vmatprep.mubr.bf16.mxu0 %v6603_v45  ;;  %v7765_v45 = vld [vmem:[#allocation50_spill] sm:$0xff] }
 0x90d   : > { %3548 = vmatpush1.bf16.msra.mxu1 %v7755_v12  ;;  %3507 = vmatpush1.bf16.msra.mxu0 %v7756_v60  ;;  %v7780_v12 = vld [vmem:[#allocation67_spill] sm:$0xff]  ;;  %v7781_v60 = vld [vmem:[#allocation66_spill] sm:$0xff] }
 0x90e   : > { %3549 = vmatprep.subr.bf16.mxu1 %v7757_v13  ;;  %3508 = vmatprep.subr.bf16.mxu0 %v7758_v53  ;;  %v7782_v13 = vld [vmem:[#allocation68_spill] sm:$0xff]  ;;  %v7783_v53 = vld [vmem:[#allocation69_spill] sm:$0xff] }
 0x911   : > { %3550 = vmatpush1.bf16.msra.mxu1 %v7759_v57  ;;  %3509 = vmatpush1.bf16.msra.mxu0 %v7760_v49  ;;  %v7784_v57 = vld [vmem:[#allocation71_spill] sm:$0xff]  ;;  %v7785_v49 = vld [vmem:[#allocation70_spill] sm:$0xff] }
 0x912   : > { %3551 = vmatprep.subr.bf16.mxu1 %v7761_v34  ;;  %3510 = vmatprep.subr.bf16.mxu0 %v7762_v52  ;;  %v7786_v34 = vld [vmem:[#allocation72_spill] sm:$0xff]  ;;  %v7787_v52 = vld [vmem:[#allocation73_spill] sm:$0xff] }
 0x915   : > { %3552 = vmatpush1.bf16.msra.mxu1 %v7763_v26  ;;  %3511 = vmatpush1.bf16.msra.mxu0 %v7764_v23  ;;  %v7788_v26 = vld [vmem:[#allocation75_spill] sm:$0xff]  ;;  %v7789_v23 = vld [vmem:[#allocation74_spill] sm:$0xff] }
 0x916   : > { %3553 = vmatprep.subr.bf16.mxu1 %v7765_v45  ;;  %3512 = vmatprep.subr.bf16.mxu0 %v7766_v4  ;;  %v7790_v45 = vld [vmem:[#allocation76_spill] sm:$0xff]  ;;  %v7791_v4 = vld [vmem:[#allocation77_spill] sm:$0xff] }
 0x919   : > { %3554 = vmatpush1.bf16.msra.mxu1 %v7767_v38  ;;  %3513 = vmatpush1.bf16.msra.mxu0 %v7768_v44  ;;  %v7792_v38 = vld [vmem:[#allocation79_spill] sm:$0xff]  ;;  %v7793_v44 = vld [vmem:[#allocation78_spill] sm:$0xff] }
 0x91a   : > { %3555 = vmatprep.subr.bf16.mxu1 %v7769_v0  ;;  %3514 = vmatprep.subr.bf16.mxu0 %v7770_v43  ;;  %v7794_v0 = vld [vmem:[#allocation80_spill] sm:$0xff]  ;;  %v7795_v43 = vld [vmem:[#allocation81_spill] sm:$0xff] }
 0x91d   : > { %3556 = vmatpush1.bf16.msra.mxu1 %v7771_v10  ;;  %3515 = vmatpush1.bf16.msra.mxu0 %v7772_v42  ;;  %v7796_v10 = vld [vmem:[#allocation83_spill] sm:$0xff]  ;;  %v7797_v42 = vld [vmem:[#allocation82_spill] sm:$0xff] }
 0x91e   : > { %3557 = vmatprep.subr.bf16.mxu1 %v7773_v29  ;;  %3516 = vmatprep.subr.bf16.mxu0 %v7774_v59  ;;  %v7798_v29 = vld [vmem:[#allocation84_spill] sm:$0xff]  ;;  %v7799_v59 = vld [vmem:[#allocation85_spill] sm:$0xff] }
 0x921   : > { %3558 = vmatpush1.bf16.msra.mxu1 %v7775_v19  ;;  %3517 = vmatpush1.bf16.msra.mxu0 %v7776_v9  ;;  %v7800_v19 = vld [vmem:[#allocation87_spill] sm:$0xff]  ;;  %v7801_v9 = vld [vmem:[#allocation86_spill] sm:$0xff] }
 0x922   : > { %3559 = vmatprep.subr.bf16.mxu1 %v7777_v1  ;;  %3518 = vmatprep.subr.bf16.mxu0 %v7778_v3  ;;  %v7802_v1 = vld [vmem:[#allocation88_spill] sm:$0xff]  ;;  %v7803_v3 = vld [vmem:[#allocation89_spill] sm:$0xff] }
 0x925   : > { %3560 = vmatpush1.bf16.msra.mxu1 %v7779_v24  ;;  %3519 = vmatpush1.bf16.msra.mxu0 %v7780_v12  ;;  %v7804_v24 = vld [vmem:[#allocation91_spill] sm:$0xff]  ;;  %v7805_v12 = vld [vmem:[#allocation90_spill] sm:$0xff] }
 0x926   : > { %3561 = vmatprep.subr.bf16.mxu1 %v7781_v60  ;;  %3520 = vmatprep.subr.bf16.mxu0 %v7782_v13  ;;  %v7806_v60 = vld [vmem:[#allocation92_spill] sm:$0xff]  ;;  %v7807_v13 = vld [vmem:[#allocation93_spill] sm:$0xff] }
 0x929   : > { %3562 = vmatpush1.bf16.msra.mxu1 %v7783_v53  ;;  %3521 = vmatpush1.bf16.msra.mxu0 %v7784_v57  ;;  %v7808_v53 = vld [vmem:[#allocation95_spill] sm:$0xff]  ;;  %v7809_v57 = vld [vmem:[#allocation94_spill] sm:$0xff] }
 0x92a   : > { %3563 = vmatprep.subr.bf16.mxu1 %v7785_v49  ;;  %3522 = vmatprep.subr.bf16.mxu0 %v7786_v34  ;;  %v7810_v49 = vld [vmem:[#allocation96_spill] sm:$0xff]  ;;  %v7811_v34 = vld [vmem:[#allocation97_spill] sm:$0xff] }
 0x92d   : > { %3564 = vmatpush1.bf16.msra.mxu1 %v7787_v52  ;;  %3523 = vmatpush1.bf16.msra.mxu0 %v7788_v26  ;;  %v7812_v52 = vld [vmem:[#allocation98_spill] sm:$0xff] }
 0x92e   : > { %3565 = vmatprep.subr.bf16.mxu1 %v7789_v23  ;;  %3524 = vmatprep.subr.bf16.mxu0 %v7790_v45 }
 0x931   : > { %3566 = vmatpush1.bf16.msra.mxu1 %v7791_v4  ;;  %3525 = vmatpush1.bf16.msra.mxu0 %v7792_v38 }
 0x932   : > { %3567 = vmatprep.subr.bf16.mxu1 %v7793_v44  ;;  %3526 = vmatprep.subr.bf16.mxu0 %v7794_v0 }
 0x935   : > { %3568 = vmatpush1.bf16.msra.mxu1 %v7795_v43  ;;  %3527 = vmatpush1.bf16.msra.mxu0 %v7796_v10 }
 0x936   : > { %3569 = vmatprep.subr.bf16.mxu1 %v7797_v42  ;;  %3528 = vmatprep.subr.bf16.mxu0 %v7798_v29  ;;  %v3414_v42 = vld [vmem:[#allocation3 + $0x50] sm:$0xc] }
 0x939   : > { %3570 = vmatpush1.bf16.msra.mxu1 %v7799_v59  ;;  %3529 = vmatpush1.bf16.msra.mxu0 %v7800_v19  ;;  %v3415_v59 = vld [vmem:[#allocation3 + $0x58] sm:$0xc] }
 0x93a   : > { %3571 = vmatprep.subr.bf16.mxu1 %v7801_v9  ;;  %3530 = vmatprep.subr.bf16.mxu0 %v7802_v1  ;;  %v3412_v9 = vld [vmem:[#allocation3 + $0x40] sm:$0xc] }
 0x93d   : > { %3572 = vmatpush1.bf16.msra.mxu1 %v7803_v3  ;;  %3531 = vmatpush1.bf16.msra.mxu0 %v7804_v24  ;;  %v3413_v24 = vld [vmem:[#allocation3 + $0x48] sm:$0xc] }
 0x93e   : > { %3573 = vmatprep.subr.bf16.mxu1 %v7805_v12  ;;  %3532 = vmatprep.subr.bf16.mxu0 %v7806_v60 }
 0x941   : > { %3574 = vmatpush1.bf16.msra.mxu1 %v7807_v13  ;;  %3533 = vmatpush1.bf16.msra.mxu0 %v7808_v53 }
 0x942   : > { %3575 = vmatprep.subr.bf16.mxu1 %v7809_v57  ;;  %3534 = vmatprep.subr.bf16.mxu0 %v7810_v49 }
 0x945   : > { %3576 = vmatpush1.bf16.msra.mxu1 %v7811_v34  ;;  %3535 = vmatpush1.bf16.msra.mxu0 %v7812_v52  ;;  %v3418_v34 = vld [vmem:[#allocation3 + $0x70] sm:$0xc] }
 0x948   : > { %3578 = vmatmul.mubr.bf16.vlgmr.msra.gmra.mrb[44].mxu1 %v6669_v37  ;;  %3537 = vmatmul.mubr.bf16.vlgmr.msra.gmra.mrb[44].mxu0 %v6669_v37 }
 0x9db   : > { %v3497_v26 = vpop.f32.mrb[40].mxu1  ;;  %v3456_v23 = vpop.f32.mrb[40].mxu0 }
 0x9dc   : > { %v3499_v45 = vpop.f32.mrb[41].mxu1  ;;  %v3458_v4 = vpop.f32.mrb[41].mxu0  ;;  %v3596_v10 = vrot.slane %v3497_v26, 6  ;;  %v3594_v19 = vrot.slane %v3456_v23, 6  ;;  %v3419_v26 = vld [vmem:[#allocation3 + $0x78] sm:$0xc] }
 0x9dd   : > { %v3501_v38 = vpop.f32.mrb[42].mxu1  ;;  %v3460_v44 = vpop.f32.mrb[42].mxu0  ;;  %v3597_v29 = vrot.slane %v3499_v45, 6  ;;  %v3595_v1 = vrot.slane %v3458_v4, 6  ;;  %v3416_v45 = vld [vmem:[#allocation3 + $0x60] sm:$0xc] }
 0x9de   : > { %v3502_v0 = vpop.f32.mrb[43].mxu1  ;;  %v3461_v43 = vpop.f32.mrb[43].mxu0  ;;  %v3612_v3 = vadd.f32 %v3596_v10, %v3414_v42  ;;  %v3610_v60 = vadd.f32 %v3594_v19, %v3412_v9 }
 0x9df   : > { %v3613_v12 = vadd.f32 %v3597_v29, %v3415_v59  ;;  %v3611_v37 = vadd.f32 %v3595_v1, %v3413_v24  ;;  %v3417_v0 = vld [vmem:[#allocation3 + $0x68] sm:$0xc] }
 0x9e0   : > { %v3620_v13 = vmul.f32 0.5, %v3612_v3  ;;  %v3618_v57 = vmul.f32 0.5, %v3610_v60 }
 0x9e1   : > { %v3621_v53 = vmul.f32 0.5, %v3613_v12  ;;  %v3619_v49 = vmul.f32 0.5, %v3611_v37 }
 0x9e2   : > { %5057 = vtanh.f32 %v3620_v13 }
 0x9e3   : > { %5059 = vtanh.f32 %v3621_v53 }
 0x9e4   : > { %5061 = vtanh.f32 %v3618_v57 }
 0x9e5   : > { %5063 = vtanh.f32 %v3619_v49 }
 0x9ec   : > { %v5058_v60 = vpop.eup %5057 }
 0x9ed   : > { %v5060_v37 = vpop.eup %5059 }
 0x9ee   : > { %v5062_v53 = vpop.eup %5061 }
 0x9ef   : > { %v5064_v49 = vpop.eup %5063 }
 0xa1b   : > { %v3579_v52 = vpop.f32.mrb[44].mxu1  ;;  %v3538_v23 = vpop.f32.mrb[44].mxu0 }
 0xa1c   : > { %v3600_v38 = vrot.slane %v3579_v52, 6  ;;  %v3581_v4 = vpop.f32.mrb[45].mxu1  ;;  %v3598_v44 = vrot.slane %v3538_v23, 6  ;;  %v3540_v43 = vpop.f32.mrb[45].mxu0  ;;  %v3632_v52 = vmul.f32 0.5, %v5058_v60  ;;  %v3633_v23 = vmul.f32 0.5, %v5060_v37 }
 0xa1d   : > { %v3601_v10 = vrot.slane %v3581_v4, 6  ;;  %v3583_v42 = vpop.f32.mrb[46].mxu1  ;;  %v3599_v29 = vrot.slane %v3540_v43, 6  ;;  %v3542_v59 = vpop.f32.mrb[46].mxu0  ;;  %v3630_v4 = vmul.f32 0.5, %v5062_v53  ;;  %v3631_v43 = vmul.f32 0.5, %v5064_v49 }
 0xa1e   : > { %v3616_v19 = vadd.f32 %v3600_v38, %v3418_v34  ;;  %v3584_v9 = vpop.f32.mrb[47].mxu1  ;;  %v3614_v1 = vadd.f32 %v3598_v44, %v3416_v45  ;;  %v3543_v3 = vpop.f32.mrb[47].mxu0  ;;  %v3638_v34 = vadd.f32 0.5, %v3632_v52  ;;  %v3646_v45 = vrot.slane %v6590_v50, 6 }
 0xa1f   : > { %v3617_v24 = vadd.f32 %v3601_v10, %v3419_v26  ;;  %v3615_v12 = vadd.f32 %v3599_v29, %v3417_v0  ;;  %v3639_v38 = vadd.f32 0.5, %v3633_v23  ;;  %v3647_v26 = vrot.slane %v6592_v8, 6 }
 0xa20   : > { %5065 = vtanh.f32 %v3616_v19  ;;  %v3622_v13 = vmul.f32 0.5, %v3614_v1  ;;  %v3636_v44 = vadd.f32 0.5, %v3630_v4  ;;  %v3637_v10 = vadd.f32 0.5, %v3631_v43 }
 0xa21   : > { %5067 = vtanh.f32 %v3617_v24  ;;  %v3623_v57 = vmul.f32 0.5, %v3615_v12  ;;  %v3650_v29 = vmul.f32 %v3646_v45, %v3638_v34  ;;  %v3651_v19 = vmul.f32 %v3647_v26, %v3639_v38 }
 0xa22   : > { %5069 = vtanh.f32 %v3622_v13 }
 0xa23   : > { %5071 = vtanh.f32 %v3623_v57 }
 0xa2a   : > { %v5066_v0 = vpop.eup %5065 }
 0xa2b   : > { %v5068_v42 = vpop.eup %5067  ;;  %v3652_v59 = vmul.f32 %v5066_v0, %v3636_v44 }
 0xa2c   : > { %v3653_v9 = vmul.f32 %v5068_v42, %v3637_v10  ;;  %v5070_v24 = vpop.eup %5069 }
 0xa2d   : > { %v6745_v1 = vadd.f32 %v3652_v59, %v3650_v29  ;;  %v5072_v12 = vpop.eup %5071  ;;  %v3634_v50 = vmul.f32 0.5, %v5070_v24 }
 0xa2e   : > { %v6747_v3 = vadd.f32 %v3653_v9, %v3651_v19  ;;  %v3635_v8 = vmul.f32 0.5, %v5072_v12 }
 0xa2f   : > { %5073 = vtanh.f32 %v6745_v1  ;;  %v3640_v60 = vadd.f32 0.5, %v3634_v50 }
 0xa30   : > { %5075 = vtanh.f32 %v6747_v3  ;;  %v3641_v37 = vadd.f32 0.5, %v3635_v8 }
 0xa35   : > { %3662 = sbr.rel (%p4843_p8) target bundleno = 2622 (0xa3e), region = 84 }
 0xa39   : > { %v5074_v13 = vpop.eup %5073 }
 0xa3a   : > { %v5076_v53 = vpop.eup %5075  ;;  %v6751_v57 = vmul.f32 %v5074_v13, %v3640_v60 }
 0xa3b   : > { %v3659_v49 = vmul.f32 %v5076_v53, %v3641_v37 }
 0xa3c   : > { %3663 = vst [vmem:[#allocation2 + $0x10] sm:$0xc] %v6751_v57 }
 0xa3d   : > { %3664 = vst [vmem:[#allocation2 + $0x18] sm:$0xc] %v3659_v49 }
 0xa3e PF: > { %3722 = vmatprep.subr.bf16.mxu1 %v5452_v14  ;;  %3681 = vmatprep.subr.bf16.mxu0 %v5463_v21  ;;  %v3674_v52 = vpack.c.bf16 %v3659_v49, %v3659_v49  ;;  %v7813_v4 = vld [vmem:[#allocation7_spill] sm:$0xff]  ;;  %v7814_v43 = vld [vmem:[#allocation8_spill] sm:$0xff]  ;;  %v7815_v34 = vld [vmem:[#allocation9_spill] sm:$0xff]  ;;  %v3673_v49 = vpack.c.bf16 %v6751_v57, %v6751_v57 }
 0xa3f   : > { %3723 = vmatpush1.bf16.msra.mxu1 %v5454_v15  ;;  %3682 = vmatpush1.bf16.msra.mxu0 %v5465_v22  ;;  %v7816_v45 = vld [vmem:[#allocation11_spill] sm:$0xff]  ;;  %v7817_v38 = vld [vmem:[#allocation10_spill] sm:$0xff]  ;;  %v7818_v26 = vld [vmem:[#allocation12_spill] sm:$0xff] }
 0xa40   : > { %3724 = vmatprep.subr.bf16.mxu1 %v5461_v20  ;;  %3683 = vmatprep.subr.bf16.mxu0 %v5476_v28  ;;  %v6762_v23 = vrot.slane %v3674_v52, 1  ;;  %v7819_v44 = vld [vmem:[#allocation13_spill] sm:$0xff]  ;;  %v7820_v0 = vld [vmem:[#allocation15_spill] sm:$0xff]  ;;  %v7821_v10 = vld [vmem:[#allocation14_spill] sm:$0xff] }
 0xa41   : > { %v7822_v42 = vld [vmem:[#allocation16_spill] sm:$0xff]  ;;  %v7823_v29 = vld [vmem:[#allocation17_spill] sm:$0xff]  ;;  %v7824_v59 = vld [vmem:[#allocation19_spill] sm:$0xff] }
 0xa42   : > { %3754 = vmatprep.mubr.bf16.mxu1 %v6762_v23  ;;  %3713 = vmatprep.mubr.bf16.mxu0 %v6762_v23  ;;  %v7825_v19 = vld [vmem:[#allocation18_spill] sm:$0xff]  ;;  %v7826_v9 = vld [vmem:[#allocation20_spill] sm:$0xff]  ;;  %v7827_v24 = vld [vmem:[#allocation21_spill] sm:$0xff] }
 0xa43   : > { %3725 = vmatpush1.bf16.msra.mxu1 %v5473_v27  ;;  %3684 = vmatpush1.bf16.msra.mxu0 %v5484_v33  ;;  %v7828_v12 = vld [vmem:[#allocation23_spill] sm:$0xff]  ;;  %v7829_v50 = vld [vmem:[#allocation22_spill] sm:$0xff]  ;;  %v7830_v8 = vld [vmem:[#allocation24_spill] sm:$0xff] }
 0xa44   : > { %3726 = vmatprep.subr.bf16.mxu1 %v5482_v32  ;;  %3685 = vmatprep.subr.bf16.mxu0 %v5489_v36  ;;  %v7831_v60 = vld [vmem:[#allocation25_spill] sm:$0xff]  ;;  %v7832_v37 = vld [vmem:[#allocation27_spill] sm:$0xff]  ;;  %v7833_v13 = vld [vmem:[#allocation26_spill] sm:$0xff] }
 0xa45   : > { %v7834_v53 = vld [vmem:[#allocation28_spill] sm:$0xff]  ;;  %v7835_v52 = vld [vmem:[#allocation29_spill] sm:$0xff] }
 0xa46   : > { %v7843_v57 = vld [vmem:[#allocation37_spill] sm:$0xff] }
 0xa47   : > { %3727 = vmatpush1.bf16.msra.mxu1 %v5494_v39  ;;  %3686 = vmatpush1.bf16.msra.mxu0 %v5500_v41 }
 0xa48   : > { %3728 = vmatprep.subr.bf16.mxu1 %v5498_v40  ;;  %3687 = vmatprep.subr.bf16.mxu0 %v5505_v30 }
 0xa4b   : > { %3729 = vmatpush1.bf16.msra.mxu1 %v5510_v46  ;;  %3688 = vmatpush1.bf16.msra.mxu0 %v5516_v48 }
 0xa4c   : > { %3730 = vmatprep.subr.bf16.mxu1 %v5514_v47  ;;  %3689 = vmatprep.subr.bf16.mxu0 %v5521_v51 }
 0xa4f   : > { %3731 = vmatpush1.bf16.msra.mxu1 %v5526_v54  ;;  %3690 = vmatpush1.bf16.msra.mxu0 %v5532_v56 }
 0xa50   : > { %3732 = vmatprep.subr.bf16.mxu1 %v5530_v55  ;;  %3691 = vmatprep.subr.bf16.mxu0 %v5537_v58 }
 0xa53   : > { %3733 = vmatpush1.bf16.msra.mxu1 %v5542_v61  ;;  %3692 = vmatpush1.bf16.msra.mxu0 %v5548_v63 }
 0xa54   : > { %3734 = vmatprep.subr.bf16.mxu1 %v5546_v62  ;;  %3693 = vmatprep.subr.bf16.mxu0 %v5553_v2 }
 0xa57   : > { %3735 = vmatpush1.bf16.msra.mxu1 %v5558_v5  ;;  %3694 = vmatpush1.bf16.msra.mxu0 %v5564_v7 }
 0xa58   : > { %3736 = vmatprep.subr.bf16.mxu1 %v5562_v6  ;;  %3695 = vmatprep.subr.bf16.mxu0 %v5569_v11 }
 0xa5b   : > { %3737 = vmatpush1.bf16.msra.mxu1 %v5574_v16  ;;  %3696 = vmatpush1.bf16.msra.mxu0 %v5580_v18 }
 0xa5c   : > { %3738 = vmatprep.subr.bf16.mxu1 %v5578_v17  ;;  %3697 = vmatprep.subr.bf16.mxu0 %v5585_v25 }
 0xa5f   : > { %3739 = vmatpush1.bf16.msra.mxu1 %v5590_v31  ;;  %3698 = vmatpush1.bf16.msra.mxu0 %v5596_v35 }
 0xa60   : > { %3740 = vmatprep.subr.bf16.mxu1 %v7813_v4  ;;  %3699 = vmatprep.subr.bf16.mxu0 %v7814_v43  ;;  %v7836_v4 = vld [vmem:[#allocation31_spill] sm:$0xff]  ;;  %v7837_v43 = vld [vmem:[#allocation30_spill] sm:$0xff] }
 0xa63   : > { %3741 = vmatpush1.bf16.msra.mxu1 %v7815_v34  ;;  %3700 = vmatpush1.bf16.msra.mxu0 %v7816_v45  ;;  %v7838_v34 = vld [vmem:[#allocation32_spill] sm:$0xff]  ;;  %v6824_v45 = vrot.slane %v3673_v49, 1  ;;  %v7859_v49 = vld [vmem:[#allocation53_spill] sm:$0xff] }
 0xa64   : > { %3742 = vmatprep.subr.bf16.mxu1 %v7817_v38  ;;  %3701 = vmatprep.subr.bf16.mxu0 %v7818_v26  ;;  %v7839_v38 = vld [vmem:[#allocation33_spill] sm:$0xff]  ;;  %v7840_v26 = vld [vmem:[#allocation35_spill] sm:$0xff] }
 0xa67   : > { %3743 = vmatpush1.bf16.msra.mxu1 %v7819_v44  ;;  %3702 = vmatpush1.bf16.msra.mxu0 %v7820_v0  ;;  %v7841_v44 = vld [vmem:[#allocation34_spill] sm:$0xff]  ;;  %v7842_v0 = vld [vmem:[#allocation36_spill] sm:$0xff] }
 0xa68   : > { %3744 = vmatprep.subr.bf16.mxu1 %v7821_v10  ;;  %3703 = vmatprep.subr.bf16.mxu0 %v7822_v42  ;;  %v7844_v10 = vld [vmem:[#allocation39_spill] sm:$0xff]  ;;  %v7845_v42 = vld [vmem:[#allocation38_spill] sm:$0xff] }
 0xa6b   : > { %3745 = vmatpush1.bf16.msra.mxu1 %v7823_v29  ;;  %3704 = vmatpush1.bf16.msra.mxu0 %v7824_v59  ;;  %v7846_v29 = vld [vmem:[#allocation40_spill] sm:$0xff]  ;;  %v7847_v59 = vld [vmem:[#allocation41_spill] sm:$0xff] }
 0xa6c   : > { %3746 = vmatprep.subr.bf16.mxu1 %v7825_v19  ;;  %3705 = vmatprep.subr.bf16.mxu0 %v7826_v9  ;;  %v7848_v19 = vld [vmem:[#allocation43_spill] sm:$0xff]  ;;  %v7849_v9 = vld [vmem:[#allocation42_spill] sm:$0xff] }
 0xa6f   : > { %3747 = vmatpush1.bf16.msra.mxu1 %v7827_v24  ;;  %3706 = vmatpush1.bf16.msra.mxu0 %v7828_v12  ;;  %v7850_v24 = vld [vmem:[#allocation44_spill] sm:$0xff]  ;;  %v7851_v12 = vld [vmem:[#allocation45_spill] sm:$0xff] }
 0xa70   : > { %3748 = vmatprep.subr.bf16.mxu1 %v7829_v50  ;;  %3707 = vmatprep.subr.bf16.mxu0 %v7830_v8  ;;  %v7852_v50 = vld [vmem:[#allocation47_spill] sm:$0xff]  ;;  %v7853_v8 = vld [vmem:[#allocation46_spill] sm:$0xff] }
 0xa73   : > { %3749 = vmatpush1.bf16.msra.mxu1 %v7831_v60  ;;  %3708 = vmatpush1.bf16.msra.mxu0 %v7832_v37  ;;  %v7854_v60 = vld [vmem:[#allocation48_spill] sm:$0xff]  ;;  %v7855_v37 = vld [vmem:[#allocation49_spill] sm:$0xff] }
 0xa74   : > { %3750 = vmatprep.subr.bf16.mxu1 %v7833_v13  ;;  %3709 = vmatprep.subr.bf16.mxu0 %v7834_v53  ;;  %v7856_v13 = vld [vmem:[#allocation51_spill] sm:$0xff]  ;;  %v7858_v53 = vld [vmem:[#allocation52_spill] sm:$0xff] }
 0xa77   : > { %3751 = vmatpush1.bf16.msra.mxu1 %v7835_v52  ;;  %3710 = vmatpush1.bf16.msra.mxu0 %v7836_v4  ;;  %v7860_v52 = vld [vmem:[#allocation55_spill] sm:$0xff]  ;;  %v7861_v4 = vld [vmem:[#allocation54_spill] sm:$0xff] }
 0xa78   : > { %3752 = vmatprep.subr.bf16.mxu1 %v7837_v43  ;;  %3711 = vmatprep.subr.bf16.mxu0 %v7838_v34  ;;  %v7862_v43 = vld [vmem:[#allocation56_spill] sm:$0xff]  ;;  %v7863_v34 = vld [vmem:[#allocation57_spill] sm:$0xff] }
 0xa7b   : > { %3753 = vmatpush1.bf16.msra.mxu1 %v7839_v38  ;;  %3712 = vmatpush1.bf16.msra.mxu0 %v7840_v26  ;;  %v7864_v38 = vld [vmem:[#allocation59_spill] sm:$0xff]  ;;  %v7865_v26 = vld [vmem:[#allocation58_spill] sm:$0xff] }
 0xa7c   : > { %3804 = vmatprep.subr.bf16.mxu1 %v7841_v44  ;;  %3763 = vmatprep.subr.bf16.mxu0 %v7842_v0  ;;  %v7866_v44 = vld [vmem:[#allocation60_spill] sm:$0xff]  ;;  %v7867_v0 = vld [vmem:[#allocation61_spill] sm:$0xff] }
 0xa7e   : > { %3755 = vmatmul.mubr.bf16.vlgmr.msra.gmra.mrb[48].mxu1 %v6824_v45  ;;  %3714 = vmatmul.mubr.bf16.vlgmr.msra.gmra.mrb[48].mxu0 %v6824_v45 }
 0xa7f   : > { %3805 = vmatpush1.bf16.msra.mxu1 %v7843_v57  ;;  %3764 = vmatpush1.bf16.msra.mxu0 %v7844_v10  ;;  %v7868_v57 = vld [vmem:[#allocation63_spill] sm:$0xff]  ;;  %v7869_v10 = vld [vmem:[#allocation62_spill] sm:$0xff] }
 0xa80   : > { %3806 = vmatprep.subr.bf16.mxu1 %v7845_v42  ;;  %3765 = vmatprep.subr.bf16.mxu0 %v7846_v29  ;;  %v7870_v42 = vld [vmem:[#allocation64_spill] sm:$0xff]  ;;  %v7871_v29 = vld [vmem:[#allocation65_spill] sm:$0xff] }
 0xa81   : > { %3836 = vmatprep.mubr.bf16.mxu1 %v6762_v23  ;;  %3795 = vmatprep.mubr.bf16.mxu0 %v6762_v23  ;;  %v7857_v23 = vld [vmem:[#allocation50_spill] sm:$0xff] }
 0xa83   : > { %3807 = vmatpush1.bf16.msra.mxu1 %v7847_v59  ;;  %3766 = vmatpush1.bf16.msra.mxu0 %v7848_v19  ;;  %v7872_v59 = vld [vmem:[#allocation67_spill] sm:$0xff]  ;;  %v7873_v19 = vld [vmem:[#allocation66_spill] sm:$0xff] }
 0xa84   : > { %3808 = vmatprep.subr.bf16.mxu1 %v7849_v9  ;;  %3767 = vmatprep.subr.bf16.mxu0 %v7850_v24  ;;  %v7874_v9 = vld [vmem:[#allocation68_spill] sm:$0xff]  ;;  %v7875_v24 = vld [vmem:[#allocation69_spill] sm:$0xff] }
 0xa87   : > { %3809 = vmatpush1.bf16.msra.mxu1 %v7851_v12  ;;  %3768 = vmatpush1.bf16.msra.mxu0 %v7852_v50  ;;  %v7876_v12 = vld [vmem:[#allocation71_spill] sm:$0xff]  ;;  %v7877_v50 = vld [vmem:[#allocation70_spill] sm:$0xff] }
 0xa88   : > { %3810 = vmatprep.subr.bf16.mxu1 %v7853_v8  ;;  %3769 = vmatprep.subr.bf16.mxu0 %v7854_v60  ;;  %v7878_v8 = vld [vmem:[#allocation72_spill] sm:$0xff]  ;;  %v7879_v60 = vld [vmem:[#allocation73_spill] sm:$0xff] }
 0xa8b   : > { %3811 = vmatpush1.bf16.msra.mxu1 %v7855_v37  ;;  %3770 = vmatpush1.bf16.msra.mxu0 %v7856_v13  ;;  %v7880_v37 = vld [vmem:[#allocation75_spill] sm:$0xff]  ;;  %v7881_v13 = vld [vmem:[#allocation74_spill] sm:$0xff] }
 0xa8c   : > { %3812 = vmatprep.subr.bf16.mxu1 %v7857_v23  ;;  %3771 = vmatprep.subr.bf16.mxu0 %v7858_v53  ;;  %v7882_v23 = vld [vmem:[#allocation76_spill] sm:$0xff]  ;;  %v7883_v53 = vld [vmem:[#allocation77_spill] sm:$0xff] }
 0xa8f   : > { %3813 = vmatpush1.bf16.msra.mxu1 %v7859_v49  ;;  %3772 = vmatpush1.bf16.msra.mxu0 %v7860_v52  ;;  %v7884_v49 = vld [vmem:[#allocation79_spill] sm:$0xff]  ;;  %v7885_v52 = vld [vmem:[#allocation78_spill] sm:$0xff] }
 0xa90   : > { %3814 = vmatprep.subr.bf16.mxu1 %v7861_v4  ;;  %3773 = vmatprep.subr.bf16.mxu0 %v7862_v43  ;;  %v7886_v4 = vld [vmem:[#allocation80_spill] sm:$0xff]  ;;  %v7887_v43 = vld [vmem:[#allocation81_spill] sm:$0xff] }
 0xa93   : > { %3815 = vmatpush1.bf16.msra.mxu1 %v7863_v34  ;;  %3774 = vmatpush1.bf16.msra.mxu0 %v7864_v38  ;;  %v7888_v34 = vld [vmem:[#allocation83_spill] sm:$0xff]  ;;  %v7889_v38 = vld [vmem:[#allocation82_spill] sm:$0xff] }
 0xa94   : > { %3816 = vmatprep.subr.bf16.mxu1 %v7865_v26  ;;  %3775 = vmatprep.subr.bf16.mxu0 %v7866_v44  ;;  %v7890_v26 = vld [vmem:[#allocation84_spill] sm:$0xff]  ;;  %v7891_v44 = vld [vmem:[#allocation85_spill] sm:$0xff] }
 0xa97   : > { %3817 = vmatpush1.bf16.msra.mxu1 %v7867_v0  ;;  %3776 = vmatpush1.bf16.msra.mxu0 %v7868_v57  ;;  %v7892_v0 = vld [vmem:[#allocation87_spill] sm:$0xff]  ;;  %v7893_v57 = vld [vmem:[#allocation86_spill] sm:$0xff] }
 0xa98   : > { %3818 = vmatprep.subr.bf16.mxu1 %v7869_v10  ;;  %3777 = vmatprep.subr.bf16.mxu0 %v7870_v42  ;;  %v7894_v10 = vld [vmem:[#allocation88_spill] sm:$0xff]  ;;  %v7895_v42 = vld [vmem:[#allocation89_spill] sm:$0xff] }
 0xa9b   : > { %3819 = vmatpush1.bf16.msra.mxu1 %v7871_v29  ;;  %3778 = vmatpush1.bf16.msra.mxu0 %v7872_v59  ;;  %v7896_v29 = vld [vmem:[#allocation91_spill] sm:$0xff]  ;;  %v7897_v59 = vld [vmem:[#allocation90_spill] sm:$0xff] }
 0xa9c   : > { %3820 = vmatprep.subr.bf16.mxu1 %v7873_v19  ;;  %3779 = vmatprep.subr.bf16.mxu0 %v7874_v9  ;;  %v7898_v19 = vld [vmem:[#allocation92_spill] sm:$0xff]  ;;  %v7899_v9 = vld [vmem:[#allocation93_spill] sm:$0xff] }
 0xa9f   : > { %3821 = vmatpush1.bf16.msra.mxu1 %v7875_v24  ;;  %3780 = vmatpush1.bf16.msra.mxu0 %v7876_v12  ;;  %v7900_v24 = vld [vmem:[#allocation95_spill] sm:$0xff]  ;;  %v7901_v12 = vld [vmem:[#allocation94_spill] sm:$0xff] }
 0xaa0   : > { %3822 = vmatprep.subr.bf16.mxu1 %v7877_v50  ;;  %3781 = vmatprep.subr.bf16.mxu0 %v7878_v8  ;;  %v7902_v50 = vld [vmem:[#allocation96_spill] sm:$0xff]  ;;  %v7903_v8 = vld [vmem:[#allocation97_spill] sm:$0xff] }
 0xaa3   : > { %3823 = vmatpush1.bf16.msra.mxu1 %v7879_v60  ;;  %3782 = vmatpush1.bf16.msra.mxu0 %v7880_v37  ;;  %v7904_v60 = vld [vmem:[#allocation98_spill] sm:$0xff] }
 0xaa4   : > { %3824 = vmatprep.subr.bf16.mxu1 %v7881_v13  ;;  %3783 = vmatprep.subr.bf16.mxu0 %v7882_v23 }
 0xaa7   : > { %3825 = vmatpush1.bf16.msra.mxu1 %v7883_v53  ;;  %3784 = vmatpush1.bf16.msra.mxu0 %v7884_v49 }
 0xaa8   : > { %3826 = vmatprep.subr.bf16.mxu1 %v7885_v52  ;;  %3785 = vmatprep.subr.bf16.mxu0 %v7886_v4 }
 0xaab   : > { %3827 = vmatpush1.bf16.msra.mxu1 %v7887_v43  ;;  %3786 = vmatpush1.bf16.msra.mxu0 %v7888_v34 }
 0xaac   : > { %3828 = vmatprep.subr.bf16.mxu1 %v7889_v38  ;;  %3787 = vmatprep.subr.bf16.mxu0 %v7890_v26  ;;  %v3667_v38 = vld [vmem:[#allocation3 + $0x50] sm:$0x30] }
 0xaaf   : > { %3829 = vmatpush1.bf16.msra.mxu1 %v7891_v44  ;;  %3788 = vmatpush1.bf16.msra.mxu0 %v7892_v0  ;;  %v3668_v44 = vld [vmem:[#allocation3 + $0x58] sm:$0x30] }
 0xab0   : > { %3830 = vmatprep.subr.bf16.mxu1 %v7893_v57  ;;  %3789 = vmatprep.subr.bf16.mxu0 %v7894_v10  ;;  %v3665_v57 = vld [vmem:[#allocation3 + $0x40] sm:$0x30] }
 0xab3   : > { %3831 = vmatpush1.bf16.msra.mxu1 %v7895_v42  ;;  %3790 = vmatpush1.bf16.msra.mxu0 %v7896_v29  ;;  %v3666_v29 = vld [vmem:[#allocation3 + $0x48] sm:$0x30] }
 0xab4   : > { %3832 = vmatprep.subr.bf16.mxu1 %v7897_v59  ;;  %3791 = vmatprep.subr.bf16.mxu0 %v7898_v19 }
 0xab7   : > { %3833 = vmatpush1.bf16.msra.mxu1 %v7899_v9  ;;  %3792 = vmatpush1.bf16.msra.mxu0 %v7900_v24 }
 0xab8   : > { %3834 = vmatprep.subr.bf16.mxu1 %v7901_v12  ;;  %3793 = vmatprep.subr.bf16.mxu0 %v7902_v50 }
 0xabb   : > { %3835 = vmatpush1.bf16.msra.mxu1 %v7903_v8  ;;  %3794 = vmatpush1.bf16.msra.mxu0 %v7904_v60  ;;  %v3671_v8 = vld [vmem:[#allocation3 + $0x70] sm:$0x30] }
 0xabe   : > { %3837 = vmatmul.mubr.bf16.vlgmr.msra.gmra.mrb[52].mxu1 %v6824_v45  ;;  %3796 = vmatmul.mubr.bf16.vlgmr.msra.gmra.mrb[52].mxu0 %v6824_v45 }
 0xb51   : > { %v3756_v37 = vpop.f32.mrb[48].mxu1  ;;  %v3715_v13 = vpop.f32.mrb[48].mxu0 }
 0xb52   : > { %v3758_v23 = vpop.f32.mrb[49].mxu1  ;;  %v3717_v53 = vpop.f32.mrb[49].mxu0  ;;  %v3855_v34 = vrot.slane %v3756_v37, 4  ;;  %v3853_v0 = vrot.slane %v3715_v13, 4  ;;  %v3672_v37 = vld [vmem:[#allocation3 + $0x78] sm:$0x30] }
 0xb53   : > { %v3760_v49 = vpop.f32.mrb[50].mxu1  ;;  %v3719_v52 = vpop.f32.mrb[50].mxu0  ;;  %v3856_v26 = vrot.slane %v3758_v23, 4  ;;  %v3854_v10 = vrot.slane %v3717_v53, 4  ;;  %v3669_v23 = vld [vmem:[#allocation3 + $0x60] sm:$0x30] }
 0xb54   : > { %v3761_v4 = vpop.f32.mrb[51].mxu1  ;;  %v3720_v43 = vpop.f32.mrb[51].mxu0  ;;  %v3871_v42 = vadd.f32 %v3855_v34, %v3667_v38  ;;  %v3869_v19 = vadd.f32 %v3853_v0, %v3665_v57 }
 0xb55   : > { %v3872_v59 = vadd.f32 %v3856_v26, %v3668_v44  ;;  %v3870_v45 = vadd.f32 %v3854_v10, %v3666_v29  ;;  %v3670_v4 = vld [vmem:[#allocation3 + $0x68] sm:$0x30] }
 0xb56   : > { %v3879_v9 = vmul.f32 0.5, %v3871_v42  ;;  %v3877_v12 = vmul.f32 0.5, %v3869_v19 }
 0xb57   : > { %v3880_v24 = vmul.f32 0.5, %v3872_v59  ;;  %v3878_v50 = vmul.f32 0.5, %v3870_v45 }
 0xb58   : > { %5077 = vtanh.f32 %v3879_v9 }
 0xb59   : > { %5079 = vtanh.f32 %v3880_v24 }
 0xb5a   : > { %5081 = vtanh.f32 %v3877_v12 }
 0xb5b   : > { %5083 = vtanh.f32 %v3878_v50 }
 0xb62   : > { %v5078_v19 = vpop.eup %5077 }
 0xb63   : > { %v5080_v45 = vpop.eup %5079 }
 0xb64   : > { %v5082_v24 = vpop.eup %5081 }
 0xb65   : > { %v5084_v50 = vpop.eup %5083 }
 0xb91   : > { %v3838_v60 = vpop.f32.mrb[52].mxu1  ;;  %v3797_v13 = vpop.f32.mrb[52].mxu0 }
 0xb92   : > { %v3859_v49 = vrot.slane %v3838_v60, 4  ;;  %v3840_v53 = vpop.f32.mrb[53].mxu1  ;;  %v3857_v52 = vrot.slane %v3797_v13, 4  ;;  %v3799_v43 = vpop.f32.mrb[53].mxu0  ;;  %v3891_v60 = vmul.f32 0.5, %v5078_v19  ;;  %v3892_v13 = vmul.f32 0.5, %v5080_v45 }
 0xb93   : > { %v3860_v34 = vrot.slane %v3840_v53, 4  ;;  %v3842_v38 = vpop.f32.mrb[54].mxu1  ;;  %v3858_v26 = vrot.slane %v3799_v43, 4  ;;  %v3801_v44 = vpop.f32.mrb[54].mxu0  ;;  %v3889_v53 = vmul.f32 0.5, %v5082_v24  ;;  %v3890_v43 = vmul.f32 0.5, %v5084_v50 }
 0xb94   : > { %v3875_v0 = vadd.f32 %v3859_v49, %v3671_v8  ;;  %v3843_v57 = vpop.f32.mrb[55].mxu1  ;;  %v3873_v10 = vadd.f32 %v3857_v52, %v3669_v23  ;;  %v3802_v42 = vpop.f32.mrb[55].mxu0  ;;  %v3897_v8 = vadd.f32 0.5, %v3891_v60  ;;  %v3905_v23 = vrot.slane %v6745_v1, 6 }
 0xb95   : > { %v3876_v29 = vadd.f32 %v3860_v34, %v3672_v37  ;;  %v3874_v59 = vadd.f32 %v3858_v26, %v3670_v4  ;;  %v3898_v49 = vadd.f32 0.5, %v3892_v13  ;;  %v3906_v37 = vrot.slane %v6747_v3, 6 }
 0xb96   : > { %5085 = vtanh.f32 %v3875_v0  ;;  %v3881_v9 = vmul.f32 0.5, %v3873_v10  ;;  %v3895_v52 = vadd.f32 0.5, %v3889_v53  ;;  %v3896_v34 = vadd.f32 0.5, %v3890_v43 }
 0xb97   : > { %5087 = vtanh.f32 %v3876_v29  ;;  %v3882_v12 = vmul.f32 0.5, %v3874_v59  ;;  %v3909_v26 = vmul.f32 %v3905_v23, %v3897_v8  ;;  %v3910_v0 = vmul.f32 %v3906_v37, %v3898_v49 }
 0xb98   : > { %5089 = vtanh.f32 %v3881_v9 }
 0xb99   : > { %5091 = vtanh.f32 %v3882_v12 }
 0xba0   : > { %v5086_v4 = vpop.eup %5085 }
 0xba1   : > { %v5088_v38 = vpop.eup %5087  ;;  %v3911_v44 = vmul.f32 %v5086_v4, %v3895_v52 }
 0xba2   : > { %v3912_v57 = vmul.f32 %v5088_v38, %v3896_v34  ;;  %v5090_v29 = vpop.eup %5089 }
 0xba3   : > { %v6900_v10 = vadd.f32 %v3911_v44, %v3909_v26  ;;  %v5092_v59 = vpop.eup %5091  ;;  %v3893_v1 = vmul.f32 0.5, %v5090_v29 }
 0xba4   : > { %v6902_v42 = vadd.f32 %v3912_v57, %v3910_v0  ;;  %v3894_v3 = vmul.f32 0.5, %v5092_v59 }
 0xba5   : > { %5093 = vtanh.f32 %v6900_v10  ;;  %v3899_v19 = vadd.f32 0.5, %v3893_v1 }
 0xba6   : > { %5095 = vtanh.f32 %v6902_v42  ;;  %v3900_v45 = vadd.f32 0.5, %v3894_v3 }
 0xbab   : > { %3921 = sbr.rel (%p4843_p8) target bundleno = 2996 (0xbb4), region = 88 }
 0xbaf   : > { %v5094_v9 = vpop.eup %5093 }
 0xbb0   : > { %v5096_v24 = vpop.eup %5095  ;;  %v6906_v12 = vmul.f32 %v5094_v9, %v3899_v19 }
 0xbb1   : > { %v3918_v50 = vmul.f32 %v5096_v24, %v3900_v45 }
 0xbb2   : > { %3922 = vst [vmem:[#allocation2 + $0x10] sm:$0x30] %v6906_v12 }
 0xbb3   : > { %3923 = vst [vmem:[#allocation2 + $0x18] sm:$0x30] %v3918_v50 }
 0xbb4 PF: > { %3981 = vmatprep.subr.bf16.mxu1 %v5452_v14  ;;  %3940 = vmatprep.subr.bf16.mxu0 %v5463_v21  ;;  %v3933_v60 = vpack.c.bf16 %v3918_v50, %v3918_v50  ;;  %v7905_v14 = vld [vmem:[#allocation7_spill] sm:$0xff]  ;;  %v7939_v53 = vld [vmem:[#allocation41_spill] sm:$0xff]  ;;  %v7941_v8 = vld [vmem:[#allocation42_spill] sm:$0xff] }
 0xbb5   : > { %3982 = vmatpush1.bf16.msra.mxu1 %v5454_v15  ;;  %3941 = vmatpush1.bf16.msra.mxu0 %v5465_v22  ;;  %v7906_v15 = vld [vmem:[#allocation8_spill] sm:$0xff]  ;;  %v7908_v21 = vld [vmem:[#allocation11_spill] sm:$0xff]  ;;  %v7909_v22 = vld [vmem:[#allocation10_spill] sm:$0xff] }
 0xbb6   : > { %3983 = vmatprep.subr.bf16.mxu1 %v5461_v20  ;;  %3942 = vmatprep.subr.bf16.mxu0 %v5476_v28  ;;  %v6917_v13 = vrot.slane %v3933_v60, 2  ;;  %v7907_v20 = vld [vmem:[#allocation9_spill] sm:$0xff]  ;;  %v7940_v43 = vld [vmem:[#allocation43_spill] sm:$0xff]  ;;  %v7942_v23 = vld [vmem:[#allocation44_spill] sm:$0xff] }
 0xbb7   : > { %v7911_v28 = vld [vmem:[#allocation13_spill] sm:$0xff]  ;;  %v7944_v37 = vld [vmem:[#allocation47_spill] sm:$0xff]  ;;  %v7945_v52 = vld [vmem:[#allocation46_spill] sm:$0xff] }
 0xbb8   : > { %4013 = vmatprep.mubr.bf16.mxu1 %v6917_v13  ;;  %3972 = vmatprep.mubr.bf16.mxu0 %v6917_v13  ;;  %v7943_v49 = vld [vmem:[#allocation45_spill] sm:$0xff]  ;;  %v7946_v4 = vld [vmem:[#allocation48_spill] sm:$0xff]  ;;  %v7948_v38 = vld [vmem:[#allocation51_spill] sm:$0xff] }
 0xbb9   : > { %3984 = vmatpush1.bf16.msra.mxu1 %v5473_v27  ;;  %3943 = vmatpush1.bf16.msra.mxu0 %v5484_v33  ;;  %v7910_v27 = vld [vmem:[#allocation12_spill] sm:$0xff]  ;;  %v7913_v33 = vld [vmem:[#allocation14_spill] sm:$0xff]  ;;  %v7947_v34 = vld [vmem:[#allocation49_spill] sm:$0xff] }
 0xbba   : > { %3985 = vmatprep.subr.bf16.mxu1 %v5482_v32  ;;  %3944 = vmatprep.subr.bf16.mxu0 %v5489_v36  ;;  %v7912_v32 = vld [vmem:[#allocation15_spill] sm:$0xff]  ;;  %v7914_v36 = vld [vmem:[#allocation16_spill] sm:$0xff]  ;;  %v7949_v26 = vld [vmem:[#allocation50_spill] sm:$0xff] }
 0xbbb   : > { %v7950_v44 = vld [vmem:[#allocation52_spill] sm:$0xff]  ;;  %v7951_v0 = vld [vmem:[#allocation53_spill] sm:$0xff]  ;;  %v7952_v57 = vld [vmem:[#allocation55_spill] sm:$0xff] }
 0xbbc   : > { %v7953_v29 = vld [vmem:[#allocation54_spill] sm:$0xff]  ;;  %v7954_v59 = vld [vmem:[#allocation56_spill] sm:$0xff]  ;;  %v7955_v1 = vld [vmem:[#allocation57_spill] sm:$0xff] }
 0xbbd   : > { %3986 = vmatpush1.bf16.msra.mxu1 %v5494_v39  ;;  %3945 = vmatpush1.bf16.msra.mxu0 %v5500_v41  ;;  %v7915_v39 = vld [vmem:[#allocation17_spill] sm:$0xff]  ;;  %v7917_v41 = vld [vmem:[#allocation18_spill] sm:$0xff]  ;;  %v7956_v3 = vld [vmem:[#allocation59_spill] sm:$0xff] }
 0xbbe   : > { %3987 = vmatprep.subr.bf16.mxu1 %v5498_v40  ;;  %3946 = vmatprep.subr.bf16.mxu0 %v5505_v30  ;;  %v7916_v40 = vld [vmem:[#allocation19_spill] sm:$0xff]  ;;  %v7918_v30 = vld [vmem:[#allocation20_spill] sm:$0xff]  ;;  %v7957_v19 = vld [vmem:[#allocation58_spill] sm:$0xff] }
 0xbbf   : > { %v7958_v45 = vld [vmem:[#allocation60_spill] sm:$0xff]  ;;  %v7959_v9 = vld [vmem:[#allocation61_spill] sm:$0xff]  ;;  %v7960_v24 = vld [vmem:[#allocation63_spill] sm:$0xff] }
 0xbc0   : > { %v7962_v50 = vld [vmem:[#allocation64_spill] sm:$0xff]  ;;  %v7963_v60 = vld [vmem:[#allocation65_spill] sm:$0xff] }
 0xbc1   : > { %3988 = vmatpush1.bf16.msra.mxu1 %v5510_v46  ;;  %3947 = vmatpush1.bf16.msra.mxu0 %v5516_v48  ;;  %v7919_v46 = vld [vmem:[#allocation21_spill] sm:$0xff]  ;;  %v7921_v48 = vld [vmem:[#allocation22_spill] sm:$0xff] }
 0xbc2   : > { %3989 = vmatprep.subr.bf16.mxu1 %v5514_v47  ;;  %3948 = vmatprep.subr.bf16.mxu0 %v5521_v51  ;;  %v7920_v47 = vld [vmem:[#allocation23_spill] sm:$0xff]  ;;  %v7922_v51 = vld [vmem:[#allocation24_spill] sm:$0xff] }
 0xbc5   : > { %3990 = vmatpush1.bf16.msra.mxu1 %v5526_v54  ;;  %3949 = vmatpush1.bf16.msra.mxu0 %v5532_v56  ;;  %v7923_v54 = vld [vmem:[#allocation25_spill] sm:$0xff]  ;;  %v7925_v56 = vld [vmem:[#allocation26_spill] sm:$0xff] }
 0xbc6   : > { %3991 = vmatprep.subr.bf16.mxu1 %v5530_v55  ;;  %3950 = vmatprep.subr.bf16.mxu0 %v5537_v58  ;;  %v7924_v55 = vld [vmem:[#allocation27_spill] sm:$0xff]  ;;  %v7926_v58 = vld [vmem:[#allocation28_spill] sm:$0xff] }
 0xbc9   : > { %3992 = vmatpush1.bf16.msra.mxu1 %v5542_v61  ;;  %3951 = vmatpush1.bf16.msra.mxu0 %v5548_v63  ;;  %v3932_v61 = vpack.c.bf16 %v6906_v12, %v6906_v12  ;;  %v7928_v63 = vld [vmem:[#allocation31_spill] sm:$0xff]  ;;  %v7961_v12 = vld [vmem:[#allocation62_spill] sm:$0xff] }
 0xbca   : > { %3993 = vmatprep.subr.bf16.mxu1 %v5546_v62  ;;  %3952 = vmatprep.subr.bf16.mxu0 %v5553_v2  ;;  %v7927_v62 = vld [vmem:[#allocation29_spill] sm:$0xff]  ;;  %v7929_v2 = vld [vmem:[#allocation30_spill] sm:$0xff] }
 0xbcd   : > { %3994 = vmatpush1.bf16.msra.mxu1 %v5558_v5  ;;  %3953 = vmatpush1.bf16.msra.mxu0 %v5564_v7  ;;  %v7930_v5 = vld [vmem:[#allocation32_spill] sm:$0xff]  ;;  %v7931_v7 = vld [vmem:[#allocation33_spill] sm:$0xff] }
 0xbce   : > { %3995 = vmatprep.subr.bf16.mxu1 %v5562_v6  ;;  %3954 = vmatprep.subr.bf16.mxu0 %v5569_v11  ;;  %v6979_v6 = vrot.slane %v3932_v61, 2  ;;  %v7932_v11 = vld [vmem:[#allocation35_spill] sm:$0xff]  ;;  %v7987_v61 = vld [vmem:[#allocation89_spill] sm:$0xff] }
 0xbd1   : > { %3996 = vmatpush1.bf16.msra.mxu1 %v5574_v16  ;;  %3955 = vmatpush1.bf16.msra.mxu0 %v5580_v18  ;;  %v7933_v16 = vld [vmem:[#allocation34_spill] sm:$0xff]  ;;  %v7935_v18 = vld [vmem:[#allocation37_spill] sm:$0xff] }
 0xbd2   : > { %3997 = vmatprep.subr.bf16.mxu1 %v5578_v17  ;;  %3956 = vmatprep.subr.bf16.mxu0 %v5585_v25  ;;  %v7934_v17 = vld [vmem:[#allocation36_spill] sm:$0xff]  ;;  %v7936_v25 = vld [vmem:[#allocation39_spill] sm:$0xff] }
 0xbd5   : > { %3998 = vmatpush1.bf16.msra.mxu1 %v5590_v31  ;;  %3957 = vmatpush1.bf16.msra.mxu0 %v5596_v35  ;;  %v7937_v31 = vld [vmem:[#allocation38_spill] sm:$0xff]  ;;  %v7938_v35 = vld [vmem:[#allocation40_spill] sm:$0xff] }
 0xbd6   : > { %3999 = vmatprep.subr.bf16.mxu1 %v7905_v14  ;;  %3958 = vmatprep.subr.bf16.mxu0 %v7906_v15  ;;  %v7965_v14 = vld [vmem:[#allocation66_spill] sm:$0xff]  ;;  %v7966_v15 = vld [vmem:[#allocation68_spill] sm:$0xff] }
 0xbd9   : > { %4000 = vmatpush1.bf16.msra.mxu1 %v7907_v20  ;;  %3959 = vmatpush1.bf16.msra.mxu0 %v7908_v21  ;;  %v7967_v20 = vld [vmem:[#allocation69_spill] sm:$0xff]  ;;  %v7968_v21 = vld [vmem:[#allocation71_spill] sm:$0xff] }
 0xbda   : > { %4001 = vmatprep.subr.bf16.mxu1 %v7909_v22  ;;  %3960 = vmatprep.subr.bf16.mxu0 %v7910_v27  ;;  %v7969_v22 = vld [vmem:[#allocation70_spill] sm:$0xff]  ;;  %v7970_v27 = vld [vmem:[#allocation72_spill] sm:$0xff] }
 0xbdd   : > { %4002 = vmatpush1.bf16.msra.mxu1 %v7911_v28  ;;  %3961 = vmatpush1.bf16.msra.mxu0 %v7912_v32  ;;  %v7971_v28 = vld [vmem:[#allocation73_spill] sm:$0xff]  ;;  %v7972_v32 = vld [vmem:[#allocation75_spill] sm:$0xff] }
 0xbde   : > { %4003 = vmatprep.subr.bf16.mxu1 %v7913_v33  ;;  %3962 = vmatprep.subr.bf16.mxu0 %v7914_v36  ;;  %v7973_v33 = vld [vmem:[#allocation74_spill] sm:$0xff]  ;;  %v7974_v36 = vld [vmem:[#allocation76_spill] sm:$0xff] }
 0xbe1   : > { %4004 = vmatpush1.bf16.msra.mxu1 %v7915_v39  ;;  %3963 = vmatpush1.bf16.msra.mxu0 %v7916_v40  ;;  %v7975_v39 = vld [vmem:[#allocation77_spill] sm:$0xff]  ;;  %v7976_v40 = vld [vmem:[#allocation79_spill] sm:$0xff] }
 0xbe2   : > { %4005 = vmatprep.subr.bf16.mxu1 %v7917_v41  ;;  %3964 = vmatprep.subr.bf16.mxu0 %v7918_v30  ;;  %v7977_v41 = vld [vmem:[#allocation78_spill] sm:$0xff]  ;;  %v7978_v30 = vld [vmem:[#allocation80_spill] sm:$0xff] }
 0xbe5   : > { %4006 = vmatpush1.bf16.msra.mxu1 %v7919_v46  ;;  %3965 = vmatpush1.bf16.msra.mxu0 %v7920_v47  ;;  %v7979_v46 = vld [vmem:[#allocation81_spill] sm:$0xff]  ;;  %v7980_v47 = vld [vmem:[#allocation83_spill] sm:$0xff] }
 0xbe6   : > { %4007 = vmatprep.subr.bf16.mxu1 %v7921_v48  ;;  %3966 = vmatprep.subr.bf16.mxu0 %v7922_v51  ;;  %v7981_v48 = vld [vmem:[#allocation82_spill] sm:$0xff]  ;;  %v7982_v51 = vld [vmem:[#allocation84_spill] sm:$0xff] }
 0xbe9   : > { %4008 = vmatpush1.bf16.msra.mxu1 %v7923_v54  ;;  %3967 = vmatpush1.bf16.msra.mxu0 %v7924_v55  ;;  %v7983_v54 = vld [vmem:[#allocation85_spill] sm:$0xff]  ;;  %v7984_v55 = vld [vmem:[#allocation87_spill] sm:$0xff] }
 0xbea   : > { %4009 = vmatprep.subr.bf16.mxu1 %v7925_v56  ;;  %3968 = vmatprep.subr.bf16.mxu0 %v7926_v58  ;;  %v7985_v56 = vld [vmem:[#allocation86_spill] sm:$0xff]  ;;  %v7986_v58 = vld [vmem:[#allocation88_spill] sm:$0xff] }
 0xbed   : > { %4010 = vmatpush1.bf16.msra.mxu1 %v7927_v62  ;;  %3969 = vmatpush1.bf16.msra.mxu0 %v7928_v63  ;;  %v7988_v62 = vld [vmem:[#allocation91_spill] sm:$0xff]  ;;  %v7989_v63 = vld [vmem:[#allocation90_spill] sm:$0xff] }
 0xbee   : > { %4011 = vmatprep.subr.bf16.mxu1 %v7929_v2  ;;  %3970 = vmatprep.subr.bf16.mxu0 %v7930_v5  ;;  %v7990_v2 = vld [vmem:[#allocation92_spill] sm:$0xff]  ;;  %v7991_v5 = vld [vmem:[#allocation93_spill] sm:$0xff] }
 0xbf1   : > { %4012 = vmatpush1.bf16.msra.mxu1 %v7931_v7  ;;  %3971 = vmatpush1.bf16.msra.mxu0 %v7932_v11  ;;  %v7992_v7 = vld [vmem:[#allocation95_spill] sm:$0xff]  ;;  %v7993_v11 = vld [vmem:[#allocation94_spill] sm:$0xff] }
 0xbf2   : > { %4063 = vmatprep.subr.bf16.mxu1 %v7933_v16  ;;  %4022 = vmatprep.subr.bf16.mxu0 %v7934_v17  ;;  %v7994_v16 = vld [vmem:[#allocation96_spill] sm:$0xff]  ;;  %v7995_v17 = vld [vmem:[#allocation97_spill] sm:$0xff] }
 0xbf4   : > { %4014 = vmatmul.mubr.bf16.vlgmr.msra.gmra.mrb[56].mxu1 %v6979_v6  ;;  %3973 = vmatmul.mubr.bf16.vlgmr.msra.gmra.mrb[56].mxu0 %v6979_v6 }
 0xbf5   : > { %4064 = vmatpush1.bf16.msra.mxu1 %v7935_v18  ;;  %4023 = vmatpush1.bf16.msra.mxu0 %v7936_v25  ;;  %v7996_v18 = vld [vmem:[#allocation98_spill] sm:$0xff] }
 0xbf6   : > { %4065 = vmatprep.subr.bf16.mxu1 %v7937_v31  ;;  %4024 = vmatprep.subr.bf16.mxu0 %v7938_v35 }
 0xbf7   : > { %4095 = vmatprep.mubr.bf16.mxu1 %v6917_v13  ;;  %4054 = vmatprep.mubr.bf16.mxu0 %v6917_v13  ;;  %v7964_v13 = vld [vmem:[#allocation67_spill] sm:$0xff] }
 0xbf9   : > { %4066 = vmatpush1.bf16.msra.mxu1 %v7939_v53  ;;  %4025 = vmatpush1.bf16.msra.mxu0 %v7940_v43 }
 0xbfa   : > { %4067 = vmatprep.subr.bf16.mxu1 %v7941_v8  ;;  %4026 = vmatprep.subr.bf16.mxu0 %v7942_v23 }
 0xbfd   : > { %4068 = vmatpush1.bf16.msra.mxu1 %v7943_v49  ;;  %4027 = vmatpush1.bf16.msra.mxu0 %v7944_v37 }
 0xbfe   : > { %4069 = vmatprep.subr.bf16.mxu1 %v7945_v52  ;;  %4028 = vmatprep.subr.bf16.mxu0 %v7946_v4  ;;  %v3926_v52 = vld [vmem:[#allocation3 + $0x50] sm:$0xc0] }
 0xc01   : > { %4070 = vmatpush1.bf16.msra.mxu1 %v7947_v34  ;;  %4029 = vmatpush1.bf16.msra.mxu0 %v7948_v38  ;;  %v3927_v34 = vld [vmem:[#allocation3 + $0x58] sm:$0xc0] }
 0xc02   : > { %4071 = vmatprep.subr.bf16.mxu1 %v7949_v26  ;;  %4030 = vmatprep.subr.bf16.mxu0 %v7950_v44  ;;  %v3924_v26 = vld [vmem:[#allocation3 + $0x40] sm:$0xc0] }
 0xc05   : > { %4072 = vmatpush1.bf16.msra.mxu1 %v7951_v0  ;;  %4031 = vmatpush1.bf16.msra.mxu0 %v7952_v57  ;;  %v3925_v57 = vld [vmem:[#allocation3 + $0x48] sm:$0xc0] }
 0xc06   : > { %4073 = vmatprep.subr.bf16.mxu1 %v7953_v29  ;;  %4032 = vmatprep.subr.bf16.mxu0 %v7954_v59 }
 0xc09   : > { %4074 = vmatpush1.bf16.msra.mxu1 %v7955_v1  ;;  %4033 = vmatpush1.bf16.msra.mxu0 %v7956_v3 }
 0xc0a   : > { %4075 = vmatprep.subr.bf16.mxu1 %v7957_v19  ;;  %4034 = vmatprep.subr.bf16.mxu0 %v7958_v45 }
 0xc0d   : > { %4076 = vmatpush1.bf16.msra.mxu1 %v7959_v9  ;;  %4035 = vmatpush1.bf16.msra.mxu0 %v7960_v24  ;;  %v3930_v9 = vld [vmem:[#allocation3 + $0x70] sm:$0xc0] }
 0xc0e   : > { %4077 = vmatprep.subr.bf16.mxu1 %v7961_v12  ;;  %4036 = vmatprep.subr.bf16.mxu0 %v7962_v50  ;;  %v3931_v12 = vld [vmem:[#allocation3 + $0x78] sm:$0xc0]  ;;  %v3928_v50 = vld [vmem:[#allocation3 + $0x60] sm:$0xc0] }
 0xc11   : > { %4078 = vmatpush1.bf16.msra.mxu1 %v7963_v60  ;;  %4037 = vmatpush1.bf16.msra.mxu0 %v7964_v13 }
 0xc12   : > { %4079 = vmatprep.subr.bf16.mxu1 %v7965_v14  ;;  %4038 = vmatprep.subr.bf16.mxu0 %v7966_v15 }
 0xc15   : > { %4080 = vmatpush1.bf16.msra.mxu1 %v7967_v20  ;;  %4039 = vmatpush1.bf16.msra.mxu0 %v7968_v21  ;;  %v3929_v20 = vld [vmem:[#allocation3 + $0x68] sm:$0xc0] }
 0xc16   : > { %4081 = vmatprep.subr.bf16.mxu1 %v7969_v22  ;;  %4040 = vmatprep.subr.bf16.mxu0 %v7970_v27 }
 0xc19   : > { %4082 = vmatpush1.bf16.msra.mxu1 %v7971_v28  ;;  %4041 = vmatpush1.bf16.msra.mxu0 %v7972_v32 }
 0xc1a   : > { %4083 = vmatprep.subr.bf16.mxu1 %v7973_v33  ;;  %4042 = vmatprep.subr.bf16.mxu0 %v7974_v36 }
 0xc1d   : > { %4084 = vmatpush1.bf16.msra.mxu1 %v7975_v39  ;;  %4043 = vmatpush1.bf16.msra.mxu0 %v7976_v40 }
 0xc1e   : > { %4085 = vmatprep.subr.bf16.mxu1 %v7977_v41  ;;  %4044 = vmatprep.subr.bf16.mxu0 %v7978_v30 }
 0xc21   : > { %4086 = vmatpush1.bf16.msra.mxu1 %v7979_v46  ;;  %4045 = vmatpush1.bf16.msra.mxu0 %v7980_v47 }
 0xc22   : > { %4087 = vmatprep.subr.bf16.mxu1 %v7981_v48  ;;  %4046 = vmatprep.subr.bf16.mxu0 %v7982_v51 }
 0xc25   : > { %4088 = vmatpush1.bf16.msra.mxu1 %v7983_v54  ;;  %4047 = vmatpush1.bf16.msra.mxu0 %v7984_v55 }
 0xc26   : > { %4089 = vmatprep.subr.bf16.mxu1 %v7985_v56  ;;  %4048 = vmatprep.subr.bf16.mxu0 %v7986_v58 }
 0xc29   : > { %4090 = vmatpush1.bf16.msra.mxu1 %v7987_v61  ;;  %4049 = vmatpush1.bf16.msra.mxu0 %v7988_v62 }
 0xc2a   : > { %4091 = vmatprep.subr.bf16.mxu1 %v7989_v63  ;;  %4050 = vmatprep.subr.bf16.mxu0 %v7990_v2  ;;  %v4164_v2 = vrot.slane %v6900_v10, 6 }
 0xc2d   : > { %4092 = vmatpush1.bf16.msra.mxu1 %v7991_v5  ;;  %4051 = vmatpush1.bf16.msra.mxu0 %v7992_v7  ;;  %v4165_v7 = vrot.slane %v6902_v42, 6 }
 0xc2e   : > { %4093 = vmatprep.subr.bf16.mxu1 %v7993_v11  ;;  %4052 = vmatprep.subr.bf16.mxu0 %v7994_v16 }
 0xc31   : > { %4094 = vmatpush1.bf16.msra.mxu1 %v7995_v17  ;;  %4053 = vmatpush1.bf16.msra.mxu0 %v7996_v18 }
 0xc34   : > { %4096 = vmatmul.mubr.bf16.vlgmr.msra.gmra.mrb[60].mxu1 %v6979_v6  ;;  %4055 = vmatmul.mubr.bf16.vlgmr.msra.gmra.mrb[60].mxu0 %v6979_v6 }
 0xcc7   : > { %v4015_v25 = vpop.f32.mrb[56].mxu1  ;;  %v3974_v31 = vpop.f32.mrb[56].mxu0 }
 0xcc8   : > { %v4017_v35 = vpop.f32.mrb[57].mxu1  ;;  %v3976_v53 = vpop.f32.mrb[57].mxu0  ;;  %v4114_v37 = vrot.slane %v4015_v25, 2  ;;  %v4112_v38 = vrot.slane %v3974_v31, 2 }
 0xcc9   : > { %v4019_v43 = vpop.f32.mrb[58].mxu1  ;;  %v3978_v8 = vpop.f32.mrb[58].mxu0  ;;  %v4115_v4 = vrot.slane %v4017_v35, 2  ;;  %v4113_v44 = vrot.slane %v3976_v53, 2 }
 0xcca   : > { %v4020_v23 = vpop.f32.mrb[59].mxu1  ;;  %v3979_v49 = vpop.f32.mrb[59].mxu0  ;;  %v4130_v0 = vadd.f32 %v4114_v37, %v3926_v52  ;;  %v4128_v59 = vadd.f32 %v4112_v38, %v3924_v26 }
 0xccb   : > { %v4131_v29 = vadd.f32 %v4115_v4, %v3927_v34  ;;  %v4129_v6 = vadd.f32 %v4113_v44, %v3925_v57 }
 0xccc   : > { %v4138_v1 = vmul.f32 0.5, %v4130_v0  ;;  %v4136_v19 = vmul.f32 0.5, %v4128_v59 }
 0xccd   : > { %v4139_v3 = vmul.f32 0.5, %v4131_v29  ;;  %v4137_v45 = vmul.f32 0.5, %v4129_v6 }
 0xcce   : > { %5097 = vtanh.f32 %v4138_v1 }
 0xccf   : > { %5099 = vtanh.f32 %v4139_v3 }
 0xcd0   : > { %5101 = vtanh.f32 %v4136_v19 }
 0xcd1   : > { %5103 = vtanh.f32 %v4137_v45 }
 0xcd8   : > { %v5098_v46 = vpop.eup %5097 }
 0xcd9   : > { %v5100_v47 = vpop.eup %5099  ;;  %v4150_v56 = vmul.f32 0.5, %v5098_v46 }
 0xcda   : > { %v5102_v51 = vpop.eup %5101  ;;  %v4151_v58 = vmul.f32 0.5, %v5100_v47 }
 0xcdb   : > { %v5104_v55 = vpop.eup %5103  ;;  %v4148_v61 = vmul.f32 0.5, %v5102_v51  ;;  %v4156_v63 = vadd.f32 0.5, %v4150_v56 }
 0xcdc   : > { %v4149_v62 = vmul.f32 0.5, %v5104_v55  ;;  %v4157_v5 = vadd.f32 0.5, %v4151_v58 }
 0xcdd   : > { %v4154_v11 = vadd.f32 0.5, %v4148_v61  ;;  %v4168_v25 = vmul.f32 %v4164_v2, %v4156_v63 }
 0xcde   : > { %v4155_v17 = vadd.f32 0.5, %v4149_v62  ;;  %v4169_v35 = vmul.f32 %v4165_v7, %v4157_v5 }
 0xd07   : > { %v4097_v24 = vpop.f32.mrb[60].mxu1  ;;  %v4056_v60 = vpop.f32.mrb[60].mxu0 }
 0xd08   : > { %v4118_v13 = vrot.slane %v4097_v24, 2  ;;  %v4099_v14 = vpop.f32.mrb[61].mxu1  ;;  %v4116_v15 = vrot.slane %v4056_v60, 2  ;;  %v4058_v21 = vpop.f32.mrb[61].mxu0 }
 0xd09   : > { %v4119_v22 = vrot.slane %v4099_v14, 2  ;;  %v4101_v27 = vpop.f32.mrb[62].mxu1  ;;  %v4117_v28 = vrot.slane %v4058_v21, 2  ;;  %v4060_v32 = vpop.f32.mrb[62].mxu0 }
 0xd0a   : > { %v4134_v33 = vadd.f32 %v4118_v13, %v3930_v9  ;;  %v4102_v36 = vpop.f32.mrb[63].mxu1  ;;  %v4132_v39 = vadd.f32 %v4116_v15, %v3928_v50  ;;  %v4061_v40 = vpop.f32.mrb[63].mxu0 }
 0xd0b   : > { %v4135_v41 = vadd.f32 %v4119_v22, %v3931_v12  ;;  %v4133_v30 = vadd.f32 %v4117_v28, %v3929_v20 }
 0xd0c   : > { %5105 = vtanh.f32 %v4134_v33  ;;  %v4140_v48 = vmul.f32 0.5, %v4132_v39 }
 0xd0d   : > { %5107 = vtanh.f32 %v4135_v41  ;;  %v4141_v54 = vmul.f32 0.5, %v4133_v30 }
 0xd0e   : > { %5109 = vtanh.f32 %v4140_v48 }
 0xd0f   : > { %5111 = vtanh.f32 %v4141_v54 }
 0xd16   : > { %v5106_v16 = vpop.eup %5105 }
 0xd17   : > { %v5108_v18 = vpop.eup %5107  ;;  %v4170_v31 = vmul.f32 %v5106_v16, %v4154_v11 }
 0xd18   : > { %v4171_v53 = vmul.f32 %v5108_v18, %v4155_v17  ;;  %v5110_v23 = vpop.eup %5109 }
 0xd19   : > { %v4172_v43 = vadd.f32 %v4170_v31, %v4168_v25  ;;  %v5112_v49 = vpop.eup %5111  ;;  %v4152_v37 = vmul.f32 0.5, %v5110_v23 }
 0xd1a   : > { %v4173_v8 = vadd.f32 %v4171_v53, %v4169_v35  ;;  %v4153_v52 = vmul.f32 0.5, %v5112_v49 }
 0xd1b   : > { %5113 = vtanh.f32 %v4172_v43  ;;  %v4158_v10 = vadd.f32 0.5, %v4152_v37 }
 0xd1c   : > { %5115 = vtanh.f32 %v4173_v8  ;;  %v4159_v4 = vadd.f32 0.5, %v4153_v52 }
 0xd21   : > { %4180 = sbr.rel (%p4843_p8) target bundleno = 3370 (0xd2a), region = 92 }
 0xd25   : > { %v5114_v34 = vpop.eup %5113 }
 0xd26   : > { %v5116_v42 = vpop.eup %5115  ;;  %v4176_v38 = vmul.f32 %v5114_v34, %v4158_v10 }
 0xd27   : > { %v4177_v26 = vmul.f32 %v5116_v42, %v4159_v4 }
 0xd28   : > { %4181 = vst [vmem:[#allocation2 + $0x10] sm:$0xc0] %v4176_v38 }
 0xd29   : > { %4182 = vst [vmem:[#allocation2 + $0x18] sm:$0xc0] %v4177_v26 }
 0xd2a PF: > { %p4851_p9 = scmp.ne.s32.totalorder %s5236_s28, 2 }
 0xd2b   : > { %v5117_v44 = vld [vmem:[%s7166_s4 + $0x40] sm:$0xff] (!%p4851_p9)   ;;  %v4188_v0 = vpack.c.bf16 (!%p4851_p9), %v4177_v26, %v4177_v26  ;;  %v5182_v29 = vmov (!%p4851_p9), 0.0   ;;  %v5119_v59 = vld [vmem:[%s7166_s4 + $0x48] sm:$0xff] (!%p4851_p9)   ;;  %v5121_v3 = vld [vmem:[%s7166_s4 + $0x50] sm:$0xff] (!%p4851_p9)   ;;  %v4187_v27 = vpack.c.bf16 (!%p4851_p9), %v4176_v38, %v4176_v38  ;;  %vm5183_vm0 = vmmov (!%p4851_p9), 0  }
 0xd2c   : > { %4186 = sbr.rel (%p4851_p9) target bundleno = 3858 (0xf12), region = 96  ;;  %v5118_v57 = vld [vmem:[%s7166_s4] sm:$0xff] (!%p4851_p9)   ;;  %4919 = vmatprep.subr.bf16.mxu1 (!%p4851_p9), %v5182_v29  ;;  %4888 = vmatprep.subr.bf16.mxu0 (!%p4851_p9), %v5117_v44  ;;  %v5120_v1 = vld [vmem:[%s7166_s4 + $0x8] sm:$0xff] (!%p4851_p9)   ;;  %v5122_v19 = vld [vmem:[%s7166_s4 + $0x10] sm:$0xff] (!%p4851_p9)  }
 0xd2d   : > { %v4231_v6 = vrot.slane (!%p4851_p9), %v4188_v0, 3  ;;  %4889 = vmatpush3.bf16.msra.mxu0 (!%p4851_p9), %v5118_v57  ;;  %v5123_v45 = vld [vmem:[%s7166_s4 + $0x58] sm:$0xff] (!%p4851_p9)   ;;  %v5125_v24 = vld [vmem:[%s7166_s4 + $0x60] sm:$0xff] (!%p4851_p9)   ;;  %v5127_v50 = vld [vmem:[%s7166_s4 + $0x68] sm:$0xff] (!%p4851_p9)   ;;  %v4230_v33 = vrot.slane (!%p4851_p9), %v4187_v27, 3  ;;  %4935 = vmatprep.mubr.msk.bf16.mxu1 (!%p4851_p9), %vm5183_vm0, %v5182_v29 }
 0xd2e   : > { %4890 = vmatprep.subr.bf16.mxu0 (!%p4851_p9), %v5119_v59  ;;  %v5124_v9 = vld [vmem:[%s7166_s4 + $0x18] sm:$0xff] (!%p4851_p9)   ;;  %v5126_v12 = vld [vmem:[%s7166_s4 + $0x20] sm:$0xff] (!%p4851_p9)   ;;  %v5128_v13 = vld [vmem:[%s7166_s4 + $0x28] sm:$0xff] (!%p4851_p9)  }
 0xd2f   : > { %4362 = vmatprep.mubr.bf16.mxu0 (!%p4851_p9), %v4231_v6  ;;  %v5133_v60 = vld [vmem:[%s7168_s6] sm:$0xff] (!%p4851_p9)   ;;  %v5134_v14 = vld [vmem:[%s7168_s6 + $0x8] sm:$0xff] (!%p4851_p9)   ;;  %v5129_v15 = vld [vmem:[%s7166_s4 + $0x70] sm:$0xff] (!%p4851_p9)  }
 0xd30   : > { %4920 = vmatpush3.bf16.msra.mxu1 (!%p4851_p9), %v5133_v60  ;;  %v5135_v20 = vld [vmem:[%s7168_s6 + $0x10] sm:$0xff] (!%p4851_p9)   ;;  %v5131_v22 = vld [vmem:[%s7166_s4 + $0x78] sm:$0xff] (!%p4851_p9)   ;;  %v5137_v36 = vld [vmem:[%s7168_s6 + $0x20] sm:$0xff] (!%p4851_p9)  }
 0xd31   : > { %4891 = vmatpush3.bf16.msra.mxu0 (!%p4851_p9), %v5120_v1  ;;  %4921 = vmatprep.subr.bf16.mxu1 (!%p4851_p9), %v5182_v29  ;;  %v5130_v21 = vld [vmem:[%s7166_s4 + $0x30] sm:$0xff] (!%p4851_p9)   ;;  %v5136_v28 = vld [vmem:[%s7168_s6 + $0x18] sm:$0xff] (!%p4851_p9)   ;;  %v5138_v39 = vld [vmem:[%s7168_s6 + $0x28] sm:$0xff] (!%p4851_p9)  }
 0xd32   : > { %4892 = vmatprep.subr.bf16.mxu0 (!%p4851_p9), %v5121_v3  ;;  %v5132_v32 = vld [vmem:[%s7166_s4 + $0x38] sm:$0xff] (!%p4851_p9)   ;;  %v5139_v40 = vld [vmem:[%s7168_s6 + $0x30] sm:$0xff] (!%p4851_p9)   ;;  %v4852_v46 = vld [vmem:[%s7167_s5] ss:$0 sm:$0xff] (!%p4851_p9) }
 0xd33   : > { %v5140_v41 = vld [vmem:[%s7168_s6 + $0x38] sm:$0xff]   ;;  %v4869_v62 = vld [vmem:[%s7169_s7] ss:$0 sm:$0xff] }
 0xd34   : > { %4922 = vmatpush3.bf16.msra.mxu1 %v5134_v14 }
 0xd35   : > { %4893 = vmatpush3.bf16.msra.mxu0 %v5122_v19  ;;  %4923 = vmatprep.subr.bf16.mxu1 %v5182_v29 }
 0xd36   : > { %4894 = vmatprep.subr.bf16.mxu0 %v5123_v45 }
 0xd38   : > { %4924 = vmatpush3.bf16.msra.mxu1 %v5135_v20 }
 0xd39   : > { %4895 = vmatpush3.bf16.msra.mxu0 %v5124_v9  ;;  %4925 = vmatprep.subr.bf16.mxu1 %v5182_v29 }
 0xd3a   : > { %4896 = vmatprep.subr.bf16.mxu0 %v5125_v24 }
 0xd3c   : > { %4926 = vmatpush3.bf16.msra.mxu1 %v5136_v28 }
 0xd3d   : > { %4897 = vmatpush3.bf16.msra.mxu0 %v5126_v12  ;;  %4927 = vmatprep.subr.bf16.mxu1 %v5182_v29 }
 0xd3e   : > { %4898 = vmatprep.subr.bf16.mxu0 %v5127_v50 }
 0xd40   : > { %4928 = vmatpush3.bf16.msra.mxu1 %v5137_v36 }
 0xd41   : > { %4899 = vmatpush3.bf16.msra.mxu0 %v5128_v13  ;;  %4929 = vmatprep.subr.bf16.mxu1 %v5182_v29 }
 0xd42   : > { %4900 = vmatprep.subr.bf16.mxu0 %v5129_v15 }
 0xd44   : > { %4930 = vmatpush3.bf16.msra.mxu1 %v5138_v39 }
 0xd45   : > { %4901 = vmatpush3.bf16.msra.mxu0 %v5130_v21  ;;  %4931 = vmatprep.subr.bf16.mxu1 %v5182_v29 }
 0xd46   : > { %4902 = vmatprep.subr.bf16.mxu0 %v5131_v22 }
 0xd48   : > { %4932 = vmatpush3.bf16.msra.mxu1 %v5139_v40 }
 0xd49   : > { %4903 = vmatpush3.bf16.msra.mxu0 %v5132_v32  ;;  %4933 = vmatprep.subr.bf16.mxu1 %v5182_v29 }
 0xd4c   : > { %4363 = vmatmul.mubr.bf16.vlgmr.msra.gmra.mrb[0].mxu0 %v4230_v33  ;;  %4934 = vmatpush3.bf16.msra.mxu1 %v5140_v41 }
 0xe1f   : > { %v4904_v30 = vpop.f32.mrb[0].mxu0 }
 0xe20   : > { %v4905_v47 = vpop.f32.mrb[1].mxu0 }
 0xe21   : > { %v4906_v48 = vadd.f32 %v4905_v47, %v4904_v30  ;;  %v4907_v51 = vpop.f32.mrb[2].mxu0 }
 0xe22   : > { %v4908_v54 = vpop.f32.mrb[3].mxu0 }
 0xe23   : > { %v4365_v55 = vadd.f32 %v4906_v48, %v4852_v46 }
 0xe25   : > { %v4371_v56 = vmul.f32 0.01, %v4365_v55  ;;  %vm4370_vm1 = vcmp.ge.f32.partialorder %v4365_v55, 0.0 }
 0xe27   : > { %v4372_v58 = vsel %vm4370_vm1, %v4365_v55, %v4371_v56 }
 0xe28   : > { %v4373_v61 = vpack.c.bf16 %v4372_v58, %v4372_v58 }
 0xe2a   : > { %4936 = vmatmul.mubr.bf16.vlgmr.msra.gmra.mrb[0].mxu1 %v4373_v61 }
 0xefd   : > { %v4479_v63 = vpop.f32.mrb[0].mxu1 }
 0xefe   : > { %v4480_v2 = vadd.f32 %v4869_v62, %v4479_v63  ;;  %v4937_v5 = vpop.f32.mrb[1].mxu1 }
 0xeff   : > { %v4482_v7 = vpop.f32.mrb[2].mxu1 }
 0xf00   : > { %v4485_v11 = vmul.f32 0.5, %v4480_v2  ;;  %v4938_v16 = vpop.f32.mrb[3].mxu1 }
 0xf02   : > { %5141 = vtanh.f32 %v4485_v11 }
 0xf0c   : > { %v5142_v17 = vpop.eup %5141 }
 0xf0d   : > { %v4487_v18 = vmul.f32 0.5, %v5142_v17 }
 0xf0f   : > { %v4488_v25 = vadd.f32 0.5, %v4487_v18 }
 0xf11   : > { %4489 = vst [vmem:[#allocation4] sm:$0x3] %v4488_v25 }
 0xf12 PF: > { %p4943_p10 = scmp.eq.s32.totalorder %s5236_s28, 2  ;;  %s5184_s30 = smov [#allocation4]  }
 0xf13   : > { %s4497_s9 = sshll.u32 %s5184_s30, 4  ;;  %s4498_s9 = int_to_ptr.vmem [resolvable:$true] %s4497_s9 }
 0xf14   : > { %s5143_s10 = scalar_lea.vmem %s4498_s9, 32  ;;  %p5150_p0 = scmp.lt.s32.totalorder %s4498_s9, %s4498_s9 }
 0xf15   : > { %p5144_p11 = scmp.ne.s32.totalorder %s4498_s9, %s5143_s10  ;;  %p5151_p1 = scmp.lt.s32.totalorder %s5143_s10, %s5143_s10 }
 0xf17   : > { %p5145_p12 = pnand %p5144_p11, %p4943_p10  ;;  %p5152_p2 = por %p5151_p1, %p5150_p0 }
 0xf19   : > { %p5146_p13 = pneg %p5145_p12 }
 0xf1b   : > { %p5153_p3 = pnand %p5152_p2, %p5146_p13 }
 0xf1d   : > { %5156 = shalt.err (!%p5153_p3)
}
 0xf1e   : > { %s5157_s14 = scalar_lea.hbm %s7170_s8, 32 }
 0xf1f   : > { %p5158_p4 = scmp.ne.s32.totalorder %s7170_s8, %s5157_s14  ;;  %p5163_p7 = scmp.lt.u32.totalorder %s5157_s14, %s7170_s8 }
 0xf21   : > { %p5159_p5 = pnand %p5158_p4, %p4943_p10 }
 0xf23   : > { %p5160_p6 = pneg %p5159_p5 }
 0xf25   : > { %p5165_p8 = pnand %p5163_p7, %p5160_p6 }
 0xf27   : > { %5168 = shalt.err (!%p5165_p8)
}
 0xf28   : > { %4940 = dma.vmem_to_hbm [thread:$0]  (%p4943_p10), %s4498_s9, 32, %s7170_s8, [#allocation5]  }
 0xf29   : > { %5174 = dma.done.wait (%p4943_p10), [#allocation5], 32  }
 0xf2a   : > { %5176 = vsyncadd (%p4943_p10), [#allocation5], 4294967264 }
 0xf2b PF: > { %s19_s27 = sadd.s32 1, %s5179_s27  }
 0xf2c   : > { %p16_p9 = scmp.ge.s32.totalorder %s19_s27, 5  }
 0xf2e   :  { %18 = sbr.rel (!%p16_p9) target bundleno = 1 (0x1), region = 129 }
 0xf35   :  { %4510 = vsyncpa [#allocation5], 1 }
 0xf36   :  { %4512 = vsyncpa [#allocation5 + $0x1], 1 }

</bundles_post_ra>
